<compile_context>
chip_gen: v7x
topology: tpu7x:2x2x1
jax: 0.10.0
libtpu: 0.0.40
codegen_flags: <defaults>
</compile_context>

<pallas_src>
import math
import jax
import jax.numpy as jnp
from jax.experimental import pallas as pl
from jax.experimental.pallas import tpu as pltpu


def _pad_to(n, m):
    return ((n + m - 1) // m) * m


def _make_fused_encoder_kernel(num_layers):
    """Fused [Linear + ReLU] x num_layers kernel.

    Ref order: x_ref, w1, b1, w2, b2, ..., wL, bL, o_ref.
    x and weights are bf16; biases f32.  Each matmul accumulates in f32 on the
    MXU, bias add + ReLU run on the f32 accumulator, and only the feed to the
    next matmul is downcast to bf16.  Final output stays f32.
    """

    def kernel(x_ref, *refs):
        o_ref = refs[-1]
        h = x_ref[...]  # already bf16 (cast fused into the wrapper-side flatten)
        for l in range(num_layers):
            w_ref = refs[2 * l]
            b_ref = refs[2 * l + 1]
            acc = jnp.dot(h, w_ref[...], preferred_element_type=jnp.float32)
            acc = jnp.maximum(acc + b_ref[...], 0.0)  # bias bcast + ReLU in f32
            if l + 1 < num_layers:
                h = acc.astype(jnp.bfloat16)  # next MXU matmul takes bf16
            else:
                o_ref[...] = acc

    return kernel


def make_encoder_params(layercount, bottleneck, key):
    """Parameter init matching the torch module's shapes, pre-padded once.

    torch layer i (i < layercount-1): Linear(int(784/(i+1)) -> int(784/(i+2)))
    final layer:                      Linear(int(784/layercount) -> bottleneck)

    Weights use torch's default U(-1/sqrt(fan_in), 1/sqrt(fan_in)) init, are
    stored transposed to (in, out), zero-padded, and cast to bf16.  Layer 0
    keeps K = 784 unpadded (full-extent block; saves x DMA bytes); deeper K
    dims are padded to 128 so they line up with the previous layer's padded N.
    Biases are padded to (1, Np) in f32.

    Returns a list of (w_padded_bf16, b_padded_f32, (K, N)).
    """
    dims = []
    for i in range(layercount - 1):
        dims.append((int(28 * 28 / (i + 1)), int(28 * 28 / (i + 2))))
    dims.append((int(28 * 28 / layercount), bottleneck))

    params = []
    for layer_idx, (fan_in, fan_out) in enumerate(dims):
        key, kw, kb = jax.random.split(key, 3)
        bound = 1.0 / math.sqrt(fan_in)
        w_t = jax.random.uniform(kw, (fan_in, fan_out), jnp.float32, -bound, bound)
        b = jax.random.uniform(kb, (fan_out,), jnp.float32, -bound, bound)

        # Layer 0: K = 784 (already a multiple of 8 -> valid sublane extent).
        # Layer l>0: K padded to 128 so it equals the previous layer's padded N.
        Kp = fan_in if layer_idx == 0 else _pad_to(fan_in, 128)
        Np = _pad_to(fan_out, 128)
        wp = jnp.zeros((Kp, Np), jnp.float32).at[:fan_in, :fan_out].set(w_t)
        wp = wp.astype(jnp.bfloat16)
        # TODO(synk): optional gen-specific weight quantization (int8 on v6e,
        # fp8 e4m3 on v7x) would halve resident weight bytes again.
        bp = jnp.zeros((1, Np), jnp.float32).at[0, :fan_out].set(b)
        params.append((wp, bp, (fan_in, fan_out)))
    return params


def _pick_batch_tiling(M):
    """Pick (TM, Mp): single block for small batches; otherwise large tiles
    (<= 1024 rows), >= 2 grid steps (keeps both v7x TensorCores busy), and TM
    chosen to minimize padded rows (batch=257 pads to 272, not 512)."""
    if M <= 256:
        TM = max(8, _pad_to(M, 8))
        return TM, TM
    steps = max(2, -(-M // 1024))          # ceil(M / 1024), at least 2 steps
    TM = _pad_to(-(-M // steps), 8)        # ceil(M / steps), sublane-aligned
    return TM, TM * steps


def encoder_forward(x_nchw, params):
    """Forward pass: flatten (NCHW -> (B, C*H*W)), then fused Linear+ReLU stack."""
    B = x_nchw.shape[0]
    # nn.Flatten fused with the bf16 cast (halves x HBM traffic into the kernel).
    x = x_nchw.reshape(B, -1).astype(jnp.bfloat16)
    M, K0 = x.shape
    K0p = params[0][0].shape[0]
    assert K0 == K0p, (K0, K0p)  # module hard-codes 784 inputs

    TM, Mp = _pick_batch_tiling(M)
    # Row-pad only when needed; no column pad, no copy when already aligned.
    xp = x if Mp == M else jnp.pad(x, ((0, Mp - M), (0, 0)))

    num_layers = len(params)
    N_last = params[-1][2][1]
    Np_last = params[-1][0].shape[1]

    def build(weight_pipeline_mode):
        in_specs = [pl.BlockSpec((TM, K0p), lambda i: (i, 0))]
        for (wp, bp, _) in params:
            Kp, Np = wp.shape
            # Constant index_map -> weights/biases stay resident in VMEM.
            if weight_pipeline_mode is None:
                wspec = pl.BlockSpec((Kp, Np), lambda i: (0, 0))
                bspec = pl.BlockSpec((1, Np), lambda i: (0, 0))
            else:
                wspec = pl.BlockSpec((Kp, Np), lambda i: (0, 0),
                                     pipeline_mode=weight_pipeline_mode)
                bspec = pl.BlockSpec((1, Np), lambda i: (0, 0),
                                     pipeline_mode=weight_pipeline_mode)
            in_specs.append(wspec)
            in_specs.append(bspec)
        return pl.pallas_call(
            _make_fused_encoder_kernel(num_layers),
            out_shape=jax.ShapeDtypeStruct((Mp, Np_last), jnp.float32),
            grid=(Mp // TM,),
            in_specs=in_specs,
            out_specs=pl.BlockSpec((TM, Np_last), lambda i: (i, 0)),
            compiler_params=pltpu.CompilerParams(
                dimension_semantics=("parallel",),
                vmem_limit_bytes=32 * 1024 * 1024,
            ),
        )

    operands = [xp]
    for (wp, bp, _) in params:
        operands.append(wp)
        operands.append(bp)

    try:
        # Single pipeline buffer for the never-changing weight/bias blocks
        # (the default second buffer is dead VMEM).
        out_p = build(pl.Buffered(1))(*operands)
    except Exception:
        # Fallback: identical kernel with default buffering, for JAX versions
        # whose pallas_call pipeline rejects per-BlockSpec pipeline_mode.
        out_p = build(None)(*operands)

    return out_p[:M, :N_last]


def _reference_forward(x_nchw, params):
    """Plain-JAX reference with identical (bf16 operand, f32 accum) numerics."""
    B = x_nchw.shape[0]
    h = x_nchw.reshape(B, -1).astype(jnp.float32)
    for (wp, bp, (K, N)) in params:
        acc = jnp.dot(h.astype(jnp.bfloat16), wp[:K, :N],
                      preferred_element_type=jnp.float32)
        h = jnp.maximum(acc + bp[0, :N], 0.0)
    return h


if __name__ == "__main__":
    layercount = 3
    bottleneck = 32
    batch = 2

    key = jax.random.PRNGKey(0)
    key, kx = jax.random.split(key)

    # MNIST-shaped input in NCHW (B, 1, 28, 28) — the module hard-codes the
    # flattened size 784, so spatial dims cannot be shrunk.
    x = jax.random.normal(kx, (batch, 1, 28, 28), jnp.float32)

    params = make_encoder_params(layercount, bottleneck, key)

    out = encoder_forward(x, params)
    out = jax.block_until_ready(out)

    # Contract checks + numerical check against the bf16-matched reference.
    assert out.shape == (batch, bottleneck), out.shape
    assert bool(jnp.all(jnp.isfinite(out)))
    assert bool(jnp.all(out >= 0.0))  # ReLU output
    ref = _reference_forward(x, params)
    assert bool(jnp.allclose(out, ref, rtol=2e-2, atol=2e-2))

    print("KERNEL_OK")
</pallas_src>

<mosaic_0001>
module attributes {stable_mosaic.version = 11 : i64} {
  func.func @kernel(%arg0: i32, %arg1: memref<8x784xbf16, #tpu.memory_space<vmem>>, %arg2: memref<784x512xbf16, #tpu.memory_space<vmem>>, %arg3: memref<1x512xf32, #tpu.memory_space<vmem>>, %arg4: memref<512x384xbf16, #tpu.memory_space<vmem>>, %arg5: memref<1x384xf32, #tpu.memory_space<vmem>>, %arg6: memref<384x128xbf16, #tpu.memory_space<vmem>>, %arg7: memref<1x128xf32, #tpu.memory_space<vmem>>, %arg8: memref<8x128xf32, #tpu.memory_space<vmem>>) attributes {dimension_semantics = [#tpu.dimension_semantics<parallel>], iteration_bounds = array<i64: 1>, scalar_prefetch = 0 : i64, scratch_operands = 0 : i64, tpu.core_type = #tpu.core_type<tc>, window_params = [{transform_indices = @transform_0, window_bounds = array<i64: 8, 784>}, {pipeline_mode = #tpu.pipeline_mode<synchronous>, transform_indices = @transform_1, window_bounds = array<i64: 784, 512>}, {pipeline_mode = #tpu.pipeline_mode<synchronous>, transform_indices = @transform_2, window_bounds = array<i64: 1, 512>}, {pipeline_mode = #tpu.pipeline_mode<synchronous>, transform_indices = @transform_3, window_bounds = array<i64: 512, 384>}, {pipeline_mode = #tpu.pipeline_mode<synchronous>, transform_indices = @transform_4, window_bounds = array<i64: 1, 384>}, {pipeline_mode = #tpu.pipeline_mode<synchronous>, transform_indices = @transform_5, window_bounds = array<i64: 384, 128>}, {pipeline_mode = #tpu.pipeline_mode<synchronous>, transform_indices = @transform_6, window_bounds = array<i64: 1, 128>}, {transform_indices = @transform_7, window_bounds = array<i64: 8, 128>}]} {
    %c0 = arith.constant 0 : index
    %c0_0 = arith.constant 0 : index
    %0 = vector.load %arg1[%c0, %c0_0] : memref<8x784xbf16, #tpu.memory_space<vmem>>, vector<8x784xbf16>
    %c0_1 = arith.constant 0 : index
    %c0_2 = arith.constant 0 : index
    %1 = vector.load %arg2[%c0_1, %c0_2] : memref<784x512xbf16, #tpu.memory_space<vmem>>, vector<784x512xbf16>
    %cst = arith.constant dense<0.000000e+00> : vector<8x512xf32>
    %2 = tpu.matmul %0, %1, %cst {dimension_numbers = #tpu.dot_dimension_numbers<[1], [0], [0], [1], [0, 0, 1, 1], [], []>} : vector<8x784xbf16>, vector<784x512xbf16>, vector<8x512xf32> -> vector<8x512xf32>
    %c0_3 = arith.constant 0 : index
    %c0_4 = arith.constant 0 : index
    %3 = vector.load %arg3[%c0_3, %c0_4] : memref<1x512xf32, #tpu.memory_space<vmem>>, vector<1x512xf32>
    %4 = vector.broadcast %3 : vector<1x512xf32> to vector<8x512xf32>
    %5 = arith.addf %2, %4 : vector<8x512xf32>
    %cst_5 = arith.constant 0.000000e+00 : f32
    %6 = vector.broadcast %cst_5 : f32 to vector<8x512xf32>
    %7 = arith.maximumf %5, %6 : vector<8x512xf32>
    %8 = arith.truncf %7 : vector<8x512xf32> to vector<8x512xbf16>
    %c0_6 = arith.constant 0 : index
    %c0_7 = arith.constant 0 : index
    %9 = vector.load %arg4[%c0_6, %c0_7] : memref<512x384xbf16, #tpu.memory_space<vmem>>, vector<512x384xbf16>
    %cst_8 = arith.constant dense<0.000000e+00> : vector<8x384xf32>
    %10 = tpu.matmul %8, %9, %cst_8 {dimension_numbers = #tpu.dot_dimension_numbers<[1], [0], [0], [1], [0, 0, 1, 1], [], []>} : vector<8x512xbf16>, vector<512x384xbf16>, vector<8x384xf32> -> vector<8x384xf32>
    %c0_9 = arith.constant 0 : index
    %c0_10 = arith.constant 0 : index
    %11 = vector.load %arg5[%c0_9, %c0_10] : memref<1x384xf32, #tpu.memory_space<vmem>>, vector<1x384xf32>
    %12 = vector.broadcast %11 : vector<1x384xf32> to vector<8x384xf32>
    %13 = arith.addf %10, %12 : vector<8x384xf32>
    %cst_11 = arith.constant 0.000000e+00 : f32
    %14 = vector.broadcast %cst_11 : f32 to vector<8x384xf32>
    %15 = arith.maximumf %13, %14 : vector<8x384xf32>
    %16 = arith.truncf %15 : vector<8x384xf32> to vector<8x384xbf16>
    %c0_12 = arith.constant 0 : index
    %c0_13 = arith.constant 0 : index
    %17 = vector.load %arg6[%c0_12, %c0_13] : memref<384x128xbf16, #tpu.memory_space<vmem>>, vector<384x128xbf16>
    %cst_14 = arith.constant dense<0.000000e+00> : vector<8x128xf32>
    %18 = tpu.matmul %16, %17, %cst_14 {dimension_numbers = #tpu.dot_dimension_numbers<[1], [0], [0], [1], [0, 0, 1, 1], [], []>} : vector<8x384xbf16>, vector<384x128xbf16>, vector<8x128xf32> -> vector<8x128xf32>
    %c0_15 = arith.constant 0 : index
    %c0_16 = arith.constant 0 : index
    %19 = vector.load %arg7[%c0_15, %c0_16] : memref<1x128xf32, #tpu.memory_space<vmem>>, vector<1x128xf32>
    %20 = vector.broadcast %19 : vector<1x128xf32> to vector<8x128xf32>
    %21 = arith.addf %18, %20 : vector<8x128xf32>
    %cst_17 = arith.constant 0.000000e+00 : f32
    %22 = vector.broadcast %cst_17 : f32 to vector<8x128xf32>
    %23 = arith.maximumf %21, %22 : vector<8x128xf32>
    %c0_18 = arith.constant 0 : index
    %c0_19 = arith.constant 0 : index
    %24 = vector.load %arg8[%c0_18, %c0_19] : memref<8x128xf32, #tpu.memory_space<vmem>>, vector<8x128xf32>
    tpu.vector_store %arg8[%c0_18, %c0_19], %23 {strides = array<i32>} : memref<8x128xf32, #tpu.memory_space<vmem>>, vector<8x128xf32>,
    return
  }
  func.func @transform_0(%arg0: i32) -> (i32, i32) {
    %c0_i32 = arith.constant 0 : i32
    %c0_i32_0 = arith.constant 0 : i32
    return %arg0, %c0_i32 : i32, i32
  }
  func.func @transform_1(%arg0: i32) -> (i32, i32) {
    %c0_i32 = arith.constant 0 : i32
    %c0_i32_0 = arith.constant 0 : i32
    %c0_i32_1 = arith.constant 0 : i32
    return %c0_i32, %c0_i32_0 : i32, i32
  }
  func.func @transform_2(%arg0: i32) -> (i32, i32) {
    %c0_i32 = arith.constant 0 : i32
    %c0_i32_0 = arith.constant 0 : i32
    %c0_i32_1 = arith.constant 0 : i32
    return %c0_i32, %c0_i32_0 : i32, i32
  }
  func.func @transform_3(%arg0: i32) -> (i32, i32) {
    %c0_i32 = arith.constant 0 : i32
    %c0_i32_0 = arith.constant 0 : i32
    %c0_i32_1 = arith.constant 0 : i32
    return %c0_i32, %c0_i32_0 : i32, i32
  }
  func.func @transform_4(%arg0: i32) -> (i32, i32) {
    %c0_i32 = arith.constant 0 : i32
    %c0_i32_0 = arith.constant 0 : i32
    %c0_i32_1 = arith.constant 0 : i32
    return %c0_i32, %c0_i32_0 : i32, i32
  }
  func.func @transform_5(%arg0: i32) -> (i32, i32) {
    %c0_i32 = arith.constant 0 : i32
    %c0_i32_0 = arith.constant 0 : i32
    %c0_i32_1 = arith.constant 0 : i32
    return %c0_i32, %c0_i32_0 : i32, i32
  }
  func.func @transform_6(%arg0: i32) -> (i32, i32) {
    %c0_i32 = arith.constant 0 : i32
    %c0_i32_0 = arith.constant 0 : i32
    %c0_i32_1 = arith.constant 0 : i32
    return %c0_i32, %c0_i32_0 : i32, i32
  }
  func.func @transform_7(%arg0: i32) -> (i32, i32) {
    %c0_i32 = arith.constant 0 : i32
    %c0_i32_0 = arith.constant 0 : i32
    return %arg0, %c0_i32 : i32, i32
  }
}

module attributes {stable_mosaic.version = 11 : i64} {
  func.func @kernel(%arg0: i32, %arg1: memref<8x784xbf16, #tpu.memory_space<vmem>>, %arg2: memref<784x512xbf16, #tpu.memory_space<vmem>>, %arg3: memref<1x512xf32, #tpu.memory_space<vmem>>, %arg4: memref<512x384xbf16, #tpu.memory_space<vmem>>, %arg5: memref<1x384xf32, #tpu.memory_space<vmem>>, %arg6: memref<384x128xbf16, #tpu.memory_space<vmem>>, %arg7: memref<1x128xf32, #tpu.memory_space<vmem>>, %arg8: memref<8x128xf32, #tpu.memory_space<vmem>>) attributes {dimension_semantics = [#tpu.dimension_semantics<parallel>], iteration_bounds = array<i64: 1>, scalar_prefetch = 0 : i64, scratch_operands = 0 : i64, tpu.core_type = #tpu.core_type<tc>, window_params = [{transform_indices = @transform_0, window_bounds = array<i64: 8, 784>}, {pipeline_mode = #tpu.pipeline_mode<synchronous>, transform_indices = @transform_1, window_bounds = array<i64: 784, 512>}, {pipeline_mode = #tpu.pipeline_mode<synchronous>, transform_indices = @transform_2, window_bounds = array<i64: 1, 512>}, {pipeline_mode = #tpu.pipeline_mode<synchronous>, transform_indices = @transform_3, window_bounds = array<i64: 512, 384>}, {pipeline_mode = #tpu.pipeline_mode<synchronous>, transform_indices = @transform_4, window_bounds = array<i64: 1, 384>}, {pipeline_mode = #tpu.pipeline_mode<synchronous>, transform_indices = @transform_5, window_bounds = array<i64: 384, 128>}, {pipeline_mode = #tpu.pipeline_mode<synchronous>, transform_indices = @transform_6, window_bounds = array<i64: 1, 128>}, {transform_indices = @transform_7, window_bounds = array<i64: 8, 128>}]} {
    %c0 = arith.constant 0 : index
    %c0_0 = arith.constant 0 : index
    %0 = vector.load %arg1[%c0, %c0_0] : memref<8x784xbf16, #tpu.memory_space<vmem>>, vector<8x784xbf16>
    %c0_1 = arith.constant 0 : index
    %c0_2 = arith.constant 0 : index
    %1 = vector.load %arg2[%c0_1, %c0_2] : memref<784x512xbf16, #tpu.memory_space<vmem>>, vector<784x512xbf16>
    %cst = arith.constant dense<0.000000e+00> : vector<8x512xf32>
    %2 = tpu.matmul %0, %1, %cst {dimension_numbers = #tpu.dot_dimension_numbers<[1], [0], [0], [1], [0, 0, 1, 1], [], []>} : vector<8x784xbf16>, vector<784x512xbf16>, vector<8x512xf32> -> vector<8x512xf32>
    %c0_3 = arith.constant 0 : index
    %c0_4 = arith.constant 0 : index
    %3 = vector.load %arg3[%c0_3, %c0_4] : memref<1x512xf32, #tpu.memory_space<vmem>>, vector<1x512xf32>
    %4 = vector.broadcast %3 : vector<1x512xf32> to vector<8x512xf32>
    %5 = arith.addf %2, %4 : vector<8x512xf32>
    %cst_5 = arith.constant 0.000000e+00 : f32
    %6 = vector.broadcast %cst_5 : f32 to vector<8x512xf32>
    %7 = arith.maximumf %5, %6 : vector<8x512xf32>
    %8 = arith.truncf %7 : vector<8x512xf32> to vector<8x512xbf16>
    %c0_6 = arith.constant 0 : index
    %c0_7 = arith.constant 0 : index
    %9 = vector.load %arg4[%c0_6, %c0_7] : memref<512x384xbf16, #tpu.memory_space<vmem>>, vector<512x384xbf16>
    %cst_8 = arith.constant dense<0.000000e+00> : vector<8x384xf32>
    %10 = tpu.matmul %8, %9, %cst_8 {dimension_numbers = #tpu.dot_dimension_numbers<[1], [0], [0], [1], [0, 0, 1, 1], [], []>} : vector<8x512xbf16>, vector<512x384xbf16>, vector<8x384xf32> -> vector<8x384xf32>
    %c0_9 = arith.constant 0 : index
    %c0_10 = arith.constant 0 : index
    %11 = vector.load %arg5[%c0_9, %c0_10] : memref<1x384xf32, #tpu.memory_space<vmem>>, vector<1x384xf32>
    %12 = vector.broadcast %11 : vector<1x384xf32> to vector<8x384xf32>
    %13 = arith.addf %10, %12 : vector<8x384xf32>
    %cst_11 = arith.constant 0.000000e+00 : f32
    %14 = vector.broadcast %cst_11 : f32 to vector<8x384xf32>
    %15 = arith.maximumf %13, %14 : vector<8x384xf32>
    %16 = arith.truncf %15 : vector<8x384xf32> to vector<8x384xbf16>
    %c0_12 = arith.constant 0 : index
    %c0_13 = arith.constant 0 : index
    %17 = vector.load %arg6[%c0_12, %c0_13] : memref<384x128xbf16, #tpu.memory_space<vmem>>, vector<384x128xbf16>
    %cst_14 = arith.constant dense<0.000000e+00> : vector<8x128xf32>
    %18 = tpu.matmul %16, %17, %cst_14 {dimension_numbers = #tpu.dot_dimension_numbers<[1], [0], [0], [1], [0, 0, 1, 1], [], []>} : vector<8x384xbf16>, vector<384x128xbf16>, vector<8x128xf32> -> vector<8x128xf32>
    %c0_15 = arith.constant 0 : index
    %c0_16 = arith.constant 0 : index
    %19 = vector.load %arg7[%c0_15, %c0_16] : memref<1x128xf32, #tpu.memory_space<vmem>>, vector<1x128xf32>
    %20 = vector.broadcast %19 : vector<1x128xf32> to vector<8x128xf32>
    %21 = arith.addf %18, %20 : vector<8x128xf32>
    %cst_17 = arith.constant 0.000000e+00 : f32
    %22 = vector.broadcast %cst_17 : f32 to vector<8x128xf32>
    %23 = arith.maximumf %21, %22 : vector<8x128xf32>
    %c0_18 = arith.constant 0 : index
    %c0_19 = arith.constant 0 : index
    %24 = vector.load %arg8[%c0_18, %c0_19] : memref<8x128xf32, #tpu.memory_space<vmem>>, vector<8x128xf32>
    tpu.vector_store %arg8[%c0_18, %c0_19], %23 {strides = array<i32>} : memref<8x128xf32, #tpu.memory_space<vmem>>, vector<8x128xf32>,
    return
  }
  func.func @transform_0(%arg0: i32) -> (i32, i32) {
    %c0_i32 = arith.constant 0 : i32
    %c0_i32_0 = arith.constant 0 : i32
    return %arg0, %c0_i32 : i32, i32
  }
  func.func @transform_1(%arg0: i32) -> (i32, i32) {
    %c0_i32 = arith.constant 0 : i32
    %c0_i32_0 = arith.constant 0 : i32
    %c0_i32_1 = arith.constant 0 : i32
    return %c0_i32, %c0_i32_0 : i32, i32
  }
  func.func @transform_2(%arg0: i32) -> (i32, i32) {
    %c0_i32 = arith.constant 0 : i32
    %c0_i32_0 = arith.constant 0 : i32
    %c0_i32_1 = arith.constant 0 : i32
    return %c0_i32, %c0_i32_0 : i32, i32
  }
  func.func @transform_3(%arg0: i32) -> (i32, i32) {
    %c0_i32 = arith.constant 0 : i32
    %c0_i32_0 = arith.constant 0 : i32
    %c0_i32_1 = arith.constant 0 : i32
    return %c0_i32, %c0_i32_0 : i32, i32
  }
  func.func @transform_4(%arg0: i32) -> (i32, i32) {
    %c0_i32 = arith.constant 0 : i32
    %c0_i32_0 = arith.constant 0 : i32
    %c0_i32_1 = arith.constant 0 : i32
    return %c0_i32, %c0_i32_0 : i32, i32
  }
  func.func @transform_5(%arg0: i32) -> (i32, i32) {
    %c0_i32 = arith.constant 0 : i32
    %c0_i32_0 = arith.constant 0 : i32
    %c0_i32_1 = arith.constant 0 : i32
    return %c0_i32, %c0_i32_0 : i32, i32
  }
  func.func @transform_6(%arg0: i32) -> (i32, i32) {
    %c0_i32 = arith.constant 0 : i32
    %c0_i32_0 = arith.constant 0 : i32
    %c0_i32_1 = arith.constant 0 : i32
    return %c0_i32, %c0_i32_0 : i32, i32
  }
  func.func @transform_7(%arg0: i32) -> (i32, i32) {
    %c0_i32 = arith.constant 0 : i32
    %c0_i32_0 = arith.constant 0 : i32
    return %arg0, %c0_i32 : i32, i32
  }
}

</mosaic_0001>

<bundles_post_ra>
// kernel: tpu_custom_call.1
= control target key start
LH: loop header
LB: loop body
LE: loop exit
PB: predicated region body
PF: predicated region fallthrough
CT: control target
= control target key end

     0   :  { %12 = vsyncpa [#allocation3], 0  ;;  %s3972_s0 = inlined_call_operand.hbm [shape: bf16[8,784], index: 0, kind: input, shape index: {}]   ;;  %s3973_s1 = inlined_call_operand.hbm [shape: bf16[784,512], index: 1, kind: input, shape index: {}]   ;;  %s3974_s2 = inlined_call_operand.vmem [shape: f32[1,512], index: 2, kind: input, shape index: {}]   ;;  %s3975_s3 = inlined_call_operand.hbm [shape: bf16[512,384], index: 3, kind: input, shape index: {}]   ;;  %s3976_s4 = inlined_call_operand.vmem [shape: f32[1,384], index: 4, kind: input, shape index: {}]   ;;  %s3977_s5 = inlined_call_operand.hbm [shape: bf16[384,128], index: 5, kind: input, shape index: {}]   ;;  %s3978_s6 = inlined_call_operand.vmem [shape: f32[1,128], index: 6, kind: input, shape index: {}]   ;;  %s3979_s7 = inlined_call_operand.hbm [shape: f32[8,128], index: 7, kind: output, shape index: {}]  }
   0x1   :  { %13 = vsyncpa [#allocation6], 0 }
   0x2   :  { %14 = vsyncpa [#allocation9], 0 }
   0x3   :  { %15 = vsyncpa [#allocation4], 0  ;;  %s3810_s24 = smov [#allocation5]   ;;  %s3692_s28 = scalar_lea.hbm %s3973_s1, 25088 }
   0x4   :  { %s31_s25 = sshll.u32 %s3810_s24, 4  ;;  %p3693_p0 = scmp.ne.s32.totalorder %s3973_s1, %s3692_s28  ;;  %s32_s25 = int_to_ptr.vmem [resolvable:$true] %s31_s25 }
   0x5   :  { %p3696_p1 = scmp.lt.u32.totalorder %s3692_s28, %s3973_s1 }
   0x7   :  { %p3698_p2 = pnand %p3696_p1, %p3693_p0 }
   0x9   :  { %3701 = shalt.err (!%p3698_p2)
}
   0xa   :  { %s3702_s10 = scalar_lea.vmem %s32_s25, 25088  ;;  %p3707_p4 = scmp.lt.s32.totalorder %s32_s25, %s32_s25 }
   0xb   :  { %p3703_p3 = scmp.ne.s32.totalorder %s32_s25, %s3702_s10  ;;  %p3708_p5 = scmp.lt.s32.totalorder %s3702_s10, %s3702_s10 }
   0xd   :  { %p3709_p6 = por %p3708_p5, %p3707_p4 }
   0xf   :  { %p3710_p7 = pnand %p3709_p6, %p3703_p3 }
  0x11   :  { %3713 = shalt.err (!%p3710_p7)
}
  0x12   :  { %s3811_s11 = smov 256   ;;  %s3812_s12 = smov 16  }
  0x13   :  { %37 = dma.hbm_to_vmem [thread:$0]  %s3973_s1, 25088, %s32_s25, [#allocation6], %s3811_s11, %s3811_s11, %s3812_s12  }
  0x14   :  { %s3813_s15 = smov [#allocation2]   ;;  %s3814_s17 = smov [#allocation7]  }
  0x15   :  { %s22_s16 = sshll.u32 %s3813_s15, 4  ;;  %s45_s18 = sshll.u32 %s3814_s17, 4  ;;  %s23_s16 = int_to_ptr.vmem [resolvable:$true] %s22_s16  ;;  %s46_s18 = int_to_ptr.vmem [resolvable:$true] %s45_s18 }
  0x16   :  { %s3714_s21 = scalar_lea.hbm %s3972_s0, 448 }
  0x17   :  { %p3715_p8 = scmp.ne.s32.totalorder %s3972_s0, %s3714_s21  ;;  %p3718_p9 = scmp.lt.u32.totalorder %s3714_s21, %s3972_s0 }
  0x19   :  { %p3720_p10 = pnand %p3718_p9, %p3715_p8 }
  0x1b   :  { %3723 = shalt.err (!%p3720_p10)
}
  0x1c   :  { %s3724_s1 = scalar_lea.vmem %s23_s16, 448  ;;  %p3729_p12 = scmp.lt.s32.totalorder %s23_s16, %s23_s16 }
  0x1d   :  { %p3725_p11 = scmp.ne.s32.totalorder %s23_s16, %s3724_s1  ;;  %p3730_p13 = scmp.lt.s32.totalorder %s3724_s1, %s3724_s1 }
  0x1f   :  { %p3731_p0 = por %p3730_p13, %p3729_p12 }
  0x21   :  { %p3732_p1 = pnand %p3731_p0, %p3725_p11 }
  0x23   :  { %3735 = shalt.err (!%p3732_p1)
}
  0x24   :  { %25 = dma.hbm_to_vmem [thread:$0]  %s3972_s0, 448, %s23_s16, [#allocation3]  }
  0x25   :  { %s3736_s30 = scalar_lea.hbm %s3975_s3, 12288 }
  0x26   :  { %p3737_p2 = scmp.ne.s32.totalorder %s3975_s3, %s3736_s30  ;;  %p3740_p3 = scmp.lt.u32.totalorder %s3736_s30, %s3975_s3 }
  0x28   :  { %p3742_p4 = pnand %p3740_p3, %p3737_p2 }
  0x2a   :  { %3745 = shalt.err (!%p3742_p4)
}
  0x2b   :  { %s3746_s12 = scalar_lea.vmem %s46_s18, 12288  ;;  %p3751_p6 = scmp.lt.s32.totalorder %s46_s18, %s46_s18 }
  0x2c   :  { %p3747_p5 = scmp.ne.s32.totalorder %s46_s18, %s3746_s12  ;;  %p3752_p7 = scmp.lt.s32.totalorder %s3746_s12, %s3746_s12 }
  0x2e   :  { %p3753_p8 = por %p3752_p7, %p3751_p6 }
  0x30   :  { %p3754_p9 = pnand %p3753_p8, %p3747_p5 }
  0x32   :  { %3757 = shalt.err (!%p3754_p9)
}
  0x33   :  { %s3815_s0 = smov 192   ;;  %s3816_s13 = smov 12  }
  0x34   :  { %51 = dma.hbm_to_vmem [thread:$0]  %s3975_s3, 12288, %s46_s18, [#allocation6], %s3815_s0, %s3815_s0, %s3816_s13  }
  0x35   :  { %s3817_s16 = smov [#allocation8]   ;;  %s3758_s21 = scalar_lea.hbm %s3977_s5, 3072 }
  0x36   :  { %s59_s17 = sshll.u32 %s3817_s16, 4  ;;  %p3759_p10 = scmp.ne.s32.totalorder %s3977_s5, %s3758_s21  ;;  %s60_s17 = int_to_ptr.vmem [resolvable:$true] %s59_s17 }
  0x37   :  { %p3762_p11 = scmp.lt.u32.totalorder %s3758_s21, %s3977_s5 }
  0x39   :  { %p3764_p12 = pnand %p3762_p11, %p3759_p10 }
  0x3b   :  { %3767 = shalt.err (!%p3764_p12)
}
  0x3c   :  { %s3768_s1 = scalar_lea.vmem %s60_s17, 3072  ;;  %p3773_p0 = scmp.lt.s32.totalorder %s60_s17, %s60_s17 }
  0x3d   :  { %p3769_p13 = scmp.ne.s32.totalorder %s60_s17, %s3768_s1  ;;  %p3774_p1 = scmp.lt.s32.totalorder %s3768_s1, %s3768_s1 }
  0x3f   :  { %p3775_p2 = por %p3774_p1, %p3773_p0 }
  0x41   :  { %p3776_p3 = pnand %p3775_p2, %p3769_p13 }
  0x43   :  { %3779 = shalt.err (!%p3776_p3)
}
  0x44   :  { %s3818_s3 = smov 64   ;;  %s3819_s18 = smov 4  }
  0x45   :  { %65 = dma.hbm_to_vmem [thread:$0]  %s3977_s5, 3072, %s60_s17, [#allocation9], %s3818_s3, %s3818_s3, %s3819_s18  }
  0x46   :  { %3802 = dma.done.wait [#allocation3], 448  }
  0x47   :  { %3803 = vsyncadd [#allocation3], 4294966848 }
  0x48   :  { %3804 = dma.done.wait [#allocation6], 37376  }
  0x49   :  { %3805 = vsyncadd [#allocation6], 4294929920 }
  0x4a   :  { %3806 = dma.done.wait [#allocation9], 3072  }
  0x4b   :  { %3807 = vsyncadd [#allocation9], 4294964224  ;;  %v3239_v0 = vld [vmem:[#allocation5 + $0x4] ss:$16 sps:$4 sm:$0xff]   ;;  %v3241_v1 = vld [vmem:[#allocation5 + $0xc] ss:$16 sps:$4 sm:$0xff]  }
  0x4c   :  { %1311 = vmatprep.subr.bf16.mxu0 %v3239_v0  ;;  %v3243_v2 = vld [vmem:[#allocation5] ss:$16 sps:$4 sm:$0xff]   ;;  %v3244_v3 = vld [vmem:[#allocation5 + $0x8] ss:$16 sps:$4 sm:$0xff]   ;;  %1475 = vmatprep.subr.bf16.mxu1 %v3241_v1  ;;  %v3245_v4 = vld [vmem:[#allocation5 + $0x24] ss:$16 sps:$4 sm:$0xff]  }
  0x4d   :  { %1312 = vmatpush1.bf16.msra.mxu0 %v3243_v2  ;;  %1476 = vmatpush1.bf16.msra.mxu1 %v3244_v3  ;;  %v3247_v5 = vld [vmem:[#allocation5 + $0x2c] ss:$16 sps:$4 sm:$0xff]   ;;  %v3249_v6 = vld [vmem:[#allocation5 + $0x20] ss:$16 sps:$4 sm:$0xff]   ;;  %v3250_v7 = vld [vmem:[#allocation5 + $0x28] ss:$16 sps:$4 sm:$0xff]  }
  0x4e   :  { %1313 = vmatprep.subr.bf16.mxu0 %v3245_v4  ;;  %1477 = vmatprep.subr.bf16.mxu1 %v3247_v5  ;;  %v3251_v8 = vld [vmem:[#allocation5 + $0x44] ss:$16 sps:$4 sm:$0xff]   ;;  %v3253_v9 = vld [vmem:[#allocation5 + $0x4c] ss:$16 sps:$4 sm:$0xff]   ;;  %v3255_v10 = vld [vmem:[#allocation5 + $0x40] ss:$16 sps:$4 sm:$0xff]  }
  0x4f   :  { %v3256_v11 = vld [vmem:[#allocation5 + $0x48] ss:$16 sps:$4 sm:$0xff]   ;;  %v3257_v12 = vld [vmem:[#allocation5 + $0x64] ss:$16 sps:$4 sm:$0xff]   ;;  %v3259_v13 = vld [vmem:[#allocation5 + $0x6c] ss:$16 sps:$4 sm:$0xff]  }
  0x50   :  { %v3261_v14 = vld [vmem:[#allocation5 + $0x60] ss:$16 sps:$4 sm:$0xff]   ;;  %v3262_v15 = vld [vmem:[#allocation5 + $0x68] ss:$16 sps:$4 sm:$0xff]   ;;  %v3263_v16 = vld [vmem:[#allocation5 + $0x84] ss:$16 sps:$4 sm:$0xff]  }
  0x51   :  { %1314 = vmatpush1.bf16.msra.mxu0 %v3249_v6  ;;  %1478 = vmatpush1.bf16.msra.mxu1 %v3250_v7  ;;  %v3265_v17 = vld [vmem:[#allocation5 + $0x8c] ss:$16 sps:$4 sm:$0xff]   ;;  %v3267_v18 = vld [vmem:[#allocation5 + $0x80] ss:$16 sps:$4 sm:$0xff]   ;;  %v3268_v19 = vld [vmem:[#allocation5 + $0x88] ss:$16 sps:$4 sm:$0xff]  }
  0x52   :  { %1315 = vmatprep.subr.bf16.mxu0 %v3251_v8  ;;  %1479 = vmatprep.subr.bf16.mxu1 %v3253_v9  ;;  %v3269_v20 = vld [vmem:[#allocation5 + $0xa4] ss:$16 sps:$4 sm:$0xff]   ;;  %v3271_v21 = vld [vmem:[#allocation5 + $0xac] ss:$16 sps:$4 sm:$0xff]   ;;  %v3273_v22 = vld [vmem:[#allocation5 + $0xa0] ss:$16 sps:$4 sm:$0xff]  }
  0x53   :  { %v3274_v23 = vld [vmem:[#allocation5 + $0xa8] ss:$16 sps:$4 sm:$0xff]   ;;  %v3275_v24 = vld [vmem:[#allocation5 + $0xc4] ss:$16 sps:$4 sm:$0xff]   ;;  %v3277_v25 = vld [vmem:[#allocation5 + $0xcc] ss:$16 sps:$4 sm:$0xff]  }
  0x54   :  { %v3279_v26 = vld [vmem:[#allocation5 + $0xc0] ss:$16 sps:$4 sm:$0xff]   ;;  %v3280_v27 = vld [vmem:[#allocation5 + $0xc8] ss:$16 sps:$4 sm:$0xff]   ;;  %v3281_v28 = vld [vmem:[#allocation5 + $0xe4] ss:$16 sps:$4 sm:$0xff]  }
  0x55   :  { %1316 = vmatpush1.bf16.msra.mxu0 %v3255_v10  ;;  %1480 = vmatpush1.bf16.msra.mxu1 %v3256_v11  ;;  %v3283_v29 = vld [vmem:[#allocation5 + $0xec] ss:$16 sps:$4 sm:$0xff]   ;;  %v3285_v30 = vld [vmem:[#allocation5 + $0xe0] ss:$16 sps:$4 sm:$0xff]   ;;  %v3286_v31 = vld [vmem:[#allocation5 + $0xe8] ss:$16 sps:$4 sm:$0xff]  }
  0x56   :  { %1317 = vmatprep.subr.bf16.mxu0 %v3257_v12  ;;  %1481 = vmatprep.subr.bf16.mxu1 %v3259_v13  ;;  %v3287_v32 = vld [vmem:[#allocation5 + $0x104] ss:$16 sps:$4 sm:$0xff]   ;;  %v3289_v33 = vld [vmem:[#allocation5 + $0x10c] ss:$16 sps:$4 sm:$0xff]   ;;  %v3291_v34 = vld [vmem:[#allocation5 + $0x100] ss:$16 sps:$4 sm:$0xff]  }
  0x57   :  { %v3292_v35 = vld [vmem:[#allocation5 + $0x108] ss:$16 sps:$4 sm:$0xff]   ;;  %v3293_v36 = vld [vmem:[#allocation5 + $0x124] ss:$16 sps:$4 sm:$0xff]   ;;  %v3295_v37 = vld [vmem:[#allocation5 + $0x12c] ss:$16 sps:$4 sm:$0xff]  }
  0x58   :  { %v3297_v38 = vld [vmem:[#allocation5 + $0x120] ss:$16 sps:$4 sm:$0xff]   ;;  %v3298_v39 = vld [vmem:[#allocation5 + $0x128] ss:$16 sps:$4 sm:$0xff]   ;;  %v3299_v40 = vld [vmem:[#allocation5 + $0x144] ss:$16 sps:$4 sm:$0xff]  }
  0x59   :  { %1318 = vmatpush1.bf16.msra.mxu0 %v3261_v14  ;;  %1482 = vmatpush1.bf16.msra.mxu1 %v3262_v15  ;;  %v3301_v41 = vld [vmem:[#allocation5 + $0x14c] ss:$16 sps:$4 sm:$0xff]   ;;  %v3303_v42 = vld [vmem:[#allocation5 + $0x140] ss:$16 sps:$4 sm:$0xff]   ;;  %v3304_v43 = vld [vmem:[#allocation5 + $0x148] ss:$16 sps:$4 sm:$0xff]  }
  0x5a   :  { %1319 = vmatprep.subr.bf16.mxu0 %v3263_v16  ;;  %1483 = vmatprep.subr.bf16.mxu1 %v3265_v17  ;;  %v3305_v44 = vld [vmem:[#allocation5 + $0x164] ss:$16 sps:$4 sm:$0xff]   ;;  %v3307_v45 = vld [vmem:[#allocation5 + $0x16c] ss:$16 sps:$4 sm:$0xff]   ;;  %v3309_v47 = vld [vmem:[#allocation5 + $0x160] ss:$16 sps:$4 sm:$0xff]  }
  0x5b   :  { %v81_v46 = vld [vmem:[#allocation2] sm:$0xff]  ;;  %v3313_v51 = vld [vmem:[#allocation5 + $0x18c] ss:$16 sps:$4 sm:$0xff]   ;;  %v3315_v52 = vld [vmem:[#allocation5 + $0x180] ss:$16 sps:$4 sm:$0xff]   ;;  %vm1307_vm0 = vcmask 130048  }
  0x5c   :  { %v2771_v48 = vcombine.high %v81_v46, %v81_v46  ;;  %v3310_v49 = vld [vmem:[#allocation5 + $0x168] ss:$16 sps:$4 sm:$0xff]   ;;  %v3311_v50 = vld [vmem:[#allocation5 + $0x184] ss:$16 sps:$4 sm:$0xff]   ;;  %v3319_v55 = vld [vmem:[#allocation5 + $0x1ac] ss:$16 sps:$4 sm:$0xff]   ;;  %v2770_v4 = vcombine.low %v81_v46, %v81_v46 }
  0x5d   :  { %1320 = vmatpush1.bf16.msra.mxu0 %v3267_v18  ;;  %1484 = vmatpush1.bf16.msra.mxu1 %v3268_v19  ;;  %v3316_v53 = vld [vmem:[#allocation5 + $0x188] ss:$16 sps:$4 sm:$0xff]   ;;  %v3317_v54 = vld [vmem:[#allocation5 + $0x1a4] ss:$16 sps:$4 sm:$0xff]   ;;  %v3321_v56 = vld [vmem:[#allocation5 + $0x1a0] ss:$16 sps:$4 sm:$0xff]  }
  0x5e   :  { %1321 = vmatprep.subr.bf16.mxu0 %v3269_v20  ;;  %1485 = vmatprep.subr.bf16.mxu1 %v3271_v21  ;;  %v3322_v57 = vld [vmem:[#allocation5 + $0x1a8] ss:$16 sps:$4 sm:$0xff]   ;;  %v3323_v58 = vld [vmem:[#allocation5 + $0x1c4] ss:$16 sps:$4 sm:$0xff]   ;;  %v3325_v59 = vld [vmem:[#allocation5 + $0x1cc] ss:$16 sps:$4 sm:$0xff]  }
  0x5f   :  { %1343 = vmatprep.mubr.bf16.mxu0 %v2771_v48  ;;  %1507 = vmatprep.mubr.bf16.mxu1 %v2771_v48  ;;  %v3327_v60 = vld [vmem:[#allocation5 + $0x1c0] ss:$16 sps:$4 sm:$0xff]   ;;  %v3328_v61 = vld [vmem:[#allocation5 + $0x1c8] ss:$16 sps:$4 sm:$0xff]   ;;  %v3329_v62 = vld [vmem:[#allocation5 + $0x1e4] ss:$16 sps:$4 sm:$0xff]  }
  0x60   :  { %v3331_v63 = vld [vmem:[#allocation5 + $0x1ec] ss:$16 sps:$4 sm:$0xff]   ;;  %v3333_v0 = vld [vmem:[#allocation5 + $0x1e0] ss:$16 sps:$4 sm:$0xff]   ;;  %v3334_v1 = vld [vmem:[#allocation5 + $0x1e8] ss:$16 sps:$4 sm:$0xff]  }
  0x61   :  { %1322 = vmatpush1.bf16.msra.mxu0 %v3273_v22  ;;  %1486 = vmatpush1.bf16.msra.mxu1 %v3274_v23  ;;  %v3339_v2 = vld [vmem:[#allocation5 + $0x204] ss:$16 sps:$4 sm:$0xff]   ;;  %v3342_v3 = vld [vmem:[#allocation5 + $0x20c] ss:$16 sps:$4 sm:$0xff]   ;;  %v3337_v5 = vld [vmem:[#allocation5 + $0x200] ss:$16 sps:$4 sm:$0xff]  }
  0x62   :  { %1323 = vmatprep.subr.bf16.mxu0 %v3275_v24  ;;  %1487 = vmatprep.subr.bf16.mxu1 %v3277_v25  ;;  %v3340_v6 = vld [vmem:[#allocation5 + $0x208] ss:$16 sps:$4 sm:$0xff]   ;;  %v3345_v7 = vld [vmem:[#allocation5 + $0x224] ss:$16 sps:$4 sm:$0xff]   ;;  %v3348_v8 = vld [vmem:[#allocation5 + $0x22c] ss:$16 sps:$4 sm:$0xff]  }
  0x63   :  { %v3343_v9 = vld [vmem:[#allocation5 + $0x220] ss:$16 sps:$4 sm:$0xff]   ;;  %v3346_v10 = vld [vmem:[#allocation5 + $0x228] ss:$16 sps:$4 sm:$0xff]   ;;  %v3351_v11 = vld [vmem:[#allocation5 + $0x244] ss:$16 sps:$4 sm:$0xff]  }
  0x64   :  { %v3354_v12 = vld [vmem:[#allocation5 + $0x24c] ss:$16 sps:$4 sm:$0xff]   ;;  %v3349_v13 = vld [vmem:[#allocation5 + $0x240] ss:$16 sps:$4 sm:$0xff]   ;;  %v3352_v14 = vld [vmem:[#allocation5 + $0x248] ss:$16 sps:$4 sm:$0xff]  }
  0x65   :  { %1324 = vmatpush1.bf16.msra.mxu0 %v3279_v26  ;;  %1488 = vmatpush1.bf16.msra.mxu1 %v3280_v27  ;;  %v3357_v15 = vld [vmem:[#allocation5 + $0x264] ss:$16 sps:$4 sm:$0xff]   ;;  %v3360_v16 = vld [vmem:[#allocation5 + $0x26c] ss:$16 sps:$4 sm:$0xff]   ;;  %v3355_v17 = vld [vmem:[#allocation5 + $0x260] ss:$16 sps:$4 sm:$0xff]  }
  0x66   :  { %1325 = vmatprep.subr.bf16.mxu0 %v3281_v28  ;;  %1489 = vmatprep.subr.bf16.mxu1 %v3283_v29  ;;  %v3358_v18 = vld [vmem:[#allocation5 + $0x268] ss:$16 sps:$4 sm:$0xff]   ;;  %v3363_v19 = vld [vmem:[#allocation5 + $0x284] ss:$16 sps:$4 sm:$0xff]   ;;  %v3366_v20 = vld [vmem:[#allocation5 + $0x28c] ss:$16 sps:$4 sm:$0xff]  }
  0x67   :  { %v3361_v21 = vld [vmem:[#allocation5 + $0x280] ss:$16 sps:$4 sm:$0xff]   ;;  %v3364_v22 = vld [vmem:[#allocation5 + $0x288] ss:$16 sps:$4 sm:$0xff]   ;;  %v3369_v23 = vld [vmem:[#allocation5 + $0x2a4] ss:$16 sps:$4 sm:$0xff]  }
  0x68   :  { %v3372_v24 = vld [vmem:[#allocation5 + $0x2ac] ss:$16 sps:$4 sm:$0xff]   ;;  %v3367_v25 = vld [vmem:[#allocation5 + $0x2a0] ss:$16 sps:$4 sm:$0xff]   ;;  %v3370_v26 = vld [vmem:[#allocation5 + $0x2a8] ss:$16 sps:$4 sm:$0xff]  }
  0x69   :  { %1326 = vmatpush1.bf16.msra.mxu0 %v3285_v30  ;;  %1490 = vmatpush1.bf16.msra.mxu1 %v3286_v31  ;;  %v3375_v27 = vld [vmem:[#allocation5 + $0x2c4] ss:$16 sps:$4 sm:$0xff]   ;;  %v3378_v28 = vld [vmem:[#allocation5 + $0x2cc] ss:$16 sps:$4 sm:$0xff]   ;;  %v3373_v31 = vld [vmem:[#allocation5 + $0x2c0] ss:$16 sps:$4 sm:$0xff]  }
  0x6a   :  { %1327 = vmatprep.subr.bf16.mxu0 %v3287_v32  ;;  %1491 = vmatprep.subr.bf16.mxu1 %v3289_v33  ;;  %v3912_v29 = vld [vmem:[#allocation2 + $0x8] sm:$0xff]  ;;  %v3376_v32 = vld [vmem:[#allocation5 + $0x2c8] ss:$16 sps:$4 sm:$0xff]   ;;  %v3381_v33 = vld [vmem:[#allocation5 + $0x2e4] ss:$16 sps:$4 sm:$0xff]   ;;  %vm3822_vm1 = vmmov 0  }
  0x6b   :  { %v2773_v30 = vcombine.high %v3912_v29, %v3912_v29  ;;  %v3402_v46 = vld [vmem:[#allocation5 + $0x34c] ss:$16 sps:$4 sm:$0xff]   ;;  %v3400_v48 = vld [vmem:[#allocation5 + $0x348] ss:$16 sps:$4 sm:$0xff]   ;;  %s3823_s8 = smov [#allocation10]  }
  0x6c   :  { %s2759_s9 = sshll.u32 %s3823_s8, 4  ;;  %s2760_s9 = int_to_ptr.vmem [resolvable:$true] %s2759_s9 }
  0x6d   :  { %1328 = vmatpush1.bf16.msra.mxu0 %v3291_v34  ;;  %1492 = vmatpush1.bf16.msra.mxu1 %v3292_v35  ;;  %v3384_v34 = vld [vmem:[#allocation5 + $0x2ec] ss:$16 sps:$4 sm:$0xff]   ;;  %v3379_v35 = vld [vmem:[#allocation5 + $0x2e0] ss:$16 sps:$4 sm:$0xff]   ;;  %s3780_s10 = scalar_lea.vmem %s2760_s9, 128  ;;  %p3785_p5 = scmp.lt.s32.totalorder %s2760_s9, %s2760_s9 }
  0x6e   :  { %1329 = vmatprep.subr.bf16.mxu0 %v3293_v36  ;;  %1493 = vmatprep.subr.bf16.mxu1 %v3295_v37  ;;  %v3382_v36 = vld [vmem:[#allocation5 + $0x2e8] ss:$16 sps:$4 sm:$0xff]   ;;  %v3387_v37 = vld [vmem:[#allocation5 + $0x304] ss:$16 sps:$4 sm:$0xff]   ;;  %p3781_p4 = scmp.ne.s32.totalorder %s2760_s9, %s3780_s10  ;;  %p3786_p6 = scmp.lt.s32.totalorder %s3780_s10, %s3780_s10 }
  0x70   :  { %p3787_p7 = por %p3786_p6, %p3785_p5 }
  0x71   :  { %1330 = vmatpush1.bf16.msra.mxu0 %v3297_v38  ;;  %1494 = vmatpush1.bf16.msra.mxu1 %v3298_v39  ;;  %v3390_v38 = vld [vmem:[#allocation5 + $0x30c] ss:$16 sps:$4 sm:$0xff]   ;;  %v3385_v39 = vld [vmem:[#allocation5 + $0x300] ss:$16 sps:$4 sm:$0xff]  }
  0x72   :  { %1331 = vmatprep.subr.bf16.mxu0 %v3299_v40  ;;  %1495 = vmatprep.subr.bf16.mxu1 %v3301_v41  ;;  %v3388_v40 = vld [vmem:[#allocation5 + $0x308] ss:$16 sps:$4 sm:$0xff]   ;;  %v3393_v41 = vld [vmem:[#allocation5 + $0x324] ss:$16 sps:$4 sm:$0xff]   ;;  %p3788_p8 = pnand %p3787_p7, %p3781_p4 }
  0x75   :  { %1332 = vmatpush1.bf16.msra.mxu0 %v3303_v42  ;;  %1496 = vmatpush1.bf16.msra.mxu1 %v3304_v43  ;;  %v3396_v42 = vld [vmem:[#allocation5 + $0x32c] ss:$16 sps:$4 sm:$0xff]   ;;  %v3391_v43 = vld [vmem:[#allocation5 + $0x320] ss:$16 sps:$4 sm:$0xff]  }
  0x76   :  { %1333 = vmatprep.subr.bf16.mxu0 %v3305_v44  ;;  %1497 = vmatprep.subr.bf16.mxu1 %v3307_v45  ;;  %v3394_v44 = vld [vmem:[#allocation5 + $0x328] ss:$16 sps:$4 sm:$0xff]   ;;  %v3399_v45 = vld [vmem:[#allocation5 + $0x344] ss:$16 sps:$4 sm:$0xff]  }
  0x79   :  { %1334 = vmatpush1.bf16.msra.mxu0 %v3309_v47  ;;  %1498 = vmatpush1.bf16.msra.mxu1 %v3310_v49  ;;  %v3397_v47 = vld [vmem:[#allocation5 + $0x340] ss:$16 sps:$4 sm:$0xff]   ;;  %v3405_v49 = vld [vmem:[#allocation5 + $0x364] ss:$16 sps:$4 sm:$0xff]  }
  0x7a   :  { %1335 = vmatprep.subr.bf16.mxu0 %v3311_v50  ;;  %1499 = vmatprep.subr.bf16.mxu1 %v3313_v51  ;;  %v3408_v50 = vld [vmem:[#allocation5 + $0x36c] ss:$16 sps:$4 sm:$0xff]   ;;  %v3403_v51 = vld [vmem:[#allocation5 + $0x360] ss:$16 sps:$4 sm:$0xff]  }
  0x7d   :  { %1336 = vmatpush1.bf16.msra.mxu0 %v3315_v52  ;;  %1500 = vmatpush1.bf16.msra.mxu1 %v3316_v53  ;;  %v3406_v52 = vld [vmem:[#allocation5 + $0x368] ss:$16 sps:$4 sm:$0xff]   ;;  %v3411_v53 = vld [vmem:[#allocation5 + $0x384] ss:$16 sps:$4 sm:$0xff]  }
  0x7e   :  { %1337 = vmatprep.subr.bf16.mxu0 %v3317_v54  ;;  %1501 = vmatprep.subr.bf16.mxu1 %v3319_v55  ;;  %v3414_v54 = vld [vmem:[#allocation5 + $0x38c] ss:$16 sps:$4 sm:$0xff]   ;;  %v3409_v55 = vld [vmem:[#allocation5 + $0x380] ss:$16 sps:$4 sm:$0xff]  }
  0x81   :  { %1338 = vmatpush1.bf16.msra.mxu0 %v3321_v56  ;;  %1502 = vmatpush1.bf16.msra.mxu1 %v3322_v57  ;;  %v3412_v56 = vld [vmem:[#allocation5 + $0x388] ss:$16 sps:$4 sm:$0xff]   ;;  %v3417_v57 = vld [vmem:[#allocation5 + $0x3a4] ss:$16 sps:$4 sm:$0xff]  }
  0x82   :  { %1339 = vmatprep.subr.bf16.mxu0 %v3323_v58  ;;  %1503 = vmatprep.subr.bf16.mxu1 %v3325_v59  ;;  %v3420_v58 = vld [vmem:[#allocation5 + $0x3ac] ss:$16 sps:$4 sm:$0xff]   ;;  %v3415_v59 = vld [vmem:[#allocation5 + $0x3a0] ss:$16 sps:$4 sm:$0xff]  }
  0x85   :  { %1340 = vmatpush1.bf16.msra.mxu0 %v3327_v60  ;;  %1504 = vmatpush1.bf16.msra.mxu1 %v3328_v61  ;;  %v3418_v60 = vld [vmem:[#allocation5 + $0x3a8] ss:$16 sps:$4 sm:$0xff]   ;;  %v3423_v61 = vld [vmem:[#allocation5 + $0x3c4] ss:$16 sps:$4 sm:$0xff]  }
  0x86   :  { %1341 = vmatprep.subr.bf16.mxu0 %v3329_v62  ;;  %1505 = vmatprep.subr.bf16.mxu1 %v3331_v63  ;;  %v3426_v62 = vld [vmem:[#allocation5 + $0x3cc] ss:$16 sps:$4 sm:$0xff]   ;;  %v3421_v63 = vld [vmem:[#allocation5 + $0x3c0] ss:$16 sps:$4 sm:$0xff]  }
  0x89   :  { %1342 = vmatpush1.bf16.msra.mxu0 %v3333_v0  ;;  %1506 = vmatpush1.bf16.msra.mxu1 %v3334_v1  ;;  %v3424_v0 = vld [vmem:[#allocation5 + $0x3c8] ss:$16 sps:$4 sm:$0xff]   ;;  %v3429_v1 = vld [vmem:[#allocation5 + $0x3e4] ss:$16 sps:$4 sm:$0xff]  }
  0x8a   :  { %1352 = vmatprep.subr.bf16.mxu0 %v3339_v2  ;;  %1516 = vmatprep.subr.bf16.mxu1 %v3342_v3  ;;  %v3432_v2 = vld [vmem:[#allocation5 + $0x3ec] ss:$16 sps:$4 sm:$0xff]   ;;  %v3427_v3 = vld [vmem:[#allocation5 + $0x3e0] ss:$16 sps:$4 sm:$0xff]  }
  0x8c   :  { %1344 = vmatmul.mubr.bf16.vlgmr.msra.gmra.mrb[0].mxu0 %v2770_v4  ;;  %1508 = vmatmul.mubr.bf16.vlgmr.msra.gmra.mrb[0].mxu1 %v2770_v4  ;;  %v3430_v4 = vld [vmem:[#allocation5 + $0x3e8] ss:$16 sps:$4 sm:$0xff]  }
  0x8d   :  { %1353 = vmatpush1.bf16.msra.mxu0 %v3337_v5  ;;  %1517 = vmatpush1.bf16.msra.mxu1 %v3340_v6  ;;  %v3437_v5 = vld [vmem:[#allocation5 + $0x404] ss:$16 sps:$4 sm:$0xff]   ;;  %v3440_v6 = vld [vmem:[#allocation5 + $0x40c] ss:$16 sps:$4 sm:$0xff]  }
  0x8e   :  { %1354 = vmatprep.subr.bf16.mxu0 %v3345_v7  ;;  %1518 = vmatprep.subr.bf16.mxu1 %v3348_v8  ;;  %v2772_v7 = vcombine.low %v3912_v29, %v3912_v29  ;;  %v3435_v8 = vld [vmem:[#allocation5 + $0x400] ss:$16 sps:$4 sm:$0xff]   ;;  %v3470_v29 = vld [vmem:[#allocation5 + $0x4ac] ss:$16 sps:$4 sm:$0xff]  }
  0x8f   :  { %1384 = vmatprep.mubr.bf16.mxu0 %v2773_v30  ;;  %1548 = vmatprep.mubr.bf16.mxu1 %v2773_v30  ;;  %v3465_v30 = vld [vmem:[#allocation5 + $0x4a0] ss:$16 sps:$4 sm:$0xff]  }
  0x91   :  { %1355 = vmatpush1.bf16.msra.mxu0 %v3343_v9  ;;  %1519 = vmatpush1.bf16.msra.mxu1 %v3346_v10  ;;  %v3438_v9 = vld [vmem:[#allocation5 + $0x408] ss:$16 sps:$4 sm:$0xff]   ;;  %v3443_v10 = vld [vmem:[#allocation5 + $0x424] ss:$16 sps:$4 sm:$0xff]  }
  0x92   :  { %1356 = vmatprep.subr.bf16.mxu0 %v3351_v11  ;;  %1520 = vmatprep.subr.bf16.mxu1 %v3354_v12  ;;  %v3918_v11 = vld [vmem:[#allocation2 + $0x10] sm:$0xff]  ;;  %v3446_v12 = vld [vmem:[#allocation5 + $0x42c] ss:$16 sps:$4 sm:$0xff]  }
  0x95   :  { %1357 = vmatpush1.bf16.msra.mxu0 %v3349_v13  ;;  %1521 = vmatpush1.bf16.msra.mxu1 %v3352_v14  ;;  %v2775_v13 = vcombine.high %v3918_v11, %v3918_v11  ;;  %v3441_v14 = vld [vmem:[#allocation5 + $0x420] ss:$16 sps:$4 sm:$0xff]  }
  0x96   :  { %1358 = vmatprep.subr.bf16.mxu0 %v3357_v15  ;;  %1522 = vmatprep.subr.bf16.mxu1 %v3360_v16  ;;  %v3444_v15 = vld [vmem:[#allocation5 + $0x428] ss:$16 sps:$4 sm:$0xff]   ;;  %v3449_v16 = vld [vmem:[#allocation5 + $0x444] ss:$16 sps:$4 sm:$0xff]  }
  0x99   :  { %1359 = vmatpush1.bf16.msra.mxu0 %v3355_v17  ;;  %1523 = vmatpush1.bf16.msra.mxu1 %v3358_v18  ;;  %v3452_v17 = vld [vmem:[#allocation5 + $0x44c] ss:$16 sps:$4 sm:$0xff]   ;;  %v3447_v18 = vld [vmem:[#allocation5 + $0x440] ss:$16 sps:$4 sm:$0xff]  }
  0x9a   :  { %1360 = vmatprep.subr.bf16.mxu0 %v3363_v19  ;;  %1524 = vmatprep.subr.bf16.mxu1 %v3366_v20  ;;  %v3450_v19 = vld [vmem:[#allocation5 + $0x448] ss:$16 sps:$4 sm:$0xff]   ;;  %v3455_v20 = vld [vmem:[#allocation5 + $0x464] ss:$16 sps:$4 sm:$0xff]  }
  0x9d   :  { %1361 = vmatpush1.bf16.msra.mxu0 %v3361_v21  ;;  %1525 = vmatpush1.bf16.msra.mxu1 %v3364_v22  ;;  %v3458_v21 = vld [vmem:[#allocation5 + $0x46c] ss:$16 sps:$4 sm:$0xff]   ;;  %v3453_v22 = vld [vmem:[#allocation5 + $0x460] ss:$16 sps:$4 sm:$0xff]  }
  0x9e   :  { %1362 = vmatprep.subr.bf16.mxu0 %v3369_v23  ;;  %1526 = vmatprep.subr.bf16.mxu1 %v3372_v24  ;;  %v3456_v23 = vld [vmem:[#allocation5 + $0x468] ss:$16 sps:$4 sm:$0xff]   ;;  %v3461_v24 = vld [vmem:[#allocation5 + $0x484] ss:$16 sps:$4 sm:$0xff]  }
  0xa1   :  { %1363 = vmatpush1.bf16.msra.mxu0 %v3367_v25  ;;  %1527 = vmatpush1.bf16.msra.mxu1 %v3370_v26  ;;  %v3464_v25 = vld [vmem:[#allocation5 + $0x48c] ss:$16 sps:$4 sm:$0xff]   ;;  %v3459_v26 = vld [vmem:[#allocation5 + $0x480] ss:$16 sps:$4 sm:$0xff]  }
  0xa2   :  { %1364 = vmatprep.subr.bf16.mxu0 %v3375_v27  ;;  %1528 = vmatprep.subr.bf16.mxu1 %v3378_v28  ;;  %v3462_v27 = vld [vmem:[#allocation5 + $0x488] ss:$16 sps:$4 sm:$0xff]   ;;  %v3467_v28 = vld [vmem:[#allocation5 + $0x4a4] ss:$16 sps:$4 sm:$0xff]  }
  0xa5   :  { %1365 = vmatpush1.bf16.msra.mxu0 %v3373_v31  ;;  %1529 = vmatpush1.bf16.msra.mxu1 %v3376_v32  ;;  %v3468_v31 = vld [vmem:[#allocation5 + $0x4a8] ss:$16 sps:$4 sm:$0xff]   ;;  %v3473_v32 = vld [vmem:[#allocation5 + $0x4c4] ss:$16 sps:$4 sm:$0xff]  }
  0xa6   :  { %1366 = vmatprep.subr.bf16.mxu0 %v3381_v33  ;;  %1530 = vmatprep.subr.bf16.mxu1 %v3384_v34  ;;  %v3476_v33 = vld [vmem:[#allocation5 + $0x4cc] ss:$16 sps:$4 sm:$0xff]   ;;  %v3471_v34 = vld [vmem:[#allocation5 + $0x4c0] ss:$16 sps:$4 sm:$0xff]  }
  0xa9   :  { %1367 = vmatpush1.bf16.msra.mxu0 %v3379_v35  ;;  %1531 = vmatpush1.bf16.msra.mxu1 %v3382_v36  ;;  %v3474_v35 = vld [vmem:[#allocation5 + $0x4c8] ss:$16 sps:$4 sm:$0xff]   ;;  %v3479_v36 = vld [vmem:[#allocation5 + $0x4e4] ss:$16 sps:$4 sm:$0xff]  }
  0xaa   :  { %1368 = vmatprep.subr.bf16.mxu0 %v3387_v37  ;;  %1532 = vmatprep.subr.bf16.mxu1 %v3390_v38  ;;  %v3482_v37 = vld [vmem:[#allocation5 + $0x4ec] ss:$16 sps:$4 sm:$0xff]   ;;  %v3477_v38 = vld [vmem:[#allocation5 + $0x4e0] ss:$16 sps:$4 sm:$0xff]  }
  0xad   :  { %1369 = vmatpush1.bf16.msra.mxu0 %v3385_v39  ;;  %1533 = vmatpush1.bf16.msra.mxu1 %v3388_v40  ;;  %v3480_v39 = vld [vmem:[#allocation5 + $0x4e8] ss:$16 sps:$4 sm:$0xff]   ;;  %v3485_v40 = vld [vmem:[#allocation5 + $0x504] ss:$16 sps:$4 sm:$0xff]  }
  0xae   :  { %1370 = vmatprep.subr.bf16.mxu0 %v3393_v41  ;;  %1534 = vmatprep.subr.bf16.mxu1 %v3396_v42  ;;  %v3488_v41 = vld [vmem:[#allocation5 + $0x50c] ss:$16 sps:$4 sm:$0xff]   ;;  %v3483_v42 = vld [vmem:[#allocation5 + $0x500] ss:$16 sps:$4 sm:$0xff]  }
  0xb1   :  { %1371 = vmatpush1.bf16.msra.mxu0 %v3391_v43  ;;  %1535 = vmatpush1.bf16.msra.mxu1 %v3394_v44  ;;  %v3486_v43 = vld [vmem:[#allocation5 + $0x508] ss:$16 sps:$4 sm:$0xff]   ;;  %v3491_v44 = vld [vmem:[#allocation5 + $0x524] ss:$16 sps:$4 sm:$0xff]  }
  0xb2   :  { %1372 = vmatprep.subr.bf16.mxu0 %v3399_v45  ;;  %1536 = vmatprep.subr.bf16.mxu1 %v3402_v46  ;;  %v3494_v45 = vld [vmem:[#allocation5 + $0x52c] ss:$16 sps:$4 sm:$0xff]   ;;  %v3489_v46 = vld [vmem:[#allocation5 + $0x520] ss:$16 sps:$4 sm:$0xff]  }
  0xb5   :  { %1373 = vmatpush1.bf16.msra.mxu0 %v3397_v47  ;;  %1537 = vmatpush1.bf16.msra.mxu1 %v3400_v48  ;;  %v3492_v47 = vld [vmem:[#allocation5 + $0x528] ss:$16 sps:$4 sm:$0xff]   ;;  %v3497_v48 = vld [vmem:[#allocation5 + $0x544] ss:$16 sps:$4 sm:$0xff]  }
  0xb6   :  { %1374 = vmatprep.subr.bf16.mxu0 %v3405_v49  ;;  %1538 = vmatprep.subr.bf16.mxu1 %v3408_v50  ;;  %v3500_v49 = vld [vmem:[#allocation5 + $0x54c] ss:$16 sps:$4 sm:$0xff]   ;;  %v3495_v50 = vld [vmem:[#allocation5 + $0x540] ss:$16 sps:$4 sm:$0xff]  }
  0xb9   :  { %1375 = vmatpush1.bf16.msra.mxu0 %v3403_v51  ;;  %1539 = vmatpush1.bf16.msra.mxu1 %v3406_v52  ;;  %v3498_v51 = vld [vmem:[#allocation5 + $0x548] ss:$16 sps:$4 sm:$0xff]   ;;  %v3503_v52 = vld [vmem:[#allocation5 + $0x564] ss:$16 sps:$4 sm:$0xff]  }
  0xba   :  { %1376 = vmatprep.subr.bf16.mxu0 %v3411_v53  ;;  %1540 = vmatprep.subr.bf16.mxu1 %v3414_v54  ;;  %v3506_v53 = vld [vmem:[#allocation5 + $0x56c] ss:$16 sps:$4 sm:$0xff]   ;;  %v3501_v54 = vld [vmem:[#allocation5 + $0x560] ss:$16 sps:$4 sm:$0xff]  }
  0xbd   :  { %1377 = vmatpush1.bf16.msra.mxu0 %v3409_v55  ;;  %1541 = vmatpush1.bf16.msra.mxu1 %v3412_v56  ;;  %v3504_v55 = vld [vmem:[#allocation5 + $0x568] ss:$16 sps:$4 sm:$0xff]   ;;  %v3509_v56 = vld [vmem:[#allocation5 + $0x584] ss:$16 sps:$4 sm:$0xff]  }
  0xbe   :  { %1378 = vmatprep.subr.bf16.mxu0 %v3417_v57  ;;  %1542 = vmatprep.subr.bf16.mxu1 %v3420_v58  ;;  %v3512_v57 = vld [vmem:[#allocation5 + $0x58c] ss:$16 sps:$4 sm:$0xff]   ;;  %v3507_v58 = vld [vmem:[#allocation5 + $0x580] ss:$16 sps:$4 sm:$0xff]  }
  0xc1   :  { %1379 = vmatpush1.bf16.msra.mxu0 %v3415_v59  ;;  %1543 = vmatpush1.bf16.msra.mxu1 %v3418_v60  ;;  %v3510_v59 = vld [vmem:[#allocation5 + $0x588] ss:$16 sps:$4 sm:$0xff]   ;;  %v3515_v60 = vld [vmem:[#allocation5 + $0x5a4] ss:$16 sps:$4 sm:$0xff]  }
  0xc2   :  { %1380 = vmatprep.subr.bf16.mxu0 %v3423_v61  ;;  %1544 = vmatprep.subr.bf16.mxu1 %v3426_v62  ;;  %v3518_v61 = vld [vmem:[#allocation5 + $0x5ac] ss:$16 sps:$4 sm:$0xff]   ;;  %v3513_v62 = vld [vmem:[#allocation5 + $0x5a0] ss:$16 sps:$4 sm:$0xff]  }
  0xc5   :  { %1381 = vmatpush1.bf16.msra.mxu0 %v3421_v63  ;;  %1545 = vmatpush1.bf16.msra.mxu1 %v3424_v0  ;;  %v3516_v63 = vld [vmem:[#allocation5 + $0x5a8] ss:$16 sps:$4 sm:$0xff]   ;;  %v3521_v0 = vld [vmem:[#allocation5 + $0x5c4] ss:$16 sps:$4 sm:$0xff]  }
  0xc6   :  { %1382 = vmatprep.subr.bf16.mxu0 %v3429_v1  ;;  %1546 = vmatprep.subr.bf16.mxu1 %v3432_v2  ;;  %v3524_v1 = vld [vmem:[#allocation5 + $0x5cc] ss:$16 sps:$4 sm:$0xff]   ;;  %v3519_v2 = vld [vmem:[#allocation5 + $0x5c0] ss:$16 sps:$4 sm:$0xff]  }
  0xc9   :  { %1383 = vmatpush1.bf16.msra.mxu0 %v3427_v3  ;;  %1547 = vmatpush1.bf16.msra.mxu1 %v3430_v4  ;;  %v3522_v3 = vld [vmem:[#allocation5 + $0x5c8] ss:$16 sps:$4 sm:$0xff]   ;;  %v3527_v4 = vld [vmem:[#allocation5 + $0x5e4] ss:$16 sps:$4 sm:$0xff]  }
  0xca   :  { %1393 = vmatprep.subr.bf16.mxu0 %v3437_v5  ;;  %1557 = vmatprep.subr.bf16.mxu1 %v3440_v6  ;;  %v3530_v5 = vld [vmem:[#allocation5 + $0x5ec] ss:$16 sps:$4 sm:$0xff]   ;;  %v3525_v6 = vld [vmem:[#allocation5 + $0x5e0] ss:$16 sps:$4 sm:$0xff]  }
  0xcc   :  { %1385 = vmatmul.mubr.bf16.vlgmr.msra.gmra.mrb[0].mxu0 %v2772_v7  ;;  %1549 = vmatmul.mubr.bf16.vlgmr.msra.gmra.mrb[0].mxu1 %v2772_v7  ;;  %v3528_v7 = vld [vmem:[#allocation5 + $0x5e8] ss:$16 sps:$4 sm:$0xff]  }
  0xcd   :  { %1394 = vmatpush1.bf16.msra.mxu0 %v3435_v8  ;;  %1558 = vmatpush1.bf16.msra.mxu1 %v3438_v9  ;;  %v3535_v8 = vld [vmem:[#allocation5 + $0x604] ss:$16 sps:$4 sm:$0xff]   ;;  %v3538_v9 = vld [vmem:[#allocation5 + $0x60c] ss:$16 sps:$4 sm:$0xff]  }
  0xce   :  { %1395 = vmatprep.subr.bf16.mxu0 %v3443_v10  ;;  %1559 = vmatprep.subr.bf16.mxu1 %v3446_v12  ;;  %v3533_v10 = vld [vmem:[#allocation5 + $0x600] ss:$16 sps:$4 sm:$0xff]   ;;  %v3536_v12 = vld [vmem:[#allocation5 + $0x608] ss:$16 sps:$4 sm:$0xff]  }
  0xcf   :  { %1425 = vmatprep.mubr.bf16.mxu0 %v2775_v13  ;;  %1589 = vmatprep.mubr.bf16.mxu1 %v2775_v13  ;;  %v2774_v13 = vcombine.low %v3918_v11, %v3918_v11  ;;  %v3545_v11 = vld [vmem:[#allocation7 + $0x1c] ss:$12 sps:$4 sm:$0xff]  }
  0xd1   :  { %1396 = vmatpush1.bf16.msra.mxu0 %v3441_v14  ;;  %1560 = vmatpush1.bf16.msra.mxu1 %v3444_v15  ;;  %v3542_v14 = vld [vmem:[#allocation7 + $0x4] ss:$12 sps:$4 sm:$0xff]   ;;  %v3567_v15 = vld [vmem:[#allocation7 + $0xc8] ss:$12 sps:$4 sm:$0xff]  }
  0xd2   :  { %1397 = vmatprep.subr.bf16.mxu0 %v3449_v16  ;;  %1561 = vmatprep.subr.bf16.mxu1 %v3452_v17  ;;  %v3820_v16 = vmov 0   ;;  %v3539_v17 = vld [vmem:[#allocation2 + $0x18] ss:$0 sps:$4 sm:$0xff]  }
  0xd5   :  { %1398 = vmatpush1.bf16.msra.mxu0 %v3447_v18  ;;  %1562 = vmatpush1.bf16.msra.mxu1 %v3450_v19  ;;  %v3540_v18 = vld [vmem:[#allocation7] ss:$12 sps:$4 sm:$0xff]   ;;  %v3568_v19 = vld [vmem:[#allocation7 + $0x8] ss:$12 sps:$4 sm:$0xff]  }
  0xd6   :  { %1399 = vmatprep.subr.bf16.mxu0 %v3455_v20  ;;  %1563 = vmatprep.subr.bf16.mxu1 %v3458_v21  ;;  %v3572_v20 = vld [vmem:[#allocation7 + $0xe0] ss:$12 sps:$4 sm:$0xff]   ;;  %v3543_v21 = vld [vmem:[#allocation7 + $0x18] ss:$12 sps:$4 sm:$0xff]  }
  0xd9   :  { %1400 = vmatpush1.bf16.msra.mxu0 %v3453_v22  ;;  %1564 = vmatpush1.bf16.msra.mxu1 %v3456_v23  ;;  %v3573_v22 = vld [vmem:[#allocation7 + $0x20] ss:$12 sps:$4 sm:$0xff]  }
  0xda   :  { %1401 = vmatprep.subr.bf16.mxu0 %v3461_v24  ;;  %1565 = vmatprep.subr.bf16.mxu1 %v3464_v25  ;;  %v3548_v23 = vld [vmem:[#allocation7 + $0x34] ss:$12 sps:$4 sm:$0xff]   ;;  %v3577_v24 = vld [vmem:[#allocation7 + $0xf8] ss:$12 sps:$4 sm:$0xff]   ;;  %v3546_v25 = vld [vmem:[#allocation7 + $0x30] ss:$12 sps:$4 sm:$0xff]  }
  0xdd   :  { %1402 = vmatpush1.bf16.msra.mxu0 %v3459_v26  ;;  %1566 = vmatpush1.bf16.msra.mxu1 %v3462_v27  ;;  %v3578_v26 = vld [vmem:[#allocation7 + $0x38] ss:$12 sps:$4 sm:$0xff]  }
  0xde   :  { %1403 = vmatprep.subr.bf16.mxu0 %v3467_v28  ;;  %1567 = vmatprep.subr.bf16.mxu1 %v3470_v29  ;;  %v3551_v27 = vld [vmem:[#allocation7 + $0x4c] ss:$12 sps:$4 sm:$0xff]   ;;  %v3582_v28 = vld [vmem:[#allocation7 + $0x110] ss:$12 sps:$4 sm:$0xff]   ;;  %v3549_v29 = vld [vmem:[#allocation7 + $0x48] ss:$12 sps:$4 sm:$0xff]  }
  0xe1   :  { %1404 = vmatpush1.bf16.msra.mxu0 %v3465_v30  ;;  %1568 = vmatpush1.bf16.msra.mxu1 %v3468_v31  ;;  %v3583_v30 = vld [vmem:[#allocation7 + $0x50] ss:$12 sps:$4 sm:$0xff]  }
  0xe2   :  { %1405 = vmatprep.subr.bf16.mxu0 %v3473_v32  ;;  %1569 = vmatprep.subr.bf16.mxu1 %v3476_v33  ;;  %v3554_v31 = vld [vmem:[#allocation7 + $0x64] ss:$12 sps:$4 sm:$0xff]   ;;  %v3587_v32 = vld [vmem:[#allocation7 + $0x128] ss:$12 sps:$4 sm:$0xff]   ;;  %v3552_v33 = vld [vmem:[#allocation7 + $0x60] ss:$12 sps:$4 sm:$0xff]  }
  0xe5   :  { %1406 = vmatpush1.bf16.msra.mxu0 %v3471_v34  ;;  %1570 = vmatpush1.bf16.msra.mxu1 %v3474_v35  ;;  %v3588_v34 = vld [vmem:[#allocation7 + $0x68] ss:$12 sps:$4 sm:$0xff]  }
  0xe6   :  { %1407 = vmatprep.subr.bf16.mxu0 %v3479_v36  ;;  %1571 = vmatprep.subr.bf16.mxu1 %v3482_v37  ;;  %v3557_v35 = vld [vmem:[#allocation7 + $0x7c] ss:$12 sps:$4 sm:$0xff]   ;;  %v3592_v36 = vld [vmem:[#allocation7 + $0x140] ss:$12 sps:$4 sm:$0xff]   ;;  %v3555_v37 = vld [vmem:[#allocation7 + $0x78] ss:$12 sps:$4 sm:$0xff]  }
  0xe9   :  { %1408 = vmatpush1.bf16.msra.mxu0 %v3477_v38  ;;  %1572 = vmatpush1.bf16.msra.mxu1 %v3480_v39  ;;  %v3593_v38 = vld [vmem:[#allocation7 + $0x80] ss:$12 sps:$4 sm:$0xff]  }
  0xea   :  { %1409 = vmatprep.subr.bf16.mxu0 %v3485_v40  ;;  %1573 = vmatprep.subr.bf16.mxu1 %v3488_v41  ;;  %v3560_v39 = vld [vmem:[#allocation7 + $0x94] ss:$12 sps:$4 sm:$0xff]   ;;  %v3558_v40 = vld [vmem:[#allocation7 + $0x90] ss:$12 sps:$4 sm:$0xff]   ;;  %v3563_v41 = vld [vmem:[#allocation7 + $0xac] ss:$12 sps:$4 sm:$0xff]  }
  0xed   :  { %1410 = vmatpush1.bf16.msra.mxu0 %v3483_v42  ;;  %1574 = vmatpush1.bf16.msra.mxu1 %v3486_v43  ;;  %v3561_v42 = vld [vmem:[#allocation7 + $0xa8] ss:$12 sps:$4 sm:$0xff]   ;;  %v3566_v43 = vld [vmem:[#allocation7 + $0xc4] ss:$12 sps:$4 sm:$0xff]  }
  0xee   :  { %1411 = vmatprep.subr.bf16.mxu0 %v3491_v44  ;;  %1575 = vmatprep.subr.bf16.mxu1 %v3494_v45  ;;  %v3564_v44 = vld [vmem:[#allocation7 + $0xc0] ss:$12 sps:$4 sm:$0xff]   ;;  %v3571_v45 = vld [vmem:[#allocation7 + $0xdc] ss:$12 sps:$4 sm:$0xff]  }
  0xf1   :  { %1412 = vmatpush1.bf16.msra.mxu0 %v3489_v46  ;;  %1576 = vmatpush1.bf16.msra.mxu1 %v3492_v47  ;;  %v3569_v46 = vld [vmem:[#allocation7 + $0xd8] ss:$12 sps:$4 sm:$0xff]   ;;  %v3576_v47 = vld [vmem:[#allocation7 + $0xf4] ss:$12 sps:$4 sm:$0xff]  }
  0xf2   :  { %1413 = vmatprep.subr.bf16.mxu0 %v3497_v48  ;;  %1577 = vmatprep.subr.bf16.mxu1 %v3500_v49  ;;  %v3574_v48 = vld [vmem:[#allocation7 + $0xf0] ss:$12 sps:$4 sm:$0xff]   ;;  %v3581_v49 = vld [vmem:[#allocation7 + $0x10c] ss:$12 sps:$4 sm:$0xff]  }
  0xf5   :  { %1414 = vmatpush1.bf16.msra.mxu0 %v3495_v50  ;;  %1578 = vmatpush1.bf16.msra.mxu1 %v3498_v51  ;;  %v3579_v50 = vld [vmem:[#allocation7 + $0x108] ss:$12 sps:$4 sm:$0xff]   ;;  %v3586_v51 = vld [vmem:[#allocation7 + $0x124] ss:$12 sps:$4 sm:$0xff]  }
  0xf6   :  { %1415 = vmatprep.subr.bf16.mxu0 %v3503_v52  ;;  %1579 = vmatprep.subr.bf16.mxu1 %v3506_v53  ;;  %v3584_v52 = vld [vmem:[#allocation7 + $0x120] ss:$12 sps:$4 sm:$0xff]   ;;  %v3591_v53 = vld [vmem:[#allocation7 + $0x13c] ss:$12 sps:$4 sm:$0xff]  }
  0xf9   :  { %1416 = vmatpush1.bf16.msra.mxu0 %v3501_v54  ;;  %1580 = vmatpush1.bf16.msra.mxu1 %v3504_v55  ;;  %v3589_v54 = vld [vmem:[#allocation7 + $0x138] ss:$12 sps:$4 sm:$0xff]   ;;  %v3596_v55 = vld [vmem:[#allocation7 + $0x154] ss:$12 sps:$4 sm:$0xff]  }
  0xfa   :  { %1417 = vmatprep.subr.bf16.mxu0 %v3509_v56  ;;  %1581 = vmatprep.subr.bf16.mxu1 %v3512_v57  ;;  %v3597_v56 = vld [vmem:[#allocation7 + $0x158] ss:$12 sps:$4 sm:$0xff]   ;;  %v3594_v57 = vld [vmem:[#allocation7 + $0x150] ss:$12 sps:$4 sm:$0xff]  }
  0xfd   :  { %1418 = vmatpush1.bf16.msra.mxu0 %v3507_v58  ;;  %1582 = vmatpush1.bf16.msra.mxu1 %v3510_v59  ;;  %v3598_v58 = vld [vmem:[#allocation7 + $0x98] ss:$12 sps:$4 sm:$0xff]  }
  0xfe   :  { %1419 = vmatprep.subr.bf16.mxu0 %v3515_v60  ;;  %1583 = vmatprep.subr.bf16.mxu1 %v3518_v61  ;;  %v3601_v59 = vld [vmem:[#allocation7 + $0x16c] ss:$12 sps:$4 sm:$0xff]   ;;  %v3602_v60 = vld [vmem:[#allocation7 + $0x170] ss:$12 sps:$4 sm:$0xff]   ;;  %v3599_v61 = vld [vmem:[#allocation7 + $0x168] ss:$12 sps:$4 sm:$0xff]  }
 0x101   :  { %1420 = vmatpush1.bf16.msra.mxu0 %v3513_v62  ;;  %1584 = vmatpush1.bf16.msra.mxu1 %v3516_v63  ;;  %v3603_v62 = vld [vmem:[#allocation7 + $0xb0] ss:$12 sps:$4 sm:$0xff]  }
 0x102   :  { %1421 = vmatprep.subr.bf16.mxu0 %v3521_v0  ;;  %1585 = vmatprep.subr.bf16.mxu1 %v3524_v1  ;;  %v3606_v63 = vld [vmem:[#allocation7 + $0x184] ss:$12 sps:$4 sm:$0xff]   ;;  %v3607_v0 = vld [vmem:[#allocation7 + $0x248] ss:$12 sps:$4 sm:$0xff]   ;;  %v283_v1 = vlaneseq }
 0x105   :  { %1422 = vmatpush1.bf16.msra.mxu0 %v3519_v2  ;;  %1586 = vmatpush1.bf16.msra.mxu1 %v3522_v3  ;;  %v3924_v2 = vshrl.u32 %v283_v1, 7  ;;  %v3647_v1 = vld [vmem:[#allocation7 + $0x258] ss:$12 sps:$4 sm:$0xff]  }
 0x106   :  { %1423 = vmatprep.subr.bf16.mxu0 %v3527_v4  ;;  %1587 = vmatprep.subr.bf16.mxu1 %v3530_v5  ;;  %v3930_v4 = vld [vmem:[%s3974_s2] sm:$0xf] }
 0x107   :  { %v285_v3 = vsub.s32 0, %v3924_v2  ;;  %v289_v5 = vsub.s32 1, %v3924_v2 }
 0x109   :  { %1424 = vmatpush1.bf16.msra.mxu0 %v3525_v6  ;;  %1588 = vmatpush1.bf16.msra.mxu1 %v3528_v7  ;;  %v297_v6 = vsub.s32 3, %v3924_v2  ;;  %v286_v7 = vrot.slane %v3930_v4, %v285_v3 }
 0x10a   :  { %1434 = vmatprep.subr.bf16.mxu0 %v3535_v8  ;;  %1598 = vmatprep.subr.bf16.mxu1 %v3538_v9  ;;  %v290_v8 = vrot.slane %v3930_v4, %v289_v5 }
 0x10b   :  { %v298_v9 = vrot.slane %v3930_v4, %v297_v6  ;;  %v3650_v6 = vld [vmem:[#allocation7 + $0x270] ss:$12 sps:$4 sm:$0xff]  }
 0x10c   :  { %1426 = vmatmul.mubr.bf16.vlgmr.msra.gmra.mrb[0].mxu0 %v2774_v13  ;;  %1590 = vmatmul.mubr.bf16.vlgmr.msra.gmra.mrb[0].mxu1 %v2774_v13 }
 0x10d   :  { %1435 = vmatpush1.bf16.msra.mxu0 %v3533_v10  ;;  %1599 = vmatpush1.bf16.msra.mxu1 %v3536_v12 }
 0x10e   :  { %1466 = vmatprep.mubr.bf16.mxu0 %v3820_v16  ;;  %1630 = vmatprep.mubr.bf16.mxu1 %v3820_v16 }
 0x10f   :  { %2304 = vmatprep.subr.bf16.mxu0 %v3542_v14  ;;  %3096 = vmatprep.subr.bf16.mxu1 %v3567_v15 }
 0x118   :  { %2973 = vmatmul.mubr.msk.bf16.vlgmr.msra.gmra.mrb[0].mxu0 %vm1307_vm0, %v3539_v17  ;;  %2974 = vmatmul.mubr.msk.bf16.vlgmr.msra.gmra.mrb[0].mxu1 %vm1307_vm0, %v3539_v17 }
 0x119   :  { %2305 = vmatpush1.bf16.msra.mxu0 %v3540_v18  ;;  %3097 = vmatpush3.bf16.msra.mxu1 %v3568_v19 }
 0x11a   :  { %2306 = vmatprep.subr.bf16.mxu0 %v3545_v11  ;;  %3098 = vmatprep.subr.bf16.mxu1 %v3572_v20 }
 0x11d   :  { %2307 = vmatpush1.bf16.msra.mxu0 %v3543_v21  ;;  %3099 = vmatpush3.bf16.msra.mxu1 %v3573_v22 }
 0x11e   :  { %2308 = vmatprep.subr.bf16.mxu0 %v3548_v23  ;;  %3100 = vmatprep.subr.bf16.mxu1 %v3577_v24 }
 0x121   :  { %2309 = vmatpush1.bf16.msra.mxu0 %v3546_v25  ;;  %3101 = vmatpush3.bf16.msra.mxu1 %v3578_v26  ;;  %v3604_v25 = vld [vmem:[#allocation7 + $0x180] ss:$12 sps:$4 sm:$0xff]   ;;  %v3608_v26 = vld [vmem:[#allocation7 + $0x188] ss:$12 sps:$4 sm:$0xff]  }
 0x122   :  { %2310 = vmatprep.subr.bf16.mxu0 %v3551_v27  ;;  %3102 = vmatprep.subr.bf16.mxu1 %v3582_v28  ;;  %v3611_v28 = vld [vmem:[#allocation7 + $0x19c] ss:$12 sps:$4 sm:$0xff]  }
 0x125   :  { %2311 = vmatpush1.bf16.msra.mxu0 %v3549_v29  ;;  %3103 = vmatpush3.bf16.msra.mxu1 %v3583_v30  ;;  %v3612_v29 = vld [vmem:[#allocation7 + $0x260] ss:$12 sps:$4 sm:$0xff]  }
 0x126   :  { %2312 = vmatprep.subr.bf16.mxu0 %v3554_v31  ;;  %3104 = vmatprep.subr.bf16.mxu1 %v3587_v32  ;;  %v3609_v31 = vld [vmem:[#allocation7 + $0x198] ss:$12 sps:$4 sm:$0xff]   ;;  %v3613_v32 = vld [vmem:[#allocation7 + $0x1a0] ss:$12 sps:$4 sm:$0xff]  }
 0x129   :  { %2313 = vmatpush1.bf16.msra.mxu0 %v3552_v33  ;;  %3105 = vmatpush3.bf16.msra.mxu1 %v3588_v34  ;;  %v3616_v33 = vld [vmem:[#allocation7 + $0x1b4] ss:$12 sps:$4 sm:$0xff]   ;;  %v3617_v34 = vld [vmem:[#allocation7 + $0x278] ss:$12 sps:$4 sm:$0xff]  }
 0x12a   :  { %2314 = vmatprep.subr.bf16.mxu0 %v3557_v35  ;;  %3106 = vmatprep.subr.bf16.mxu1 %v3592_v36  ;;  %v3614_v35 = vld [vmem:[#allocation7 + $0x1b0] ss:$12 sps:$4 sm:$0xff]   ;;  %v3618_v36 = vld [vmem:[#allocation7 + $0x1b8] ss:$12 sps:$4 sm:$0xff]  }
 0x12d   :  { %2315 = vmatpush1.bf16.msra.mxu0 %v3555_v37  ;;  %3107 = vmatpush3.bf16.msra.mxu1 %v3593_v38  ;;  %v3621_v37 = vld [vmem:[#allocation7 + $0x1cc] ss:$12 sps:$4 sm:$0xff]   ;;  %v3622_v38 = vld [vmem:[#allocation7 + $0x290] ss:$12 sps:$4 sm:$0xff]  }
 0x12e   :  { %2316 = vmatprep.subr.bf16.mxu0 %v3560_v39  ;;  %3108 = vmatprep.subr.bf16.mxu1 %v3597_v56  ;;  %v3619_v39 = vld [vmem:[#allocation7 + $0x1c8] ss:$12 sps:$4 sm:$0xff]   ;;  %v3641_v56 = vld [vmem:[#allocation7 + $0x22c] ss:$12 sps:$4 sm:$0xff]  }
 0x131   :  { %2317 = vmatpush1.bf16.msra.mxu0 %v3558_v40  ;;  %3109 = vmatpush3.bf16.msra.mxu1 %v3598_v58  ;;  %v3623_v40 = vld [vmem:[#allocation7 + $0x1d0] ss:$12 sps:$4 sm:$0xff]   ;;  %v3639_v58 = vld [vmem:[#allocation7 + $0x228] ss:$12 sps:$4 sm:$0xff]  }
 0x132   :  { %2318 = vmatprep.subr.bf16.mxu0 %v3563_v41  ;;  %3110 = vmatprep.subr.bf16.mxu1 %v3602_v60  ;;  %v3626_v41 = vld [vmem:[#allocation7 + $0x1e4] ss:$12 sps:$4 sm:$0xff]  }
 0x135   :  { %2319 = vmatpush1.bf16.msra.mxu0 %v3561_v42  ;;  %3111 = vmatpush3.bf16.msra.mxu1 %v3603_v62  ;;  %v3627_v42 = vld [vmem:[#allocation7 + $0x2a8] ss:$12 sps:$4 sm:$0xff]   ;;  %v3644_v62 = vld [vmem:[#allocation7 + $0x240] ss:$12 sps:$4 sm:$0xff]  }
 0x136   :  { %2320 = vmatprep.subr.bf16.mxu0 %v3566_v43  ;;  %3118 = vmatprep.subr.bf16.mxu1 %v3607_v0  ;;  %v3624_v43 = vld [vmem:[#allocation7 + $0x1e0] ss:$12 sps:$4 sm:$0xff]   ;;  %v3649_v0 = vld [vmem:[#allocation7 + $0x25c] ss:$12 sps:$4 sm:$0xff]  }
 0x139   :  { %2321 = vmatpush1.bf16.msra.mxu0 %v3564_v44  ;;  %v3628_v44 = vld [vmem:[#allocation7 + $0x1e8] ss:$12 sps:$4 sm:$0xff]  }
 0x13a   :  { %2322 = vmatprep.subr.bf16.mxu0 %v3571_v45  ;;  %v293_v45 = vsub.s32 2, %v3924_v2  ;;  %v3686_v2 = vld [vmem:[#allocation8 + $0x90] sm:$0xff]  }
 0x13d   :  { %2323 = vmatpush1.bf16.msra.mxu0 %v3569_v46  ;;  %v3631_v46 = vld [vmem:[#allocation7 + $0x1fc] ss:$12 sps:$4 sm:$0xff]  }
 0x13e   :  { %2324 = vmatprep.subr.bf16.mxu0 %v3576_v47  ;;  %v3632_v47 = vld [vmem:[#allocation7 + $0x2c0] ss:$12 sps:$4 sm:$0xff]  }
 0x141   :  { %2325 = vmatpush1.bf16.msra.mxu0 %v3574_v48  ;;  %v3629_v48 = vld [vmem:[#allocation7 + $0x1f8] ss:$12 sps:$4 sm:$0xff]  }
 0x142   :  { %2326 = vmatprep.subr.bf16.mxu0 %v3581_v49  ;;  %v3633_v49 = vld [vmem:[#allocation7 + $0x200] ss:$12 sps:$4 sm:$0xff]  }
 0x145   :  { %2327 = vmatpush1.bf16.msra.mxu0 %v3579_v50  ;;  %v294_v50 = vrot.slane %v3930_v4, %v293_v45  ;;  %v3652_v4 = vld [vmem:[#allocation7 + $0x274] ss:$12 sps:$4 sm:$0xff]  }
 0x146   :  { %2328 = vmatprep.subr.bf16.mxu0 %v3586_v51  ;;  %v3636_v51 = vld [vmem:[#allocation7 + $0x214] ss:$12 sps:$4 sm:$0xff]  }
 0x149   :  { %2329 = vmatpush1.bf16.msra.mxu0 %v3584_v52  ;;  %v3637_v52 = vld [vmem:[#allocation7 + $0x2d8] ss:$12 sps:$4 sm:$0xff]  }
 0x14a   :  { %2330 = vmatprep.subr.bf16.mxu0 %v3591_v53  ;;  %v3634_v53 = vld [vmem:[#allocation7 + $0x210] ss:$12 sps:$4 sm:$0xff]  }
 0x14d   :  { %2331 = vmatpush1.bf16.msra.mxu0 %v3589_v54  ;;  %v3638_v54 = vld [vmem:[#allocation7 + $0x218] ss:$12 sps:$4 sm:$0xff]  }
 0x14e   :  { %2332 = vmatprep.subr.bf16.mxu0 %v3596_v55 }
 0x151   :  { %2333 = vmatpush1.bf16.msra.mxu0 %v3594_v57  ;;  %v3642_v57 = vld [vmem:[#allocation7 + $0x2f0] ss:$12 sps:$4 sm:$0xff]  }
 0x152   :  { %2334 = vmatprep.subr.bf16.mxu0 %v3601_v59  ;;  %v3643_v59 = vld [vmem:[#allocation7 + $0x230] ss:$12 sps:$4 sm:$0xff]  }
 0x155   :  { %2335 = vmatpush1.bf16.msra.mxu0 %v3599_v61  ;;  %v3646_v61 = vld [vmem:[#allocation7 + $0x244] ss:$12 sps:$4 sm:$0xff]  }
 0x156   :  { %2345 = vmatprep.subr.bf16.mxu0 %v3606_v63 }
 0x1eb   :  { %v1468_v10 = vpop.f32.mrb[0].mxu0  ;;  %v3941_v12 = vpop.f32.mrb[0].mxu1 }
 0x1ec   :  { %v3191_v13 = vadd.f32 %v1468_v10, %v286_v7  ;;  %v1470_v14 = vpop.f32.mrb[1].mxu0  ;;  %v1634_v15 = vpop.f32.mrb[1].mxu1  ;;  %v3193_v55 = vadd.f32 %v3941_v12, %v294_v50  ;;  %v3655_v7 = vld [vmem:[#allocation7 + $0x28c] ss:$12 sps:$4 sm:$0xff]   ;;  %v3661_v12 = vld [vmem:[#allocation7 + $0x2bc] ss:$12 sps:$4 sm:$0xff]  }
 0x1ed   :  { %v3192_v16 = vadd.f32 %v1470_v14, %v290_v8  ;;  %v3194_v17 = vadd.f32 %v1634_v15, %v298_v9  ;;  %v1472_v18 = vpop.f32.mrb[2].mxu0  ;;  %v1636_v19 = vpop.f32.mrb[2].mxu1  ;;  %v3653_v8 = vld [vmem:[#allocation7 + $0x288] ss:$12 sps:$4 sm:$0xff]   ;;  %v3658_v9 = vld [vmem:[#allocation7 + $0x2a4] ss:$12 sps:$4 sm:$0xff]  }
 0x1ee   :  { %v1639_v11 = vmax.f32 %v3191_v13, 0.0  ;;  %v1473_v20 = vpop.f32.mrb[3].mxu0  ;;  %v1637_v21 = vpop.f32.mrb[3].mxu1  ;;  %v1641_v60 = vmax.f32 %v3193_v55, 0.0  ;;  %v3656_v10 = vld [vmem:[#allocation7 + $0x2a0] ss:$12 sps:$4 sm:$0xff]  }
 0x1ef   :  { %v1640_v22 = vmax.f32 %v3192_v16, 0.0  ;;  %v1642_v23 = vmax.f32 %v3194_v17, 0.0  ;;  %v3659_v13 = vld [vmem:[#allocation7 + $0x2b8] ss:$12 sps:$4 sm:$0xff]   ;;  %v3664_v14 = vld [vmem:[#allocation7 + $0x2d4] ss:$12 sps:$4 sm:$0xff]  }
 0x1f0   :  { %v1643_v27 = vpack.c.bf16 %v1639_v11, %v1639_v11  ;;  %v1645_v63 = vpack.c.bf16 %v1641_v60, %v1641_v60  ;;  %v3662_v15 = vld [vmem:[#allocation7 + $0x2d0] ss:$12 sps:$4 sm:$0xff]   ;;  %v3667_v16 = vld [vmem:[#allocation7 + $0x2ec] ss:$12 sps:$4 sm:$0xff]   ;;  %v3665_v17 = vld [vmem:[#allocation7 + $0x2e8] ss:$12 sps:$4 sm:$0xff]  }
 0x1f1   :  { %v1644_v24 = vpack.c.bf16 %v1640_v22, %v1640_v22  ;;  %v1646_v30 = vpack.c.bf16 %v1642_v23, %v1642_v23  ;;  %v3668_v18 = vld [vmem:[#allocation8 + $0x40] sm:$0xff]   ;;  %v3670_v11 = vld [vmem:[#allocation8 + $0x48] sm:$0xff]   ;;  %v3672_v21 = vld [vmem:[#allocation8 + $0x50] sm:$0xff]  }
 0x1f2   :  { %v3669_v19 = vld [vmem:[#allocation8] sm:$0xff]   ;;  %v3671_v20 = vld [vmem:[#allocation8 + $0x8] sm:$0xff]   ;;  %v3673_v22 = vld [vmem:[#allocation8 + $0x10] sm:$0xff]  }
 0x1f3   :  { %2336 = vmatprep.mubr.bf16.mxu0 %v1644_v24  ;;  %2418 = vmatprep.mubr.bf16.mxu1 %v1644_v24  ;;  %v3674_v23 = vld [vmem:[#allocation8 + $0x58] sm:$0xff]  }
 0x1f4   :  { %2337 = vmatmul.mubr.bf16.vlgmr.msra.gmra.mrb[4].mxu0 %v1643_v27  ;;  %2419 = vmatmul.mubr.bf16.vlgmr.msra.gmra.mrb[4].mxu1 %v1643_v27  ;;  %v3675_v24 = vld [vmem:[#allocation8 + $0x18] sm:$0xff]   ;;  %v3678_v27 = vld [vmem:[#allocation8 + $0x68] sm:$0xff]  }
 0x1f5   :  { %2346 = vmatpush1.bf16.msra.mxu0 %v3604_v25  ;;  %3119 = vmatpush3.bf16.msra.mxu1 %v3608_v26  ;;  %v3676_v25 = vld [vmem:[#allocation8 + $0x60] sm:$0xff]  }
 0x1f6   :  { %2377 = vmatprep.mubr.bf16.mxu0 %v1646_v30  ;;  %2458 = vmatprep.mubr.bf16.mxu1 %v1646_v30  ;;  %v3677_v26 = vld [vmem:[#allocation8 + $0x20] sm:$0xff]   ;;  %v3681_v30 = vld [vmem:[#allocation8 + $0x30] sm:$0xff]  }
 0x1f7   :  { %2347 = vmatprep.subr.bf16.mxu0 %v3611_v28  ;;  %3120 = vmatprep.subr.bf16.mxu1 %v3612_v29  ;;  %v3679_v28 = vld [vmem:[#allocation8 + $0x28] sm:$0xff]   ;;  %v3680_v29 = vld [vmem:[#allocation8 + $0x70] sm:$0xff]  }
 0x1f9   :  { %2348 = vmatpush1.bf16.msra.mxu0 %v3609_v31  ;;  %3121 = vmatpush3.bf16.msra.mxu1 %v3613_v32  ;;  %v3682_v31 = vld [vmem:[#allocation8 + $0x78] sm:$0xff]  }
 0x1fa   :  { %2349 = vmatprep.subr.bf16.mxu0 %v3616_v33  ;;  %3122 = vmatprep.subr.bf16.mxu1 %v3617_v34  ;;  %v3683_v32 = vld [vmem:[#allocation8 + $0x38] sm:$0xff]   ;;  %v3821_v33 = vmov 0.0  }
 0x1fd   :  { %2350 = vmatpush1.bf16.msra.mxu0 %v3614_v35  ;;  %3123 = vmatpush3.bf16.msra.mxu1 %v3618_v36 }
 0x1fe   :  { %2351 = vmatprep.subr.bf16.mxu0 %v3621_v37  ;;  %3124 = vmatprep.subr.bf16.mxu1 %v3622_v38 }
 0x201   :  { %2352 = vmatpush1.bf16.msra.mxu0 %v3619_v39  ;;  %3125 = vmatpush3.bf16.msra.mxu1 %v3623_v40  ;;  %v1775_v39 = vld [vmem:[%s3976_s4] sm:$0x7] }
 0x202   :  { %2353 = vmatprep.subr.bf16.mxu0 %v3626_v41  ;;  %3126 = vmatprep.subr.bf16.mxu1 %v3627_v42  ;;  %v1788_v40 = vrot.slane %v1775_v39, %v293_v45  ;;  %v1784_v50 = vrot.slane %v1775_v39, %v289_v5  ;;  %v3688_v5 = vld [vmem:[#allocation8 + $0xa0] sm:$0xff]  }
 0x205   :  { %2354 = vmatpush1.bf16.msra.mxu0 %v3624_v43  ;;  %3127 = vmatpush3.bf16.msra.mxu1 %v3628_v44 }
 0x206   :  { %2355 = vmatprep.subr.bf16.mxu0 %v3631_v46  ;;  %3128 = vmatprep.subr.bf16.mxu1 %v3632_v47 }
 0x209   :  { %2356 = vmatpush1.bf16.msra.mxu0 %v3629_v48  ;;  %3129 = vmatpush3.bf16.msra.mxu1 %v3633_v49  ;;  %v1780_v49 = vrot.slane %v1775_v39, %v285_v3  ;;  %v3687_v3 = vld [vmem:[#allocation8 + $0x98] sm:$0xff]  }
 0x20a   :  { %2357 = vmatprep.subr.bf16.mxu0 %v3636_v51  ;;  %3130 = vmatprep.subr.bf16.mxu1 %v3637_v52 }
 0x20d   :  { %2358 = vmatpush1.bf16.msra.mxu0 %v3634_v53  ;;  %3131 = vmatpush3.bf16.msra.mxu1 %v3638_v54 }
 0x20e   :  { %2359 = vmatprep.subr.bf16.mxu0 %v3641_v56  ;;  %3132 = vmatprep.subr.bf16.mxu1 %v3642_v57 }
 0x211   :  { %2360 = vmatpush1.bf16.msra.mxu0 %v3639_v58  ;;  %3133 = vmatpush3.bf16.msra.mxu1 %v3643_v59  ;;  %v3684_v59 = vld [vmem:[#allocation8 + $0x80] sm:$0xff]  }
 0x212   :  { %2361 = vmatprep.subr.bf16.mxu0 %v3646_v61  ;;  %3140 = vmatprep.subr.bf16.mxu1 %v3668_v18  ;;  %v3685_v61 = vld [vmem:[#allocation8 + $0x88] sm:$0xff]  }
 0x214   :  { %2459 = vmatmul.mubr.bf16.vlgmr.msra.gmra.mrb[8].mxu1 %v1645_v63 }
 0x215   :  { %2362 = vmatpush1.bf16.msra.mxu0 %v3644_v62  ;;  %3141 = vmatpush3.bf16.msra.mxu1 %v3669_v19  ;;  %v3689_v62 = vld [vmem:[#allocation8 + $0xa8] sm:$0xff]  }
 0x216   :  { %2363 = vmatprep.subr.bf16.mxu0 %v3649_v0  ;;  %3142 = vmatprep.subr.bf16.mxu1 %v3670_v11  ;;  %v3691_v0 = vld [vmem:[#allocation8 + $0xb8] sm:$0xff]  }
 0x219   :  { %2364 = vmatpush1.bf16.msra.mxu0 %v3647_v1  ;;  %3143 = vmatpush3.bf16.msra.mxu1 %v3671_v20 }
 0x21a   :  { %2365 = vmatprep.subr.bf16.mxu0 %v3652_v4  ;;  %3144 = vmatprep.subr.bf16.mxu1 %v3672_v21 }
 0x21d   :  { %2366 = vmatpush1.bf16.msra.mxu0 %v3650_v6  ;;  %3145 = vmatpush3.bf16.msra.mxu1 %v3673_v22 }
 0x21e   :  { %2367 = vmatprep.subr.bf16.mxu0 %v3655_v7  ;;  %3146 = vmatprep.subr.bf16.mxu1 %v3674_v23 }
 0x221   :  { %2368 = vmatpush1.bf16.msra.mxu0 %v3653_v8  ;;  %3147 = vmatpush3.bf16.msra.mxu1 %v3675_v24 }
 0x222   :  { %2369 = vmatprep.subr.bf16.mxu0 %v3658_v9  ;;  %3148 = vmatprep.subr.bf16.mxu1 %v3676_v25 }
 0x225   :  { %2370 = vmatpush1.bf16.msra.mxu0 %v3656_v10  ;;  %3149 = vmatpush3.bf16.msra.mxu1 %v3677_v26 }
 0x226   :  { %2371 = vmatprep.subr.bf16.mxu0 %v3661_v12  ;;  %3150 = vmatprep.subr.bf16.mxu1 %v3678_v27  ;;  %v3071_v12 = vld [vmem:[%s3978_s6] ss:$0 sm:$0xff] }
 0x229   :  { %2372 = vmatpush1.bf16.msra.mxu0 %v3659_v13  ;;  %3151 = vmatpush3.bf16.msra.mxu1 %v3679_v28 }
 0x22a   :  { %2373 = vmatprep.subr.bf16.mxu0 %v3664_v14  ;;  %3152 = vmatprep.subr.bf16.mxu1 %v3680_v29 }
 0x22d   :  { %2374 = vmatpush1.bf16.msra.mxu0 %v3662_v15  ;;  %3153 = vmatpush3.bf16.msra.mxu1 %v3681_v30 }
 0x22e   :  { %2375 = vmatprep.subr.bf16.mxu0 %v3667_v16  ;;  %3154 = vmatprep.subr.bf16.mxu1 %v3682_v31 }
 0x231   :  { %2376 = vmatpush1.bf16.msra.mxu0 %v3665_v17  ;;  %3155 = vmatpush3.bf16.msra.mxu1 %v3683_v32 }
 0x232   :  { %3171 = vmatprep.subr.bf16.mxu1 %v3821_v33 }
 0x234   :  { %2378 = vmatmul.mubr.bf16.vlgmr.msra.gmra.mrb[4].mxu0 %v1645_v63  ;;  %v3690_v63 = vld [vmem:[#allocation8 + $0xb0] sm:$0xff]  }
 0x2c7   :  { %v3112_v34 = vpop.f32.mrb[4].mxu1 }
 0x2c8   :  { %v3113_v35 = vpop.f32.mrb[5].mxu1 }
 0x2c9   :  { %v3114_v36 = vadd.f32 %v3113_v35, %v3112_v34  ;;  %v3115_v37 = vpop.f32.mrb[6].mxu1 }
 0x2ca   :  { %v3116_v38 = vpop.f32.mrb[7].mxu1 }
 0x2cb   :  { %v2421_v43 = vadd.f32 %v3114_v36, %v1788_v40 }
 0x2e7   :  { %v3134_v41 = vpop.f32.mrb[8].mxu1 }
 0x2e8   :  { %v3135_v42 = vpop.f32.mrb[9].mxu1 }
 0x2e9   :  { %v3136_v44 = vadd.f32 %v3135_v42, %v3134_v41  ;;  %v3137_v46 = vpop.f32.mrb[10].mxu1 }
 0x2ea   :  { %v3138_v47 = vpop.f32.mrb[11].mxu1 }
 0x2eb   :  { %v2461_v48 = vadd.f32 %v3136_v44, %v2421_v43 }
 0x2ed   :  { %v2468_v1 = vmax.f32 %v2461_v48, 0.0 }
 0x2ef   :  { %v2471_v4 = vpack.c.bf16 %v2468_v1, %v2468_v1 }
 0x307   :  { %v2379_v51 = vpop.f32.mrb[4].mxu0 }
 0x308   :  { %v3195_v52 = vadd.f32 %v2379_v51, %v1780_v49  ;;  %v2381_v53 = vpop.f32.mrb[5].mxu0 }
 0x309   :  { %v3196_v54 = vadd.f32 %v2381_v53, %v1784_v50  ;;  %v2383_v55 = vpop.f32.mrb[6].mxu0 }
 0x30a   :  { %v2466_v56 = vmax.f32 %v3195_v52, 0.0  ;;  %v2384_v45 = vpop.f32.mrb[7].mxu0 }
 0x30b   :  { %v2467_v57 = vmax.f32 %v3196_v54, 0.0 }
 0x30c   :  { %v2469_v60 = vpack.c.bf16 %v2466_v56, %v2466_v56 }
 0x30d   :  { %v2470_v58 = vpack.c.bf16 %v2467_v57, %v2467_v57 }
 0x30f   :  { %2703 = vmatprep.mubr.bf16.mxu1 %v2470_v58 }
 0x310   :  { %2704 = vmatmul.mubr.bf16.vlgmr.msra.gmra.mrb[12].mxu1 %v2469_v60 }
 0x311   :  { %3172 = vmatpush3.bf16.msra.mxu1 %v3684_v59  ;;  %3187 = vmatprep.mubr.msk.bf16.mxu1 %vm3822_vm1, %v3821_v33 }
 0x312   :  { %3173 = vmatprep.subr.bf16.mxu1 %v3821_v33 }
 0x315   :  { %3174 = vmatpush3.bf16.msra.mxu1 %v3685_v61 }
 0x316   :  { %3175 = vmatprep.subr.bf16.mxu1 %v3821_v33 }
 0x319   :  { %3176 = vmatpush3.bf16.msra.mxu1 %v3686_v2 }
 0x31a   :  { %3177 = vmatprep.subr.bf16.mxu1 %v3821_v33 }
 0x31d   :  { %3178 = vmatpush3.bf16.msra.mxu1 %v3687_v3 }
 0x31e   :  { %3179 = vmatprep.subr.bf16.mxu1 %v3821_v33 }
 0x321   :  { %3180 = vmatpush3.bf16.msra.mxu1 %v3688_v5 }
 0x322   :  { %3181 = vmatprep.subr.bf16.mxu1 %v3821_v33 }
 0x325   :  { %3182 = vmatpush3.bf16.msra.mxu1 %v3689_v62 }
 0x326   :  { %3183 = vmatprep.subr.bf16.mxu1 %v3821_v33 }
 0x329   :  { %3184 = vmatpush3.bf16.msra.mxu1 %v3690_v63 }
 0x32a   :  { %3185 = vmatprep.subr.bf16.mxu1 %v3821_v33 }
 0x32d   :  { %3186 = vmatpush3.bf16.msra.mxu1 %v3691_v0 }
 0x330   :  { %3188 = vmatmul.mubr.bf16.vlgmr.msra.gmra.mrb[16].mxu1 %v2471_v4 }
 0x3e3   :  { %v3156_v6 = vpop.f32.mrb[12].mxu1 }
 0x3e4   :  { %v3157_v7 = vpop.f32.mrb[13].mxu1 }
 0x3e5   :  { %v3158_v8 = vadd.f32 %v3157_v7, %v3156_v6  ;;  %v3159_v9 = vpop.f32.mrb[14].mxu1 }
 0x3e6   :  { %v3160_v10 = vpop.f32.mrb[15].mxu1 }
 0x3e7   :  { %v2706_v13 = vadd.f32 %v3158_v8, %v3071_v12 }
 0x403   :  { %v2745_v14 = vpop.f32.mrb[16].mxu1 }
 0x404   :  { %v2746_v15 = vadd.f32 %v2745_v14, %v2706_v13  ;;  %v3189_v16 = vpop.f32.mrb[17].mxu1 }
 0x405   :  { %v2748_v17 = vpop.f32.mrb[18].mxu1 }
 0x406   :  { %v2751_v18 = vmax.f32 %v2746_v15, 0.0  ;;  %v3190_v19 = vpop.f32.mrb[19].mxu1 }
 0x408   :  { %2752 = vst [vmem:[#allocation10] sm:$0xff] %v2751_v18 }
 0x409   :  { %3791 = shalt.err (!%p3788_p8)
}
 0x40a   :  { %s3792_s12 = scalar_lea.hbm %s3979_s7, 128 }
 0x40b   :  { %p3793_p9 = scmp.ne.s32.totalorder %s3979_s7, %s3792_s12  ;;  %p3796_p10 = scmp.lt.u32.totalorder %s3792_s12, %s3979_s7 }
 0x40d   :  { %p3798_p11 = pnand %p3796_p10, %p3793_p9 }
 0x40f   :  { %3801 = shalt.err (!%p3798_p11)
}
 0x410   :  { %2762 = dma.vmem_to_hbm [thread:$0]  %s2760_s9, 128, %s3979_s7, [#allocation4]  }
 0x411   :  { %3808 = dma.done.wait [#allocation4], 128  }
 0x412   :  { %3809 = vsyncadd [#allocation4], 4294967168 }
 0x413   :  { %2766 = vsyncpa [#allocation3], 1 }
 0x414   :  { %2767 = vsyncpa [#allocation6], 1 }
 0x415   :  { %2768 = vsyncpa [#allocation9], 1 }
 0x416   :  { %2769 = vsyncpa [#allocation4], 1 }

// kernel: tpu_custom_call.1
= control target key start
LH: loop header
LB: loop body
LE: loop exit
PB: predicated region body
PF: predicated region fallthrough
CT: control target
= control target key end

     0   :  { %12 = vsyncpa [#allocation3], 0  ;;  %s3972_s0 = inlined_call_operand.hbm [shape: bf16[8,784], index: 0, kind: input, shape index: {}]   ;;  %s3973_s1 = inlined_call_operand.hbm [shape: bf16[784,512], index: 1, kind: input, shape index: {}]   ;;  %s3974_s2 = inlined_call_operand.vmem [shape: f32[1,512], index: 2, kind: input, shape index: {}]   ;;  %s3975_s3 = inlined_call_operand.hbm [shape: bf16[512,384], index: 3, kind: input, shape index: {}]   ;;  %s3976_s4 = inlined_call_operand.vmem [shape: f32[1,384], index: 4, kind: input, shape index: {}]   ;;  %s3977_s5 = inlined_call_operand.hbm [shape: bf16[384,128], index: 5, kind: input, shape index: {}]   ;;  %s3978_s6 = inlined_call_operand.vmem [shape: f32[1,128], index: 6, kind: input, shape index: {}]   ;;  %s3979_s7 = inlined_call_operand.hbm [shape: f32[8,128], index: 7, kind: output, shape index: {}]  }
   0x1   :  { %13 = vsyncpa [#allocation6], 0 }
   0x2   :  { %14 = vsyncpa [#allocation9], 0 }
   0x3   :  { %15 = vsyncpa [#allocation4], 0  ;;  %s3810_s24 = smov [#allocation5]   ;;  %s3692_s28 = scalar_lea.hbm %s3973_s1, 25088 }
   0x4   :  { %s31_s25 = sshll.u32 %s3810_s24, 4  ;;  %p3693_p0 = scmp.ne.s32.totalorder %s3973_s1, %s3692_s28  ;;  %s32_s25 = int_to_ptr.vmem [resolvable:$true] %s31_s25 }
   0x5   :  { %p3696_p1 = scmp.lt.u32.totalorder %s3692_s28, %s3973_s1 }
   0x7   :  { %p3698_p2 = pnand %p3696_p1, %p3693_p0 }
   0x9   :  { %3701 = shalt.err (!%p3698_p2)
}
   0xa   :  { %s3702_s10 = scalar_lea.vmem %s32_s25, 25088  ;;  %p3707_p4 = scmp.lt.s32.totalorder %s32_s25, %s32_s25 }
   0xb   :  { %p3703_p3 = scmp.ne.s32.totalorder %s32_s25, %s3702_s10  ;;  %p3708_p5 = scmp.lt.s32.totalorder %s3702_s10, %s3702_s10 }
   0xd   :  { %p3709_p6 = por %p3708_p5, %p3707_p4 }
   0xf   :  { %p3710_p7 = pnand %p3709_p6, %p3703_p3 }
  0x11   :  { %3713 = shalt.err (!%p3710_p7)
}
  0x12   :  { %s3811_s11 = smov 256   ;;  %s3812_s12 = smov 16  }
  0x13   :  { %37 = dma.hbm_to_vmem [thread:$0]  %s3973_s1, 25088, %s32_s25, [#allocation6], %s3811_s11, %s3811_s11, %s3812_s12  }
  0x14   :  { %s3813_s15 = smov [#allocation2]   ;;  %s3814_s17 = smov [#allocation7]  }
  0x15   :  { %s22_s16 = sshll.u32 %s3813_s15, 4  ;;  %s45_s18 = sshll.u32 %s3814_s17, 4  ;;  %s23_s16 = int_to_ptr.vmem [resolvable:$true] %s22_s16  ;;  %s46_s18 = int_to_ptr.vmem [resolvable:$true] %s45_s18 }
  0x16   :  { %s3714_s21 = scalar_lea.hbm %s3972_s0, 448 }
  0x17   :  { %p3715_p8 = scmp.ne.s32.totalorder %s3972_s0, %s3714_s21  ;;  %p3718_p9 = scmp.lt.u32.totalorder %s3714_s21, %s3972_s0 }
  0x19   :  { %p3720_p10 = pnand %p3718_p9, %p3715_p8 }
  0x1b   :  { %3723 = shalt.err (!%p3720_p10)
}
  0x1c   :  { %s3724_s1 = scalar_lea.vmem %s23_s16, 448  ;;  %p3729_p12 = scmp.lt.s32.totalorder %s23_s16, %s23_s16 }
  0x1d   :  { %p3725_p11 = scmp.ne.s32.totalorder %s23_s16, %s3724_s1  ;;  %p3730_p13 = scmp.lt.s32.totalorder %s3724_s1, %s3724_s1 }
  0x1f   :  { %p3731_p0 = por %p3730_p13, %p3729_p12 }
  0x21   :  { %p3732_p1 = pnand %p3731_p0, %p3725_p11 }
  0x23   :  { %3735 = shalt.err (!%p3732_p1)
}
  0x24   :  { %25 = dma.hbm_to_vmem [thread:$0]  %s3972_s0, 448, %s23_s16, [#allocation3]  }
  0x25   :  { %s3736_s30 = scalar_lea.hbm %s3975_s3, 12288 }
  0x26   :  { %p3737_p2 = scmp.ne.s32.totalorder %s3975_s3, %s3736_s30  ;;  %p3740_p3 = scmp.lt.u32.totalorder %s3736_s30, %s3975_s3 }
  0x28   :  { %p3742_p4 = pnand %p3740_p3, %p3737_p2 }
  0x2a   :  { %3745 = shalt.err (!%p3742_p4)
}
  0x2b   :  { %s3746_s12 = scalar_lea.vmem %s46_s18, 12288  ;;  %p3751_p6 = scmp.lt.s32.totalorder %s46_s18, %s46_s18 }
  0x2c   :  { %p3747_p5 = scmp.ne.s32.totalorder %s46_s18, %s3746_s12  ;;  %p3752_p7 = scmp.lt.s32.totalorder %s3746_s12, %s3746_s12 }
  0x2e   :  { %p3753_p8 = por %p3752_p7, %p3751_p6 }
  0x30   :  { %p3754_p9 = pnand %p3753_p8, %p3747_p5 }
  0x32   :  { %3757 = shalt.err (!%p3754_p9)
}
  0x33   :  { %s3815_s0 = smov 192   ;;  %s3816_s13 = smov 12  }
  0x34   :  { %51 = dma.hbm_to_vmem [thread:$0]  %s3975_s3, 12288, %s46_s18, [#allocation6], %s3815_s0, %s3815_s0, %s3816_s13  }
  0x35   :  { %s3817_s16 = smov [#allocation8]   ;;  %s3758_s21 = scalar_lea.hbm %s3977_s5, 3072 }
  0x36   :  { %s59_s17 = sshll.u32 %s3817_s16, 4  ;;  %p3759_p10 = scmp.ne.s32.totalorder %s3977_s5, %s3758_s21  ;;  %s60_s17 = int_to_ptr.vmem [resolvable:$true] %s59_s17 }
  0x37   :  { %p3762_p11 = scmp.lt.u32.totalorder %s3758_s21, %s3977_s5 }
  0x39   :  { %p3764_p12 = pnand %p3762_p11, %p3759_p10 }
  0x3b   :  { %3767 = shalt.err (!%p3764_p12)
}
  0x3c   :  { %s3768_s1 = scalar_lea.vmem %s60_s17, 3072  ;;  %p3773_p0 = scmp.lt.s32.totalorder %s60_s17, %s60_s17 }
  0x3d   :  { %p3769_p13 = scmp.ne.s32.totalorder %s60_s17, %s3768_s1  ;;  %p3774_p1 = scmp.lt.s32.totalorder %s3768_s1, %s3768_s1 }
  0x3f   :  { %p3775_p2 = por %p3774_p1, %p3773_p0 }
  0x41   :  { %p3776_p3 = pnand %p3775_p2, %p3769_p13 }
  0x43   :  { %3779 = shalt.err (!%p3776_p3)
}
  0x44   :  { %s3818_s3 = smov 64   ;;  %s3819_s18 = smov 4  }
  0x45   :  { %65 = dma.hbm_to_vmem [thread:$0]  %s3977_s5, 3072, %s60_s17, [#allocation9], %s3818_s3, %s3818_s3, %s3819_s18  }
  0x46   :  { %3802 = dma.done.wait [#allocation3], 448  }
  0x47   :  { %3803 = vsyncadd [#allocation3], 4294966848 }
  0x48   :  { %3804 = dma.done.wait [#allocation6], 37376  }
  0x49   :  { %3805 = vsyncadd [#allocation6], 4294929920 }
  0x4a   :  { %3806 = dma.done.wait [#allocation9], 3072  }
  0x4b   :  { %3807 = vsyncadd [#allocation9], 4294964224  ;;  %v3239_v0 = vld [vmem:[#allocation5 + $0x4] ss:$16 sps:$4 sm:$0xff]   ;;  %v3241_v1 = vld [vmem:[#allocation5 + $0xc] ss:$16 sps:$4 sm:$0xff]  }
  0x4c   :  { %1311 = vmatprep.subr.bf16.mxu0 %v3239_v0  ;;  %v3243_v2 = vld [vmem:[#allocation5] ss:$16 sps:$4 sm:$0xff]   ;;  %v3244_v3 = vld [vmem:[#allocation5 + $0x8] ss:$16 sps:$4 sm:$0xff]   ;;  %1475 = vmatprep.subr.bf16.mxu1 %v3241_v1  ;;  %v3245_v4 = vld [vmem:[#allocation5 + $0x24] ss:$16 sps:$4 sm:$0xff]  }
  0x4d   :  { %1312 = vmatpush1.bf16.msra.mxu0 %v3243_v2  ;;  %1476 = vmatpush1.bf16.msra.mxu1 %v3244_v3  ;;  %v3247_v5 = vld [vmem:[#allocation5 + $0x2c] ss:$16 sps:$4 sm:$0xff]   ;;  %v3249_v6 = vld [vmem:[#allocation5 + $0x20] ss:$16 sps:$4 sm:$0xff]   ;;  %v3250_v7 = vld [vmem:[#allocation5 + $0x28] ss:$16 sps:$4 sm:$0xff]  }
  0x4e   :  { %1313 = vmatprep.subr.bf16.mxu0 %v3245_v4  ;;  %1477 = vmatprep.subr.bf16.mxu1 %v3247_v5  ;;  %v3251_v8 = vld [vmem:[#allocation5 + $0x44] ss:$16 sps:$4 sm:$0xff]   ;;  %v3253_v9 = vld [vmem:[#allocation5 + $0x4c] ss:$16 sps:$4 sm:$0xff]   ;;  %v3255_v10 = vld [vmem:[#allocation5 + $0x40] ss:$16 sps:$4 sm:$0xff]  }
  0x4f   :  { %v3256_v11 = vld [vmem:[#allocation5 + $0x48] ss:$16 sps:$4 sm:$0xff]   ;;  %v3257_v12 = vld [vmem:[#allocation5 + $0x64] ss:$16 sps:$4 sm:$0xff]   ;;  %v3259_v13 = vld [vmem:[#allocation5 + $0x6c] ss:$16 sps:$4 sm:$0xff]  }
  0x50   :  { %v3261_v14 = vld [vmem:[#allocation5 + $0x60] ss:$16 sps:$4 sm:$0xff]   ;;  %v3262_v15 = vld [vmem:[#allocation5 + $0x68] ss:$16 sps:$4 sm:$0xff]   ;;  %v3263_v16 = vld [vmem:[#allocation5 + $0x84] ss:$16 sps:$4 sm:$0xff]  }
  0x51   :  { %1314 = vmatpush1.bf16.msra.mxu0 %v3249_v6  ;;  %1478 = vmatpush1.bf16.msra.mxu1 %v3250_v7  ;;  %v3265_v17 = vld [vmem:[#allocation5 + $0x8c] ss:$16 sps:$4 sm:$0xff]   ;;  %v3267_v18 = vld [vmem:[#allocation5 + $0x80] ss:$16 sps:$4 sm:$0xff]   ;;  %v3268_v19 = vld [vmem:[#allocation5 + $0x88] ss:$16 sps:$4 sm:$0xff]  }
  0x52   :  { %1315 = vmatprep.subr.bf16.mxu0 %v3251_v8  ;;  %1479 = vmatprep.subr.bf16.mxu1 %v3253_v9  ;;  %v3269_v20 = vld [vmem:[#allocation5 + $0xa4] ss:$16 sps:$4 sm:$0xff]   ;;  %v3271_v21 = vld [vmem:[#allocation5 + $0xac] ss:$16 sps:$4 sm:$0xff]   ;;  %v3273_v22 = vld [vmem:[#allocation5 + $0xa0] ss:$16 sps:$4 sm:$0xff]  }
  0x53   :  { %v3274_v23 = vld [vmem:[#allocation5 + $0xa8] ss:$16 sps:$4 sm:$0xff]   ;;  %v3275_v24 = vld [vmem:[#allocation5 + $0xc4] ss:$16 sps:$4 sm:$0xff]   ;;  %v3277_v25 = vld [vmem:[#allocation5 + $0xcc] ss:$16 sps:$4 sm:$0xff]  }
  0x54   :  { %v3279_v26 = vld [vmem:[#allocation5 + $0xc0] ss:$16 sps:$4 sm:$0xff]   ;;  %v3280_v27 = vld [vmem:[#allocation5 + $0xc8] ss:$16 sps:$4 sm:$0xff]   ;;  %v3281_v28 = vld [vmem:[#allocation5 + $0xe4] ss:$16 sps:$4 sm:$0xff]  }
  0x55   :  { %1316 = vmatpush1.bf16.msra.mxu0 %v3255_v10  ;;  %1480 = vmatpush1.bf16.msra.mxu1 %v3256_v11  ;;  %v3283_v29 = vld [vmem:[#allocation5 + $0xec] ss:$16 sps:$4 sm:$0xff]   ;;  %v3285_v30 = vld [vmem:[#allocation5 + $0xe0] ss:$16 sps:$4 sm:$0xff]   ;;  %v3286_v31 = vld [vmem:[#allocation5 + $0xe8] ss:$16 sps:$4 sm:$0xff]  }
  0x56   :  { %1317 = vmatprep.subr.bf16.mxu0 %v3257_v12  ;;  %1481 = vmatprep.subr.bf16.mxu1 %v3259_v13  ;;  %v3287_v32 = vld [vmem:[#allocation5 + $0x104] ss:$16 sps:$4 sm:$0xff]   ;;  %v3289_v33 = vld [vmem:[#allocation5 + $0x10c] ss:$16 sps:$4 sm:$0xff]   ;;  %v3291_v34 = vld [vmem:[#allocation5 + $0x100] ss:$16 sps:$4 sm:$0xff]  }
  0x57   :  { %v3292_v35 = vld [vmem:[#allocation5 + $0x108] ss:$16 sps:$4 sm:$0xff]   ;;  %v3293_v36 = vld [vmem:[#allocation5 + $0x124] ss:$16 sps:$4 sm:$0xff]   ;;  %v3295_v37 = vld [vmem:[#allocation5 + $0x12c] ss:$16 sps:$4 sm:$0xff]  }
  0x58   :  { %v3297_v38 = vld [vmem:[#allocation5 + $0x120] ss:$16 sps:$4 sm:$0xff]   ;;  %v3298_v39 = vld [vmem:[#allocation5 + $0x128] ss:$16 sps:$4 sm:$0xff]   ;;  %v3299_v40 = vld [vmem:[#allocation5 + $0x144] ss:$16 sps:$4 sm:$0xff]  }
  0x59   :  { %1318 = vmatpush1.bf16.msra.mxu0 %v3261_v14  ;;  %1482 = vmatpush1.bf16.msra.mxu1 %v3262_v15  ;;  %v3301_v41 = vld [vmem:[#allocation5 + $0x14c] ss:$16 sps:$4 sm:$0xff]   ;;  %v3303_v42 = vld [vmem:[#allocation5 + $0x140] ss:$16 sps:$4 sm:$0xff]   ;;  %v3304_v43 = vld [vmem:[#allocation5 + $0x148] ss:$16 sps:$4 sm:$0xff]  }
  0x5a   :  { %1319 = vmatprep.subr.bf16.mxu0 %v3263_v16  ;;  %1483 = vmatprep.subr.bf16.mxu1 %v3265_v17  ;;  %v3305_v44 = vld [vmem:[#allocation5 + $0x164] ss:$16 sps:$4 sm:$0xff]   ;;  %v3307_v45 = vld [vmem:[#allocation5 + $0x16c] ss:$16 sps:$4 sm:$0xff]   ;;  %v3309_v47 = vld [vmem:[#allocation5 + $0x160] ss:$16 sps:$4 sm:$0xff]  }
  0x5b   :  { %v81_v46 = vld [vmem:[#allocation2] sm:$0xff]  ;;  %v3313_v51 = vld [vmem:[#allocation5 + $0x18c] ss:$16 sps:$4 sm:$0xff]   ;;  %v3315_v52 = vld [vmem:[#allocation5 + $0x180] ss:$16 sps:$4 sm:$0xff]   ;;  %vm1307_vm0 = vcmask 130048  }
  0x5c   :  { %v2771_v48 = vcombine.high %v81_v46, %v81_v46  ;;  %v3310_v49 = vld [vmem:[#allocation5 + $0x168] ss:$16 sps:$4 sm:$0xff]   ;;  %v3311_v50 = vld [vmem:[#allocation5 + $0x184] ss:$16 sps:$4 sm:$0xff]   ;;  %v3319_v55 = vld [vmem:[#allocation5 + $0x1ac] ss:$16 sps:$4 sm:$0xff]   ;;  %v2770_v4 = vcombine.low %v81_v46, %v81_v46 }
  0x5d   :  { %1320 = vmatpush1.bf16.msra.mxu0 %v3267_v18  ;;  %1484 = vmatpush1.bf16.msra.mxu1 %v3268_v19  ;;  %v3316_v53 = vld [vmem:[#allocation5 + $0x188] ss:$16 sps:$4 sm:$0xff]   ;;  %v3317_v54 = vld [vmem:[#allocation5 + $0x1a4] ss:$16 sps:$4 sm:$0xff]   ;;  %v3321_v56 = vld [vmem:[#allocation5 + $0x1a0] ss:$16 sps:$4 sm:$0xff]  }
  0x5e   :  { %1321 = vmatprep.subr.bf16.mxu0 %v3269_v20  ;;  %1485 = vmatprep.subr.bf16.mxu1 %v3271_v21  ;;  %v3322_v57 = vld [vmem:[#allocation5 + $0x1a8] ss:$16 sps:$4 sm:$0xff]   ;;  %v3323_v58 = vld [vmem:[#allocation5 + $0x1c4] ss:$16 sps:$4 sm:$0xff]   ;;  %v3325_v59 = vld [vmem:[#allocation5 + $0x1cc] ss:$16 sps:$4 sm:$0xff]  }
  0x5f   :  { %1343 = vmatprep.mubr.bf16.mxu0 %v2771_v48  ;;  %1507 = vmatprep.mubr.bf16.mxu1 %v2771_v48  ;;  %v3327_v60 = vld [vmem:[#allocation5 + $0x1c0] ss:$16 sps:$4 sm:$0xff]   ;;  %v3328_v61 = vld [vmem:[#allocation5 + $0x1c8] ss:$16 sps:$4 sm:$0xff]   ;;  %v3329_v62 = vld [vmem:[#allocation5 + $0x1e4] ss:$16 sps:$4 sm:$0xff]  }
  0x60   :  { %v3331_v63 = vld [vmem:[#allocation5 + $0x1ec] ss:$16 sps:$4 sm:$0xff]   ;;  %v3333_v0 = vld [vmem:[#allocation5 + $0x1e0] ss:$16 sps:$4 sm:$0xff]   ;;  %v3334_v1 = vld [vmem:[#allocation5 + $0x1e8] ss:$16 sps:$4 sm:$0xff]  }
  0x61   :  { %1322 = vmatpush1.bf16.msra.mxu0 %v3273_v22  ;;  %1486 = vmatpush1.bf16.msra.mxu1 %v3274_v23  ;;  %v3339_v2 = vld [vmem:[#allocation5 + $0x204] ss:$16 sps:$4 sm:$0xff]   ;;  %v3342_v3 = vld [vmem:[#allocation5 + $0x20c] ss:$16 sps:$4 sm:$0xff]   ;;  %v3337_v5 = vld [vmem:[#allocation5 + $0x200] ss:$16 sps:$4 sm:$0xff]  }
  0x62   :  { %1323 = vmatprep.subr.bf16.mxu0 %v3275_v24  ;;  %1487 = vmatprep.subr.bf16.mxu1 %v3277_v25  ;;  %v3340_v6 = vld [vmem:[#allocation5 + $0x208] ss:$16 sps:$4 sm:$0xff]   ;;  %v3345_v7 = vld [vmem:[#allocation5 + $0x224] ss:$16 sps:$4 sm:$0xff]   ;;  %v3348_v8 = vld [vmem:[#allocation5 + $0x22c] ss:$16 sps:$4 sm:$0xff]  }
  0x63   :  { %v3343_v9 = vld [vmem:[#allocation5 + $0x220] ss:$16 sps:$4 sm:$0xff]   ;;  %v3346_v10 = vld [vmem:[#allocation5 + $0x228] ss:$16 sps:$4 sm:$0xff]   ;;  %v3351_v11 = vld [vmem:[#allocation5 + $0x244] ss:$16 sps:$4 sm:$0xff]  }
  0x64   :  { %v3354_v12 = vld [vmem:[#allocation5 + $0x24c] ss:$16 sps:$4 sm:$0xff]   ;;  %v3349_v13 = vld [vmem:[#allocation5 + $0x240] ss:$16 sps:$4 sm:$0xff]   ;;  %v3352_v14 = vld [vmem:[#allocation5 + $0x248] ss:$16 sps:$4 sm:$0xff]  }
  0x65   :  { %1324 = vmatpush1.bf16.msra.mxu0 %v3279_v26  ;;  %1488 = vmatpush1.bf16.msra.mxu1 %v3280_v27  ;;  %v3357_v15 = vld [vmem:[#allocation5 + $0x264] ss:$16 sps:$4 sm:$0xff]   ;;  %v3360_v16 = vld [vmem:[#allocation5 + $0x26c] ss:$16 sps:$4 sm:$0xff]   ;;  %v3355_v17 = vld [vmem:[#allocation5 + $0x260] ss:$16 sps:$4 sm:$0xff]  }
  0x66   :  { %1325 = vmatprep.subr.bf16.mxu0 %v3281_v28  ;;  %1489 = vmatprep.subr.bf16.mxu1 %v3283_v29  ;;  %v3358_v18 = vld [vmem:[#allocation5 + $0x268] ss:$16 sps:$4 sm:$0xff]   ;;  %v3363_v19 = vld [vmem:[#allocation5 + $0x284] ss:$16 sps:$4 sm:$0xff]   ;;  %v3366_v20 = vld [vmem:[#allocation5 + $0x28c] ss:$16 sps:$4 sm:$0xff]  }
  0x67   :  { %v3361_v21 = vld [vmem:[#allocation5 + $0x280] ss:$16 sps:$4 sm:$0xff]   ;;  %v3364_v22 = vld [vmem:[#allocation5 + $0x288] ss:$16 sps:$4 sm:$0xff]   ;;  %v3369_v23 = vld [vmem:[#allocation5 + $0x2a4] ss:$16 sps:$4 sm:$0xff]  }
  0x68   :  { %v3372_v24 = vld [vmem:[#allocation5 + $0x2ac] ss:$16 sps:$4 sm:$0xff]   ;;  %v3367_v25 = vld [vmem:[#allocation5 + $0x2a0] ss:$16 sps:$4 sm:$0xff]   ;;  %v3370_v26 = vld [vmem:[#allocation5 + $0x2a8] ss:$16 sps:$4 sm:$0xff]  }
  0x69   :  { %1326 = vmatpush1.bf16.msra.mxu0 %v3285_v30  ;;  %1490 = vmatpush1.bf16.msra.mxu1 %v3286_v31  ;;  %v3375_v27 = vld [vmem:[#allocation5 + $0x2c4] ss:$16 sps:$4 sm:$0xff]   ;;  %v3378_v28 = vld [vmem:[#allocation5 + $0x2cc] ss:$16 sps:$4 sm:$0xff]   ;;  %v3373_v31 = vld [vmem:[#allocation5 + $0x2c0] ss:$16 sps:$4 sm:$0xff]  }
  0x6a   :  { %1327 = vmatprep.subr.bf16.mxu0 %v3287_v32  ;;  %1491 = vmatprep.subr.bf16.mxu1 %v3289_v33  ;;  %v3912_v29 = vld [vmem:[#allocation2 + $0x8] sm:$0xff]  ;;  %v3376_v32 = vld [vmem:[#allocation5 + $0x2c8] ss:$16 sps:$4 sm:$0xff]   ;;  %v3381_v33 = vld [vmem:[#allocation5 + $0x2e4] ss:$16 sps:$4 sm:$0xff]   ;;  %vm3822_vm1 = vmmov 0  }
  0x6b   :  { %v2773_v30 = vcombine.high %v3912_v29, %v3912_v29  ;;  %v3402_v46 = vld [vmem:[#allocation5 + $0x34c] ss:$16 sps:$4 sm:$0xff]   ;;  %v3400_v48 = vld [vmem:[#allocation5 + $0x348] ss:$16 sps:$4 sm:$0xff]   ;;  %s3823_s8 = smov [#allocation10]  }
  0x6c   :  { %s2759_s9 = sshll.u32 %s3823_s8, 4  ;;  %s2760_s9 = int_to_ptr.vmem [resolvable:$true] %s2759_s9 }
  0x6d   :  { %1328 = vmatpush1.bf16.msra.mxu0 %v3291_v34  ;;  %1492 = vmatpush1.bf16.msra.mxu1 %v3292_v35  ;;  %v3384_v34 = vld [vmem:[#allocation5 + $0x2ec] ss:$16 sps:$4 sm:$0xff]   ;;  %v3379_v35 = vld [vmem:[#allocation5 + $0x2e0] ss:$16 sps:$4 sm:$0xff]   ;;  %s3780_s10 = scalar_lea.vmem %s2760_s9, 128  ;;  %p3785_p5 = scmp.lt.s32.totalorder %s2760_s9, %s2760_s9 }
  0x6e   :  { %1329 = vmatprep.subr.bf16.mxu0 %v3293_v36  ;;  %1493 = vmatprep.subr.bf16.mxu1 %v3295_v37  ;;  %v3382_v36 = vld [vmem:[#allocation5 + $0x2e8] ss:$16 sps:$4 sm:$0xff]   ;;  %v3387_v37 = vld [vmem:[#allocation5 + $0x304] ss:$16 sps:$4 sm:$0xff]   ;;  %p3781_p4 = scmp.ne.s32.totalorder %s2760_s9, %s3780_s10  ;;  %p3786_p6 = scmp.lt.s32.totalorder %s3780_s10, %s3780_s10 }
  0x70   :  { %p3787_p7 = por %p3786_p6, %p3785_p5 }
  0x71   :  { %1330 = vmatpush1.bf16.msra.mxu0 %v3297_v38  ;;  %1494 = vmatpush1.bf16.msra.mxu1 %v3298_v39  ;;  %v3390_v38 = vld [vmem:[#allocation5 + $0x30c] ss:$16 sps:$4 sm:$0xff]   ;;  %v3385_v39 = vld [vmem:[#allocation5 + $0x300] ss:$16 sps:$4 sm:$0xff]  }
  0x72   :  { %1331 = vmatprep.subr.bf16.mxu0 %v3299_v40  ;;  %1495 = vmatprep.subr.bf16.mxu1 %v3301_v41  ;;  %v3388_v40 = vld [vmem:[#allocation5 + $0x308] ss:$16 sps:$4 sm:$0xff]   ;;  %v3393_v41 = vld [vmem:[#allocation5 + $0x324] ss:$16 sps:$4 sm:$0xff]   ;;  %p3788_p8 = pnand %p3787_p7, %p3781_p4 }
  0x75   :  { %1332 = vmatpush1.bf16.msra.mxu0 %v3303_v42  ;;  %1496 = vmatpush1.bf16.msra.mxu1 %v3304_v43  ;;  %v3396_v42 = vld [vmem:[#allocation5 + $0x32c] ss:$16 sps:$4 sm:$0xff]   ;;  %v3391_v43 = vld [vmem:[#allocation5 + $0x320] ss:$16 sps:$4 sm:$0xff]  }
  0x76   :  { %1333 = vmatprep.subr.bf16.mxu0 %v3305_v44  ;;  %1497 = vmatprep.subr.bf16.mxu1 %v3307_v45  ;;  %v3394_v44 = vld [vmem:[#allocation5 + $0x328] ss:$16 sps:$4 sm:$0xff]   ;;  %v3399_v45 = vld [vmem:[#allocation5 + $0x344] ss:$16 sps:$4 sm:$0xff]  }
  0x79   :  { %1334 = vmatpush1.bf16.msra.mxu0 %v3309_v47  ;;  %1498 = vmatpush1.bf16.msra.mxu1 %v3310_v49  ;;  %v3397_v47 = vld [vmem:[#allocation5 + $0x340] ss:$16 sps:$4 sm:$0xff]   ;;  %v3405_v49 = vld [vmem:[#allocation5 + $0x364] ss:$16 sps:$4 sm:$0xff]  }
  0x7a   :  { %1335 = vmatprep.subr.bf16.mxu0 %v3311_v50  ;;  %1499 = vmatprep.subr.bf16.mxu1 %v3313_v51  ;;  %v3408_v50 = vld [vmem:[#allocation5 + $0x36c] ss:$16 sps:$4 sm:$0xff]   ;;  %v3403_v51 = vld [vmem:[#allocation5 + $0x360] ss:$16 sps:$4 sm:$0xff]  }
  0x7d   :  { %1336 = vmatpush1.bf16.msra.mxu0 %v3315_v52  ;;  %1500 = vmatpush1.bf16.msra.mxu1 %v3316_v53  ;;  %v3406_v52 = vld [vmem:[#allocation5 + $0x368] ss:$16 sps:$4 sm:$0xff]   ;;  %v3411_v53 = vld [vmem:[#allocation5 + $0x384] ss:$16 sps:$4 sm:$0xff]  }
  0x7e   :  { %1337 = vmatprep.subr.bf16.mxu0 %v3317_v54  ;;  %1501 = vmatprep.subr.bf16.mxu1 %v3319_v55  ;;  %v3414_v54 = vld [vmem:[#allocation5 + $0x38c] ss:$16 sps:$4 sm:$0xff]   ;;  %v3409_v55 = vld [vmem:[#allocation5 + $0x380] ss:$16 sps:$4 sm:$0xff]  }
  0x81   :  { %1338 = vmatpush1.bf16.msra.mxu0 %v3321_v56  ;;  %1502 = vmatpush1.bf16.msra.mxu1 %v3322_v57  ;;  %v3412_v56 = vld [vmem:[#allocation5 + $0x388] ss:$16 sps:$4 sm:$0xff]   ;;  %v3417_v57 = vld [vmem:[#allocation5 + $0x3a4] ss:$16 sps:$4 sm:$0xff]  }
  0x82   :  { %1339 = vmatprep.subr.bf16.mxu0 %v3323_v58  ;;  %1503 = vmatprep.subr.bf16.mxu1 %v3325_v59  ;;  %v3420_v58 = vld [vmem:[#allocation5 + $0x3ac] ss:$16 sps:$4 sm:$0xff]   ;;  %v3415_v59 = vld [vmem:[#allocation5 + $0x3a0] ss:$16 sps:$4 sm:$0xff]  }
  0x85   :  { %1340 = vmatpush1.bf16.msra.mxu0 %v3327_v60  ;;  %1504 = vmatpush1.bf16.msra.mxu1 %v3328_v61  ;;  %v3418_v60 = vld [vmem:[#allocation5 + $0x3a8] ss:$16 sps:$4 sm:$0xff]   ;;  %v3423_v61 = vld [vmem:[#allocation5 + $0x3c4] ss:$16 sps:$4 sm:$0xff]  }
  0x86   :  { %1341 = vmatprep.subr.bf16.mxu0 %v3329_v62  ;;  %1505 = vmatprep.subr.bf16.mxu1 %v3331_v63  ;;  %v3426_v62 = vld [vmem:[#allocation5 + $0x3cc] ss:$16 sps:$4 sm:$0xff]   ;;  %v3421_v63 = vld [vmem:[#allocation5 + $0x3c0] ss:$16 sps:$4 sm:$0xff]  }
  0x89   :  { %1342 = vmatpush1.bf16.msra.mxu0 %v3333_v0  ;;  %1506 = vmatpush1.bf16.msra.mxu1 %v3334_v1  ;;  %v3424_v0 = vld [vmem:[#allocation5 + $0x3c8] ss:$16 sps:$4 sm:$0xff]   ;;  %v3429_v1 = vld [vmem:[#allocation5 + $0x3e4] ss:$16 sps:$4 sm:$0xff]  }
  0x8a   :  { %1352 = vmatprep.subr.bf16.mxu0 %v3339_v2  ;;  %1516 = vmatprep.subr.bf16.mxu1 %v3342_v3  ;;  %v3432_v2 = vld [vmem:[#allocation5 + $0x3ec] ss:$16 sps:$4 sm:$0xff]   ;;  %v3427_v3 = vld [vmem:[#allocation5 + $0x3e0] ss:$16 sps:$4 sm:$0xff]  }
  0x8c   :  { %1344 = vmatmul.mubr.bf16.vlgmr.msra.gmra.mrb[0].mxu0 %v2770_v4  ;;  %1508 = vmatmul.mubr.bf16.vlgmr.msra.gmra.mrb[0].mxu1 %v2770_v4  ;;  %v3430_v4 = vld [vmem:[#allocation5 + $0x3e8] ss:$16 sps:$4 sm:$0xff]  }
  0x8d   :  { %1353 = vmatpush1.bf16.msra.mxu0 %v3337_v5  ;;  %1517 = vmatpush1.bf16.msra.mxu1 %v3340_v6  ;;  %v3437_v5 = vld [vmem:[#allocation5 + $0x404] ss:$16 sps:$4 sm:$0xff]   ;;  %v3440_v6 = vld [vmem:[#allocation5 + $0x40c] ss:$16 sps:$4 sm:$0xff]  }
  0x8e   :  { %1354 = vmatprep.subr.bf16.mxu0 %v3345_v7  ;;  %1518 = vmatprep.subr.bf16.mxu1 %v3348_v8  ;;  %v2772_v7 = vcombine.low %v3912_v29, %v3912_v29  ;;  %v3435_v8 = vld [vmem:[#allocation5 + $0x400] ss:$16 sps:$4 sm:$0xff]   ;;  %v3470_v29 = vld [vmem:[#allocation5 + $0x4ac] ss:$16 sps:$4 sm:$0xff]  }
  0x8f   :  { %1384 = vmatprep.mubr.bf16.mxu0 %v2773_v30  ;;  %1548 = vmatprep.mubr.bf16.mxu1 %v2773_v30  ;;  %v3465_v30 = vld [vmem:[#allocation5 + $0x4a0] ss:$16 sps:$4 sm:$0xff]  }
  0x91   :  { %1355 = vmatpush1.bf16.msra.mxu0 %v3343_v9  ;;  %1519 = vmatpush1.bf16.msra.mxu1 %v3346_v10  ;;  %v3438_v9 = vld [vmem:[#allocation5 + $0x408] ss:$16 sps:$4 sm:$0xff]   ;;  %v3443_v10 = vld [vmem:[#allocation5 + $0x424] ss:$16 sps:$4 sm:$0xff]  }
  0x92   :  { %1356 = vmatprep.subr.bf16.mxu0 %v3351_v11  ;;  %1520 = vmatprep.subr.bf16.mxu1 %v3354_v12  ;;  %v3918_v11 = vld [vmem:[#allocation2 + $0x10] sm:$0xff]  ;;  %v3446_v12 = vld [vmem:[#allocation5 + $0x42c] ss:$16 sps:$4 sm:$0xff]  }
  0x95   :  { %1357 = vmatpush1.bf16.msra.mxu0 %v3349_v13  ;;  %1521 = vmatpush1.bf16.msra.mxu1 %v3352_v14  ;;  %v2775_v13 = vcombine.high %v3918_v11, %v3918_v11  ;;  %v3441_v14 = vld [vmem:[#allocation5 + $0x420] ss:$16 sps:$4 sm:$0xff]  }
  0x96   :  { %1358 = vmatprep.subr.bf16.mxu0 %v3357_v15  ;;  %1522 = vmatprep.subr.bf16.mxu1 %v3360_v16  ;;  %v3444_v15 = vld [vmem:[#allocation5 + $0x428] ss:$16 sps:$4 sm:$0xff]   ;;  %v3449_v16 = vld [vmem:[#allocation5 + $0x444] ss:$16 sps:$4 sm:$0xff]  }
  0x99   :  { %1359 = vmatpush1.bf16.msra.mxu0 %v3355_v17  ;;  %1523 = vmatpush1.bf16.msra.mxu1 %v3358_v18  ;;  %v3452_v17 = vld [vmem:[#allocation5 + $0x44c] ss:$16 sps:$4 sm:$0xff]   ;;  %v3447_v18 = vld [vmem:[#allocation5 + $0x440] ss:$16 sps:$4 sm:$0xff]  }
  0x9a   :  { %1360 = vmatprep.subr.bf16.mxu0 %v3363_v19  ;;  %1524 = vmatprep.subr.bf16.mxu1 %v3366_v20  ;;  %v3450_v19 = vld [vmem:[#allocation5 + $0x448] ss:$16 sps:$4 sm:$0xff]   ;;  %v3455_v20 = vld [vmem:[#allocation5 + $0x464] ss:$16 sps:$4 sm:$0xff]  }
  0x9d   :  { %1361 = vmatpush1.bf16.msra.mxu0 %v3361_v21  ;;  %1525 = vmatpush1.bf16.msra.mxu1 %v3364_v22  ;;  %v3458_v21 = vld [vmem:[#allocation5 + $0x46c] ss:$16 sps:$4 sm:$0xff]   ;;  %v3453_v22 = vld [vmem:[#allocation5 + $0x460] ss:$16 sps:$4 sm:$0xff]  }
  0x9e   :  { %1362 = vmatprep.subr.bf16.mxu0 %v3369_v23  ;;  %1526 = vmatprep.subr.bf16.mxu1 %v3372_v24  ;;  %v3456_v23 = vld [vmem:[#allocation5 + $0x468] ss:$16 sps:$4 sm:$0xff]   ;;  %v3461_v24 = vld [vmem:[#allocation5 + $0x484] ss:$16 sps:$4 sm:$0xff]  }
  0xa1   :  { %1363 = vmatpush1.bf16.msra.mxu0 %v3367_v25  ;;  %1527 = vmatpush1.bf16.msra.mxu1 %v3370_v26  ;;  %v3464_v25 = vld [vmem:[#allocation5 + $0x48c] ss:$16 sps:$4 sm:$0xff]   ;;  %v3459_v26 = vld [vmem:[#allocation5 + $0x480] ss:$16 sps:$4 sm:$0xff]  }
  0xa2   :  { %1364 = vmatprep.subr.bf16.mxu0 %v3375_v27  ;;  %1528 = vmatprep.subr.bf16.mxu1 %v3378_v28  ;;  %v3462_v27 = vld [vmem:[#allocation5 + $0x488] ss:$16 sps:$4 sm:$0xff]   ;;  %v3467_v28 = vld [vmem:[#allocation5 + $0x4a4] ss:$16 sps:$4 sm:$0xff]  }
  0xa5   :  { %1365 = vmatpush1.bf16.msra.mxu0 %v3373_v31  ;;  %1529 = vmatpush1.bf16.msra.mxu1 %v3376_v32  ;;  %v3468_v31 = vld [vmem:[#allocation5 + $0x4a8] ss:$16 sps:$4 sm:$0xff]   ;;  %v3473_v32 = vld [vmem:[#allocation5 + $0x4c4] ss:$16 sps:$4 sm:$0xff]  }
  0xa6   :  { %1366 = vmatprep.subr.bf16.mxu0 %v3381_v33  ;;  %1530 = vmatprep.subr.bf16.mxu1 %v3384_v34  ;;  %v3476_v33 = vld [vmem:[#allocation5 + $0x4cc] ss:$16 sps:$4 sm:$0xff]   ;;  %v3471_v34 = vld [vmem:[#allocation5 + $0x4c0] ss:$16 sps:$4 sm:$0xff]  }
  0xa9   :  { %1367 = vmatpush1.bf16.msra.mxu0 %v3379_v35  ;;  %1531 = vmatpush1.bf16.msra.mxu1 %v3382_v36  ;;  %v3474_v35 = vld [vmem:[#allocation5 + $0x4c8] ss:$16 sps:$4 sm:$0xff]   ;;  %v3479_v36 = vld [vmem:[#allocation5 + $0x4e4] ss:$16 sps:$4 sm:$0xff]  }
  0xaa   :  { %1368 = vmatprep.subr.bf16.mxu0 %v3387_v37  ;;  %1532 = vmatprep.subr.bf16.mxu1 %v3390_v38  ;;  %v3482_v37 = vld [vmem:[#allocation5 + $0x4ec] ss:$16 sps:$4 sm:$0xff]   ;;  %v3477_v38 = vld [vmem:[#allocation5 + $0x4e0] ss:$16 sps:$4 sm:$0xff]  }
  0xad   :  { %1369 = vmatpush1.bf16.msra.mxu0 %v3385_v39  ;;  %1533 = vmatpush1.bf16.msra.mxu1 %v3388_v40  ;;  %v3480_v39 = vld [vmem:[#allocation5 + $0x4e8] ss:$16 sps:$4 sm:$0xff]   ;;  %v3485_v40 = vld [vmem:[#allocation5 + $0x504] ss:$16 sps:$4 sm:$0xff]  }
  0xae   :  { %1370 = vmatprep.subr.bf16.mxu0 %v3393_v41  ;;  %1534 = vmatprep.subr.bf16.mxu1 %v3396_v42  ;;  %v3488_v41 = vld [vmem:[#allocation5 + $0x50c] ss:$16 sps:$4 sm:$0xff]   ;;  %v3483_v42 = vld [vmem:[#allocation5 + $0x500] ss:$16 sps:$4 sm:$0xff]  }
  0xb1   :  { %1371 = vmatpush1.bf16.msra.mxu0 %v3391_v43  ;;  %1535 = vmatpush1.bf16.msra.mxu1 %v3394_v44  ;;  %v3486_v43 = vld [vmem:[#allocation5 + $0x508] ss:$16 sps:$4 sm:$0xff]   ;;  %v3491_v44 = vld [vmem:[#allocation5 + $0x524] ss:$16 sps:$4 sm:$0xff]  }
  0xb2   :  { %1372 = vmatprep.subr.bf16.mxu0 %v3399_v45  ;;  %1536 = vmatprep.subr.bf16.mxu1 %v3402_v46  ;;  %v3494_v45 = vld [vmem:[#allocation5 + $0x52c] ss:$16 sps:$4 sm:$0xff]   ;;  %v3489_v46 = vld [vmem:[#allocation5 + $0x520] ss:$16 sps:$4 sm:$0xff]  }
  0xb5   :  { %1373 = vmatpush1.bf16.msra.mxu0 %v3397_v47  ;;  %1537 = vmatpush1.bf16.msra.mxu1 %v3400_v48  ;;  %v3492_v47 = vld [vmem:[#allocation5 + $0x528] ss:$16 sps:$4 sm:$0xff]   ;;  %v3497_v48 = vld [vmem:[#allocation5 + $0x544] ss:$16 sps:$4 sm:$0xff]  }
  0xb6   :  { %1374 = vmatprep.subr.bf16.mxu0 %v3405_v49  ;;  %1538 = vmatprep.subr.bf16.mxu1 %v3408_v50  ;;  %v3500_v49 = vld [vmem:[#allocation5 + $0x54c] ss:$16 sps:$4 sm:$0xff]   ;;  %v3495_v50 = vld [vmem:[#allocation5 + $0x540] ss:$16 sps:$4 sm:$0xff]  }
  0xb9   :  { %1375 = vmatpush1.bf16.msra.mxu0 %v3403_v51  ;;  %1539 = vmatpush1.bf16.msra.mxu1 %v3406_v52  ;;  %v3498_v51 = vld [vmem:[#allocation5 + $0x548] ss:$16 sps:$4 sm:$0xff]   ;;  %v3503_v52 = vld [vmem:[#allocation5 + $0x564] ss:$16 sps:$4 sm:$0xff]  }
  0xba   :  { %1376 = vmatprep.subr.bf16.mxu0 %v3411_v53  ;;  %1540 = vmatprep.subr.bf16.mxu1 %v3414_v54  ;;  %v3506_v53 = vld [vmem:[#allocation5 + $0x56c] ss:$16 sps:$4 sm:$0xff]   ;;  %v3501_v54 = vld [vmem:[#allocation5 + $0x560] ss:$16 sps:$4 sm:$0xff]  }
  0xbd   :  { %1377 = vmatpush1.bf16.msra.mxu0 %v3409_v55  ;;  %1541 = vmatpush1.bf16.msra.mxu1 %v3412_v56  ;;  %v3504_v55 = vld [vmem:[#allocation5 + $0x568] ss:$16 sps:$4 sm:$0xff]   ;;  %v3509_v56 = vld [vmem:[#allocation5 + $0x584] ss:$16 sps:$4 sm:$0xff]  }
  0xbe   :  { %1378 = vmatprep.subr.bf16.mxu0 %v3417_v57  ;;  %1542 = vmatprep.subr.bf16.mxu1 %v3420_v58  ;;  %v3512_v57 = vld [vmem:[#allocation5 + $0x58c] ss:$16 sps:$4 sm:$0xff]   ;;  %v3507_v58 = vld [vmem:[#allocation5 + $0x580] ss:$16 sps:$4 sm:$0xff]  }
  0xc1   :  { %1379 = vmatpush1.bf16.msra.mxu0 %v3415_v59  ;;  %1543 = vmatpush1.bf16.msra.mxu1 %v3418_v60  ;;  %v3510_v59 = vld [vmem:[#allocation5 + $0x588] ss:$16 sps:$4 sm:$0xff]   ;;  %v3515_v60 = vld [vmem:[#allocation5 + $0x5a4] ss:$16 sps:$4 sm:$0xff]  }
  0xc2   :  { %1380 = vmatprep.subr.bf16.mxu0 %v3423_v61  ;;  %1544 = vmatprep.subr.bf16.mxu1 %v3426_v62  ;;  %v3518_v61 = vld [vmem:[#allocation5 + $0x5ac] ss:$16 sps:$4 sm:$0xff]   ;;  %v3513_v62 = vld [vmem:[#allocation5 + $0x5a0] ss:$16 sps:$4 sm:$0xff]  }
  0xc5   :  { %1381 = vmatpush1.bf16.msra.mxu0 %v3421_v63  ;;  %1545 = vmatpush1.bf16.msra.mxu1 %v3424_v0  ;;  %v3516_v63 = vld [vmem:[#allocation5 + $0x5a8] ss:$16 sps:$4 sm:$0xff]   ;;  %v3521_v0 = vld [vmem:[#allocation5 + $0x5c4] ss:$16 sps:$4 sm:$0xff]  }
  0xc6   :  { %1382 = vmatprep.subr.bf16.mxu0 %v3429_v1  ;;  %1546 = vmatprep.subr.bf16.mxu1 %v3432_v2  ;;  %v3524_v1 = vld [vmem:[#allocation5 + $0x5cc] ss:$16 sps:$4 sm:$0xff]   ;;  %v3519_v2 = vld [vmem:[#allocation5 + $0x5c0] ss:$16 sps:$4 sm:$0xff]  }
  0xc9   :  { %1383 = vmatpush1.bf16.msra.mxu0 %v3427_v3  ;;  %1547 = vmatpush1.bf16.msra.mxu1 %v3430_v4  ;;  %v3522_v3 = vld [vmem:[#allocation5 + $0x5c8] ss:$16 sps:$4 sm:$0xff]   ;;  %v3527_v4 = vld [vmem:[#allocation5 + $0x5e4] ss:$16 sps:$4 sm:$0xff]  }
  0xca   :  { %1393 = vmatprep.subr.bf16.mxu0 %v3437_v5  ;;  %1557 = vmatprep.subr.bf16.mxu1 %v3440_v6  ;;  %v3530_v5 = vld [vmem:[#allocation5 + $0x5ec] ss:$16 sps:$4 sm:$0xff]   ;;  %v3525_v6 = vld [vmem:[#allocation5 + $0x5e0] ss:$16 sps:$4 sm:$0xff]  }
  0xcc   :  { %1385 = vmatmul.mubr.bf16.vlgmr.msra.gmra.mrb[0].mxu0 %v2772_v7  ;;  %1549 = vmatmul.mubr.bf16.vlgmr.msra.gmra.mrb[0].mxu1 %v2772_v7  ;;  %v3528_v7 = vld [vmem:[#allocation5 + $0x5e8] ss:$16 sps:$4 sm:$0xff]  }
  0xcd   :  { %1394 = vmatpush1.bf16.msra.mxu0 %v3435_v8  ;;  %1558 = vmatpush1.bf16.msra.mxu1 %v3438_v9  ;;  %v3535_v8 = vld [vmem:[#allocation5 + $0x604] ss:$16 sps:$4 sm:$0xff]   ;;  %v3538_v9 = vld [vmem:[#allocation5 + $0x60c] ss:$16 sps:$4 sm:$0xff]  }
  0xce   :  { %1395 = vmatprep.subr.bf16.mxu0 %v3443_v10  ;;  %1559 = vmatprep.subr.bf16.mxu1 %v3446_v12  ;;  %v3533_v10 = vld [vmem:[#allocation5 + $0x600] ss:$16 sps:$4 sm:$0xff]   ;;  %v3536_v12 = vld [vmem:[#allocation5 + $0x608] ss:$16 sps:$4 sm:$0xff]  }
  0xcf   :  { %1425 = vmatprep.mubr.bf16.mxu0 %v2775_v13  ;;  %1589 = vmatprep.mubr.bf16.mxu1 %v2775_v13  ;;  %v2774_v13 = vcombine.low %v3918_v11, %v3918_v11  ;;  %v3545_v11 = vld [vmem:[#allocation7 + $0x1c] ss:$12 sps:$4 sm:$0xff]  }
  0xd1   :  { %1396 = vmatpush1.bf16.msra.mxu0 %v3441_v14  ;;  %1560 = vmatpush1.bf16.msra.mxu1 %v3444_v15  ;;  %v3542_v14 = vld [vmem:[#allocation7 + $0x4] ss:$12 sps:$4 sm:$0xff]   ;;  %v3567_v15 = vld [vmem:[#allocation7 + $0xc8] ss:$12 sps:$4 sm:$0xff]  }
  0xd2   :  { %1397 = vmatprep.subr.bf16.mxu0 %v3449_v16  ;;  %1561 = vmatprep.subr.bf16.mxu1 %v3452_v17  ;;  %v3820_v16 = vmov 0   ;;  %v3539_v17 = vld [vmem:[#allocation2 + $0x18] ss:$0 sps:$4 sm:$0xff]  }
  0xd5   :  { %1398 = vmatpush1.bf16.msra.mxu0 %v3447_v18  ;;  %1562 = vmatpush1.bf16.msra.mxu1 %v3450_v19  ;;  %v3540_v18 = vld [vmem:[#allocation7] ss:$12 sps:$4 sm:$0xff]   ;;  %v3568_v19 = vld [vmem:[#allocation7 + $0x8] ss:$12 sps:$4 sm:$0xff]  }
  0xd6   :  { %1399 = vmatprep.subr.bf16.mxu0 %v3455_v20  ;;  %1563 = vmatprep.subr.bf16.mxu1 %v3458_v21  ;;  %v3572_v20 = vld [vmem:[#allocation7 + $0xe0] ss:$12 sps:$4 sm:$0xff]   ;;  %v3543_v21 = vld [vmem:[#allocation7 + $0x18] ss:$12 sps:$4 sm:$0xff]  }
  0xd9   :  { %1400 = vmatpush1.bf16.msra.mxu0 %v3453_v22  ;;  %1564 = vmatpush1.bf16.msra.mxu1 %v3456_v23  ;;  %v3573_v22 = vld [vmem:[#allocation7 + $0x20] ss:$12 sps:$4 sm:$0xff]  }
  0xda   :  { %1401 = vmatprep.subr.bf16.mxu0 %v3461_v24  ;;  %1565 = vmatprep.subr.bf16.mxu1 %v3464_v25  ;;  %v3548_v23 = vld [vmem:[#allocation7 + $0x34] ss:$12 sps:$4 sm:$0xff]   ;;  %v3577_v24 = vld [vmem:[#allocation7 + $0xf8] ss:$12 sps:$4 sm:$0xff]   ;;  %v3546_v25 = vld [vmem:[#allocation7 + $0x30] ss:$12 sps:$4 sm:$0xff]  }
  0xdd   :  { %1402 = vmatpush1.bf16.msra.mxu0 %v3459_v26  ;;  %1566 = vmatpush1.bf16.msra.mxu1 %v3462_v27  ;;  %v3578_v26 = vld [vmem:[#allocation7 + $0x38] ss:$12 sps:$4 sm:$0xff]  }
  0xde   :  { %1403 = vmatprep.subr.bf16.mxu0 %v3467_v28  ;;  %1567 = vmatprep.subr.bf16.mxu1 %v3470_v29  ;;  %v3551_v27 = vld [vmem:[#allocation7 + $0x4c] ss:$12 sps:$4 sm:$0xff]   ;;  %v3582_v28 = vld [vmem:[#allocation7 + $0x110] ss:$12 sps:$4 sm:$0xff]   ;;  %v3549_v29 = vld [vmem:[#allocation7 + $0x48] ss:$12 sps:$4 sm:$0xff]  }
  0xe1   :  { %1404 = vmatpush1.bf16.msra.mxu0 %v3465_v30  ;;  %1568 = vmatpush1.bf16.msra.mxu1 %v3468_v31  ;;  %v3583_v30 = vld [vmem:[#allocation7 + $0x50] ss:$12 sps:$4 sm:$0xff]  }
  0xe2   :  { %1405 = vmatprep.subr.bf16.mxu0 %v3473_v32  ;;  %1569 = vmatprep.subr.bf16.mxu1 %v3476_v33  ;;  %v3554_v31 = vld [vmem:[#allocation7 + $0x64] ss:$12 sps:$4 sm:$0xff]   ;;  %v3587_v32 = vld [vmem:[#allocation7 + $0x128] ss:$12 sps:$4 sm:$0xff]   ;;  %v3552_v33 = vld [vmem:[#allocation7 + $0x60] ss:$12 sps:$4 sm:$0xff]  }
  0xe5   :  { %1406 = vmatpush1.bf16.msra.mxu0 %v3471_v34  ;;  %1570 = vmatpush1.bf16.msra.mxu1 %v3474_v35  ;;  %v3588_v34 = vld [vmem:[#allocation7 + $0x68] ss:$12 sps:$4 sm:$0xff]  }
  0xe6   :  { %1407 = vmatprep.subr.bf16.mxu0 %v3479_v36  ;;  %1571 = vmatprep.subr.bf16.mxu1 %v3482_v37  ;;  %v3557_v35 = vld [vmem:[#allocation7 + $0x7c] ss:$12 sps:$4 sm:$0xff]   ;;  %v3592_v36 = vld [vmem:[#allocation7 + $0x140] ss:$12 sps:$4 sm:$0xff]   ;;  %v3555_v37 = vld [vmem:[#allocation7 + $0x78] ss:$12 sps:$4 sm:$0xff]  }
  0xe9   :  { %1408 = vmatpush1.bf16.msra.mxu0 %v3477_v38  ;;  %1572 = vmatpush1.bf16.msra.mxu1 %v3480_v39  ;;  %v3593_v38 = vld [vmem:[#allocation7 + $0x80] ss:$12 sps:$4 sm:$0xff]  }
  0xea   :  { %1409 = vmatprep.subr.bf16.mxu0 %v3485_v40  ;;  %1573 = vmatprep.subr.bf16.mxu1 %v3488_v41  ;;  %v3560_v39 = vld [vmem:[#allocation7 + $0x94] ss:$12 sps:$4 sm:$0xff]   ;;  %v3558_v40 = vld [vmem:[#allocation7 + $0x90] ss:$12 sps:$4 sm:$0xff]   ;;  %v3563_v41 = vld [vmem:[#allocation7 + $0xac] ss:$12 sps:$4 sm:$0xff]  }
  0xed   :  { %1410 = vmatpush1.bf16.msra.mxu0 %v3483_v42  ;;  %1574 = vmatpush1.bf16.msra.mxu1 %v3486_v43  ;;  %v3561_v42 = vld [vmem:[#allocation7 + $0xa8] ss:$12 sps:$4 sm:$0xff]   ;;  %v3566_v43 = vld [vmem:[#allocation7 + $0xc4] ss:$12 sps:$4 sm:$0xff]  }
  0xee   :  { %1411 = vmatprep.subr.bf16.mxu0 %v3491_v44  ;;  %1575 = vmatprep.subr.bf16.mxu1 %v3494_v45  ;;  %v3564_v44 = vld [vmem:[#allocation7 + $0xc0] ss:$12 sps:$4 sm:$0xff]   ;;  %v3571_v45 = vld [vmem:[#allocation7 + $0xdc] ss:$12 sps:$4 sm:$0xff]  }
  0xf1   :  { %1412 = vmatpush1.bf16.msra.mxu0 %v3489_v46  ;;  %1576 = vmatpush1.bf16.msra.mxu1 %v3492_v47  ;;  %v3569_v46 = vld [vmem:[#allocation7 + $0xd8] ss:$12 sps:$4 sm:$0xff]   ;;  %v3576_v47 = vld [vmem:[#allocation7 + $0xf4] ss:$12 sps:$4 sm:$0xff]  }
  0xf2   :  { %1413 = vmatprep.subr.bf16.mxu0 %v3497_v48  ;;  %1577 = vmatprep.subr.bf16.mxu1 %v3500_v49  ;;  %v3574_v48 = vld [vmem:[#allocation7 + $0xf0] ss:$12 sps:$4 sm:$0xff]   ;;  %v3581_v49 = vld [vmem:[#allocation7 + $0x10c] ss:$12 sps:$4 sm:$0xff]  }
  0xf5   :  { %1414 = vmatpush1.bf16.msra.mxu0 %v3495_v50  ;;  %1578 = vmatpush1.bf16.msra.mxu1 %v3498_v51  ;;  %v3579_v50 = vld [vmem:[#allocation7 + $0x108] ss:$12 sps:$4 sm:$0xff]   ;;  %v3586_v51 = vld [vmem:[#allocation7 + $0x124] ss:$12 sps:$4 sm:$0xff]  }
  0xf6   :  { %1415 = vmatprep.subr.bf16.mxu0 %v3503_v52  ;;  %1579 = vmatprep.subr.bf16.mxu1 %v3506_v53  ;;  %v3584_v52 = vld [vmem:[#allocation7 + $0x120] ss:$12 sps:$4 sm:$0xff]   ;;  %v3591_v53 = vld [vmem:[#allocation7 + $0x13c] ss:$12 sps:$4 sm:$0xff]  }
  0xf9   :  { %1416 = vmatpush1.bf16.msra.mxu0 %v3501_v54  ;;  %1580 = vmatpush1.bf16.msra.mxu1 %v3504_v55  ;;  %v3589_v54 = vld [vmem:[#allocation7 + $0x138] ss:$12 sps:$4 sm:$0xff]   ;;  %v3596_v55 = vld [vmem:[#allocation7 + $0x154] ss:$12 sps:$4 sm:$0xff]  }
  0xfa   :  { %1417 = vmatprep.subr.bf16.mxu0 %v3509_v56  ;;  %1581 = vmatprep.subr.bf16.mxu1 %v3512_v57  ;;  %v3597_v56 = vld [vmem:[#allocation7 + $0x158] ss:$12 sps:$4 sm:$0xff]   ;;  %v3594_v57 = vld [vmem:[#allocation7 + $0x150] ss:$12 sps:$4 sm:$0xff]  }
  0xfd   :  { %1418 = vmatpush1.bf16.msra.mxu0 %v3507_v58  ;;  %1582 = vmatpush1.bf16.msra.mxu1 %v3510_v59  ;;  %v3598_v58 = vld [vmem:[#allocation7 + $0x98] ss:$12 sps:$4 sm:$0xff]  }
  0xfe   :  { %1419 = vmatprep.subr.bf16.mxu0 %v3515_v60  ;;  %1583 = vmatprep.subr.bf16.mxu1 %v3518_v61  ;;  %v3601_v59 = vld [vmem:[#allocation7 + $0x16c] ss:$12 sps:$4 sm:$0xff]   ;;  %v3602_v60 = vld [vmem:[#allocation7 + $0x170] ss:$12 sps:$4 sm:$0xff]   ;;  %v3599_v61 = vld [vmem:[#allocation7 + $0x168] ss:$12 sps:$4 sm:$0xff]  }
 0x101   :  { %1420 = vmatpush1.bf16.msra.mxu0 %v3513_v62  ;;  %1584 = vmatpush1.bf16.msra.mxu1 %v3516_v63  ;;  %v3603_v62 = vld [vmem:[#allocation7 + $0xb0] ss:$12 sps:$4 sm:$0xff]  }
 0x102   :  { %1421 = vmatprep.subr.bf16.mxu0 %v3521_v0  ;;  %1585 = vmatprep.subr.bf16.mxu1 %v3524_v1  ;;  %v3606_v63 = vld [vmem:[#allocation7 + $0x184] ss:$12 sps:$4 sm:$0xff]   ;;  %v3607_v0 = vld [vmem:[#allocation7 + $0x248] ss:$12 sps:$4 sm:$0xff]   ;;  %v283_v1 = vlaneseq }
 0x105   :  { %1422 = vmatpush1.bf16.msra.mxu0 %v3519_v2  ;;  %1586 = vmatpush1.bf16.msra.mxu1 %v3522_v3  ;;  %v3924_v2 = vshrl.u32 %v283_v1, 7  ;;  %v3647_v1 = vld [vmem:[#allocation7 + $0x258] ss:$12 sps:$4 sm:$0xff]  }
 0x106   :  { %1423 = vmatprep.subr.bf16.mxu0 %v3527_v4  ;;  %1587 = vmatprep.subr.bf16.mxu1 %v3530_v5  ;;  %v3930_v4 = vld [vmem:[%s3974_s2] sm:$0xf] }
 0x107   :  { %v285_v3 = vsub.s32 0, %v3924_v2  ;;  %v289_v5 = vsub.s32 1, %v3924_v2 }
 0x109   :  { %1424 = vmatpush1.bf16.msra.mxu0 %v3525_v6  ;;  %1588 = vmatpush1.bf16.msra.mxu1 %v3528_v7  ;;  %v297_v6 = vsub.s32 3, %v3924_v2  ;;  %v286_v7 = vrot.slane %v3930_v4, %v285_v3 }
 0x10a   :  { %1434 = vmatprep.subr.bf16.mxu0 %v3535_v8  ;;  %1598 = vmatprep.subr.bf16.mxu1 %v3538_v9  ;;  %v290_v8 = vrot.slane %v3930_v4, %v289_v5 }
 0x10b   :  { %v298_v9 = vrot.slane %v3930_v4, %v297_v6  ;;  %v3650_v6 = vld [vmem:[#allocation7 + $0x270] ss:$12 sps:$4 sm:$0xff]  }
 0x10c   :  { %1426 = vmatmul.mubr.bf16.vlgmr.msra.gmra.mrb[0].mxu0 %v2774_v13  ;;  %1590 = vmatmul.mubr.bf16.vlgmr.msra.gmra.mrb[0].mxu1 %v2774_v13 }
 0x10d   :  { %1435 = vmatpush1.bf16.msra.mxu0 %v3533_v10  ;;  %1599 = vmatpush1.bf16.msra.mxu1 %v3536_v12 }
 0x10e   :  { %1466 = vmatprep.mubr.bf16.mxu0 %v3820_v16  ;;  %1630 = vmatprep.mubr.bf16.mxu1 %v3820_v16 }
 0x10f   :  { %2304 = vmatprep.subr.bf16.mxu0 %v3542_v14  ;;  %3096 = vmatprep.subr.bf16.mxu1 %v3567_v15 }
 0x118   :  { %2973 = vmatmul.mubr.msk.bf16.vlgmr.msra.gmra.mrb[0].mxu0 %vm1307_vm0, %v3539_v17  ;;  %2974 = vmatmul.mubr.msk.bf16.vlgmr.msra.gmra.mrb[0].mxu1 %vm1307_vm0, %v3539_v17 }
 0x119   :  { %2305 = vmatpush1.bf16.msra.mxu0 %v3540_v18  ;;  %3097 = vmatpush3.bf16.msra.mxu1 %v3568_v19 }
 0x11a   :  { %2306 = vmatprep.subr.bf16.mxu0 %v3545_v11  ;;  %3098 = vmatprep.subr.bf16.mxu1 %v3572_v20 }
 0x11d   :  { %2307 = vmatpush1.bf16.msra.mxu0 %v3543_v21  ;;  %3099 = vmatpush3.bf16.msra.mxu1 %v3573_v22 }
 0x11e   :  { %2308 = vmatprep.subr.bf16.mxu0 %v3548_v23  ;;  %3100 = vmatprep.subr.bf16.mxu1 %v3577_v24 }
 0x121   :  { %2309 = vmatpush1.bf16.msra.mxu0 %v3546_v25  ;;  %3101 = vmatpush3.bf16.msra.mxu1 %v3578_v26  ;;  %v3604_v25 = vld [vmem:[#allocation7 + $0x180] ss:$12 sps:$4 sm:$0xff]   ;;  %v3608_v26 = vld [vmem:[#allocation7 + $0x188] ss:$12 sps:$4 sm:$0xff]  }
 0x122   :  { %2310 = vmatprep.subr.bf16.mxu0 %v3551_v27  ;;  %3102 = vmatprep.subr.bf16.mxu1 %v3582_v28  ;;  %v3611_v28 = vld [vmem:[#allocation7 + $0x19c] ss:$12 sps:$4 sm:$0xff]  }
 0x125   :  { %2311 = vmatpush1.bf16.msra.mxu0 %v3549_v29  ;;  %3103 = vmatpush3.bf16.msra.mxu1 %v3583_v30  ;;  %v3612_v29 = vld [vmem:[#allocation7 + $0x260] ss:$12 sps:$4 sm:$0xff]  }
 0x126   :  { %2312 = vmatprep.subr.bf16.mxu0 %v3554_v31  ;;  %3104 = vmatprep.subr.bf16.mxu1 %v3587_v32  ;;  %v3609_v31 = vld [vmem:[#allocation7 + $0x198] ss:$12 sps:$4 sm:$0xff]   ;;  %v3613_v32 = vld [vmem:[#allocation7 + $0x1a0] ss:$12 sps:$4 sm:$0xff]  }
 0x129   :  { %2313 = vmatpush1.bf16.msra.mxu0 %v3552_v33  ;;  %3105 = vmatpush3.bf16.msra.mxu1 %v3588_v34  ;;  %v3616_v33 = vld [vmem:[#allocation7 + $0x1b4] ss:$12 sps:$4 sm:$0xff]   ;;  %v3617_v34 = vld [vmem:[#allocation7 + $0x278] ss:$12 sps:$4 sm:$0xff]  }
 0x12a   :  { %2314 = vmatprep.subr.bf16.mxu0 %v3557_v35  ;;  %3106 = vmatprep.subr.bf16.mxu1 %v3592_v36  ;;  %v3614_v35 = vld [vmem:[#allocation7 + $0x1b0] ss:$12 sps:$4 sm:$0xff]   ;;  %v3618_v36 = vld [vmem:[#allocation7 + $0x1b8] ss:$12 sps:$4 sm:$0xff]  }
 0x12d   :  { %2315 = vmatpush1.bf16.msra.mxu0 %v3555_v37  ;;  %3107 = vmatpush3.bf16.msra.mxu1 %v3593_v38  ;;  %v3621_v37 = vld [vmem:[#allocation7 + $0x1cc] ss:$12 sps:$4 sm:$0xff]   ;;  %v3622_v38 = vld [vmem:[#allocation7 + $0x290] ss:$12 sps:$4 sm:$0xff]  }
 0x12e   :  { %2316 = vmatprep.subr.bf16.mxu0 %v3560_v39  ;;  %3108 = vmatprep.subr.bf16.mxu1 %v3597_v56  ;;  %v3619_v39 = vld [vmem:[#allocation7 + $0x1c8] ss:$12 sps:$4 sm:$0xff]   ;;  %v3641_v56 = vld [vmem:[#allocation7 + $0x22c] ss:$12 sps:$4 sm:$0xff]  }
 0x131   :  { %2317 = vmatpush1.bf16.msra.mxu0 %v3558_v40  ;;  %3109 = vmatpush3.bf16.msra.mxu1 %v3598_v58  ;;  %v3623_v40 = vld [vmem:[#allocation7 + $0x1d0] ss:$12 sps:$4 sm:$0xff]   ;;  %v3639_v58 = vld [vmem:[#allocation7 + $0x228] ss:$12 sps:$4 sm:$0xff]  }
 0x132   :  { %2318 = vmatprep.subr.bf16.mxu0 %v3563_v41  ;;  %3110 = vmatprep.subr.bf16.mxu1 %v3602_v60  ;;  %v3626_v41 = vld [vmem:[#allocation7 + $0x1e4] ss:$12 sps:$4 sm:$0xff]  }
 0x135   :  { %2319 = vmatpush1.bf16.msra.mxu0 %v3561_v42  ;;  %3111 = vmatpush3.bf16.msra.mxu1 %v3603_v62  ;;  %v3627_v42 = vld [vmem:[#allocation7 + $0x2a8] ss:$12 sps:$4 sm:$0xff]   ;;  %v3644_v62 = vld [vmem:[#allocation7 + $0x240] ss:$12 sps:$4 sm:$0xff]  }
 0x136   :  { %2320 = vmatprep.subr.bf16.mxu0 %v3566_v43  ;;  %3118 = vmatprep.subr.bf16.mxu1 %v3607_v0  ;;  %v3624_v43 = vld [vmem:[#allocation7 + $0x1e0] ss:$12 sps:$4 sm:$0xff]   ;;  %v3649_v0 = vld [vmem:[#allocation7 + $0x25c] ss:$12 sps:$4 sm:$0xff]  }
 0x139   :  { %2321 = vmatpush1.bf16.msra.mxu0 %v3564_v44  ;;  %v3628_v44 = vld [vmem:[#allocation7 + $0x1e8] ss:$12 sps:$4 sm:$0xff]  }
 0x13a   :  { %2322 = vmatprep.subr.bf16.mxu0 %v3571_v45  ;;  %v293_v45 = vsub.s32 2, %v3924_v2  ;;  %v3686_v2 = vld [vmem:[#allocation8 + $0x90] sm:$0xff]  }
 0x13d   :  { %2323 = vmatpush1.bf16.msra.mxu0 %v3569_v46  ;;  %v3631_v46 = vld [vmem:[#allocation7 + $0x1fc] ss:$12 sps:$4 sm:$0xff]  }
 0x13e   :  { %2324 = vmatprep.subr.bf16.mxu0 %v3576_v47  ;;  %v3632_v47 = vld [vmem:[#allocation7 + $0x2c0] ss:$12 sps:$4 sm:$0xff]  }
 0x141   :  { %2325 = vmatpush1.bf16.msra.mxu0 %v3574_v48  ;;  %v3629_v48 = vld [vmem:[#allocation7 + $0x1f8] ss:$12 sps:$4 sm:$0xff]  }
 0x142   :  { %2326 = vmatprep.subr.bf16.mxu0 %v3581_v49  ;;  %v3633_v49 = vld [vmem:[#allocation7 + $0x200] ss:$12 sps:$4 sm:$0xff]  }
 0x145   :  { %2327 = vmatpush1.bf16.msra.mxu0 %v3579_v50  ;;  %v294_v50 = vrot.slane %v3930_v4, %v293_v45  ;;  %v3652_v4 = vld [vmem:[#allocation7 + $0x274] ss:$12 sps:$4 sm:$0xff]  }
 0x146   :  { %2328 = vmatprep.subr.bf16.mxu0 %v3586_v51  ;;  %v3636_v51 = vld [vmem:[#allocation7 + $0x214] ss:$12 sps:$4 sm:$0xff]  }
 0x149   :  { %2329 = vmatpush1.bf16.msra.mxu0 %v3584_v52  ;;  %v3637_v52 = vld [vmem:[#allocation7 + $0x2d8] ss:$12 sps:$4 sm:$0xff]  }
 0x14a   :  { %2330 = vmatprep.subr.bf16.mxu0 %v3591_v53  ;;  %v3634_v53 = vld [vmem:[#allocation7 + $0x210] ss:$12 sps:$4 sm:$0xff]  }
 0x14d   :  { %2331 = vmatpush1.bf16.msra.mxu0 %v3589_v54  ;;  %v3638_v54 = vld [vmem:[#allocation7 + $0x218] ss:$12 sps:$4 sm:$0xff]  }
 0x14e   :  { %2332 = vmatprep.subr.bf16.mxu0 %v3596_v55 }
 0x151   :  { %2333 = vmatpush1.bf16.msra.mxu0 %v3594_v57  ;;  %v3642_v57 = vld [vmem:[#allocation7 + $0x2f0] ss:$12 sps:$4 sm:$0xff]  }
 0x152   :  { %2334 = vmatprep.subr.bf16.mxu0 %v3601_v59  ;;  %v3643_v59 = vld [vmem:[#allocation7 + $0x230] ss:$12 sps:$4 sm:$0xff]  }
 0x155   :  { %2335 = vmatpush1.bf16.msra.mxu0 %v3599_v61  ;;  %v3646_v61 = vld [vmem:[#allocation7 + $0x244] ss:$12 sps:$4 sm:$0xff]  }
 0x156   :  { %2345 = vmatprep.subr.bf16.mxu0 %v3606_v63 }
 0x1eb   :  { %v1468_v10 = vpop.f32.mrb[0].mxu0  ;;  %v3941_v12 = vpop.f32.mrb[0].mxu1 }
 0x1ec   :  { %v3191_v13 = vadd.f32 %v1468_v10, %v286_v7  ;;  %v1470_v14 = vpop.f32.mrb[1].mxu0  ;;  %v1634_v15 = vpop.f32.mrb[1].mxu1  ;;  %v3193_v55 = vadd.f32 %v3941_v12, %v294_v50  ;;  %v3655_v7 = vld [vmem:[#allocation7 + $0x28c] ss:$12 sps:$4 sm:$0xff]   ;;  %v3661_v12 = vld [vmem:[#allocation7 + $0x2bc] ss:$12 sps:$4 sm:$0xff]  }
 0x1ed   :  { %v3192_v16 = vadd.f32 %v1470_v14, %v290_v8  ;;  %v3194_v17 = vadd.f32 %v1634_v15, %v298_v9  ;;  %v1472_v18 = vpop.f32.mrb[2].mxu0  ;;  %v1636_v19 = vpop.f32.mrb[2].mxu1  ;;  %v3653_v8 = vld [vmem:[#allocation7 + $0x288] ss:$12 sps:$4 sm:$0xff]   ;;  %v3658_v9 = vld [vmem:[#allocation7 + $0x2a4] ss:$12 sps:$4 sm:$0xff]  }
 0x1ee   :  { %v1639_v11 = vmax.f32 %v3191_v13, 0.0  ;;  %v1473_v20 = vpop.f32.mrb[3].mxu0  ;;  %v1637_v21 = vpop.f32.mrb[3].mxu1  ;;  %v1641_v60 = vmax.f32 %v3193_v55, 0.0  ;;  %v3656_v10 = vld [vmem:[#allocation7 + $0x2a0] ss:$12 sps:$4 sm:$0xff]  }
 0x1ef   :  { %v1640_v22 = vmax.f32 %v3192_v16, 0.0  ;;  %v1642_v23 = vmax.f32 %v3194_v17, 0.0  ;;  %v3659_v13 = vld [vmem:[#allocation7 + $0x2b8] ss:$12 sps:$4 sm:$0xff]   ;;  %v3664_v14 = vld [vmem:[#allocation7 + $0x2d4] ss:$12 sps:$4 sm:$0xff]  }
 0x1f0   :  { %v1643_v27 = vpack.c.bf16 %v1639_v11, %v1639_v11  ;;  %v1645_v63 = vpack.c.bf16 %v1641_v60, %v1641_v60  ;;  %v3662_v15 = vld [vmem:[#allocation7 + $0x2d0] ss:$12 sps:$4 sm:$0xff]   ;;  %v3667_v16 = vld [vmem:[#allocation7 + $0x2ec] ss:$12 sps:$4 sm:$0xff]   ;;  %v3665_v17 = vld [vmem:[#allocation7 + $0x2e8] ss:$12 sps:$4 sm:$0xff]  }
 0x1f1   :  { %v1644_v24 = vpack.c.bf16 %v1640_v22, %v1640_v22  ;;  %v1646_v30 = vpack.c.bf16 %v1642_v23, %v1642_v23  ;;  %v3668_v18 = vld [vmem:[#allocation8 + $0x40] sm:$0xff]   ;;  %v3670_v11 = vld [vmem:[#allocation8 + $0x48] sm:$0xff]   ;;  %v3672_v21 = vld [vmem:[#allocation8 + $0x50] sm:$0xff]  }
 0x1f2   :  { %v3669_v19 = vld [vmem:[#allocation8] sm:$0xff]   ;;  %v3671_v20 = vld [vmem:[#allocation8 + $0x8] sm:$0xff]   ;;  %v3673_v22 = vld [vmem:[#allocation8 + $0x10] sm:$0xff]  }
 0x1f3   :  { %2336 = vmatprep.mubr.bf16.mxu0 %v1644_v24  ;;  %2418 = vmatprep.mubr.bf16.mxu1 %v1644_v24  ;;  %v3674_v23 = vld [vmem:[#allocation8 + $0x58] sm:$0xff]  }
 0x1f4   :  { %2337 = vmatmul.mubr.bf16.vlgmr.msra.gmra.mrb[4].mxu0 %v1643_v27  ;;  %2419 = vmatmul.mubr.bf16.vlgmr.msra.gmra.mrb[4].mxu1 %v1643_v27  ;;  %v3675_v24 = vld [vmem:[#allocation8 + $0x18] sm:$0xff]   ;;  %v3678_v27 = vld [vmem:[#allocation8 + $0x68] sm:$0xff]  }
 0x1f5   :  { %2346 = vmatpush1.bf16.msra.mxu0 %v3604_v25  ;;  %3119 = vmatpush3.bf16.msra.mxu1 %v3608_v26  ;;  %v3676_v25 = vld [vmem:[#allocation8 + $0x60] sm:$0xff]  }
 0x1f6   :  { %2377 = vmatprep.mubr.bf16.mxu0 %v1646_v30  ;;  %2458 = vmatprep.mubr.bf16.mxu1 %v1646_v30  ;;  %v3677_v26 = vld [vmem:[#allocation8 + $0x20] sm:$0xff]   ;;  %v3681_v30 = vld [vmem:[#allocation8 + $0x30] sm:$0xff]  }
 0x1f7   :  { %2347 = vmatprep.subr.bf16.mxu0 %v3611_v28  ;;  %3120 = vmatprep.subr.bf16.mxu1 %v3612_v29  ;;  %v3679_v28 = vld [vmem:[#allocation8 + $0x28] sm:$0xff]   ;;  %v3680_v29 = vld [vmem:[#allocation8 + $0x70] sm:$0xff]  }
 0x1f9   :  { %2348 = vmatpush1.bf16.msra.mxu0 %v3609_v31  ;;  %3121 = vmatpush3.bf16.msra.mxu1 %v3613_v32  ;;  %v3682_v31 = vld [vmem:[#allocation8 + $0x78] sm:$0xff]  }
 0x1fa   :  { %2349 = vmatprep.subr.bf16.mxu0 %v3616_v33  ;;  %3122 = vmatprep.subr.bf16.mxu1 %v3617_v34  ;;  %v3683_v32 = vld [vmem:[#allocation8 + $0x38] sm:$0xff]   ;;  %v3821_v33 = vmov 0.0  }
 0x1fd   :  { %2350 = vmatpush1.bf16.msra.mxu0 %v3614_v35  ;;  %3123 = vmatpush3.bf16.msra.mxu1 %v3618_v36 }
 0x1fe   :  { %2351 = vmatprep.subr.bf16.mxu0 %v3621_v37  ;;  %3124 = vmatprep.subr.bf16.mxu1 %v3622_v38 }
 0x201   :  { %2352 = vmatpush1.bf16.msra.mxu0 %v3619_v39  ;;  %3125 = vmatpush3.bf16.msra.mxu1 %v3623_v40  ;;  %v1775_v39 = vld [vmem:[%s3976_s4] sm:$0x7] }
 0x202   :  { %2353 = vmatprep.subr.bf16.mxu0 %v3626_v41  ;;  %3126 = vmatprep.subr.bf16.mxu1 %v3627_v42  ;;  %v1788_v40 = vrot.slane %v1775_v39, %v293_v45  ;;  %v1784_v50 = vrot.slane %v1775_v39, %v289_v5  ;;  %v3688_v5 = vld [vmem:[#allocation8 + $0xa0] sm:$0xff]  }
 0x205   :  { %2354 = vmatpush1.bf16.msra.mxu0 %v3624_v43  ;;  %3127 = vmatpush3.bf16.msra.mxu1 %v3628_v44 }
 0x206   :  { %2355 = vmatprep.subr.bf16.mxu0 %v3631_v46  ;;  %3128 = vmatprep.subr.bf16.mxu1 %v3632_v47 }
 0x209   :  { %2356 = vmatpush1.bf16.msra.mxu0 %v3629_v48  ;;  %3129 = vmatpush3.bf16.msra.mxu1 %v3633_v49  ;;  %v1780_v49 = vrot.slane %v1775_v39, %v285_v3  ;;  %v3687_v3 = vld [vmem:[#allocation8 + $0x98] sm:$0xff]  }
 0x20a   :  { %2357 = vmatprep.subr.bf16.mxu0 %v3636_v51  ;;  %3130 = vmatprep.subr.bf16.mxu1 %v3637_v52 }
 0x20d   :  { %2358 = vmatpush1.bf16.msra.mxu0 %v3634_v53  ;;  %3131 = vmatpush3.bf16.msra.mxu1 %v3638_v54 }
 0x20e   :  { %2359 = vmatprep.subr.bf16.mxu0 %v3641_v56  ;;  %3132 = vmatprep.subr.bf16.mxu1 %v3642_v57 }
 0x211   :  { %2360 = vmatpush1.bf16.msra.mxu0 %v3639_v58  ;;  %3133 = vmatpush3.bf16.msra.mxu1 %v3643_v59  ;;  %v3684_v59 = vld [vmem:[#allocation8 + $0x80] sm:$0xff]  }
 0x212   :  { %2361 = vmatprep.subr.bf16.mxu0 %v3646_v61  ;;  %3140 = vmatprep.subr.bf16.mxu1 %v3668_v18  ;;  %v3685_v61 = vld [vmem:[#allocation8 + $0x88] sm:$0xff]  }
 0x214   :  { %2459 = vmatmul.mubr.bf16.vlgmr.msra.gmra.mrb[8].mxu1 %v1645_v63 }
 0x215   :  { %2362 = vmatpush1.bf16.msra.mxu0 %v3644_v62  ;;  %3141 = vmatpush3.bf16.msra.mxu1 %v3669_v19  ;;  %v3689_v62 = vld [vmem:[#allocation8 + $0xa8] sm:$0xff]  }
 0x216   :  { %2363 = vmatprep.subr.bf16.mxu0 %v3649_v0  ;;  %3142 = vmatprep.subr.bf16.mxu1 %v3670_v11  ;;  %v3691_v0 = vld [vmem:[#allocation8 + $0xb8] sm:$0xff]  }
 0x219   :  { %2364 = vmatpush1.bf16.msra.mxu0 %v3647_v1  ;;  %3143 = vmatpush3.bf16.msra.mxu1 %v3671_v20 }
 0x21a   :  { %2365 = vmatprep.subr.bf16.mxu0 %v3652_v4  ;;  %3144 = vmatprep.subr.bf16.mxu1 %v3672_v21 }
 0x21d   :  { %2366 = vmatpush1.bf16.msra.mxu0 %v3650_v6  ;;  %3145 = vmatpush3.bf16.msra.mxu1 %v3673_v22 }
 0x21e   :  { %2367 = vmatprep.subr.bf16.mxu0 %v3655_v7  ;;  %3146 = vmatprep.subr.bf16.mxu1 %v3674_v23 }
 0x221   :  { %2368 = vmatpush1.bf16.msra.mxu0 %v3653_v8  ;;  %3147 = vmatpush3.bf16.msra.mxu1 %v3675_v24 }
 0x222   :  { %2369 = vmatprep.subr.bf16.mxu0 %v3658_v9  ;;  %3148 = vmatprep.subr.bf16.mxu1 %v3676_v25 }
 0x225   :  { %2370 = vmatpush1.bf16.msra.mxu0 %v3656_v10  ;;  %3149 = vmatpush3.bf16.msra.mxu1 %v3677_v26 }
 0x226   :  { %2371 = vmatprep.subr.bf16.mxu0 %v3661_v12  ;;  %3150 = vmatprep.subr.bf16.mxu1 %v3678_v27  ;;  %v3071_v12 = vld [vmem:[%s3978_s6] ss:$0 sm:$0xff] }
 0x229   :  { %2372 = vmatpush1.bf16.msra.mxu0 %v3659_v13  ;;  %3151 = vmatpush3.bf16.msra.mxu1 %v3679_v28 }
 0x22a   :  { %2373 = vmatprep.subr.bf16.mxu0 %v3664_v14  ;;  %3152 = vmatprep.subr.bf16.mxu1 %v3680_v29 }
 0x22d   :  { %2374 = vmatpush1.bf16.msra.mxu0 %v3662_v15  ;;  %3153 = vmatpush3.bf16.msra.mxu1 %v3681_v30 }
 0x22e   :  { %2375 = vmatprep.subr.bf16.mxu0 %v3667_v16  ;;  %3154 = vmatprep.subr.bf16.mxu1 %v3682_v31 }
 0x231   :  { %2376 = vmatpush1.bf16.msra.mxu0 %v3665_v17  ;;  %3155 = vmatpush3.bf16.msra.mxu1 %v3683_v32 }
 0x232   :  { %3171 = vmatprep.subr.bf16.mxu1 %v3821_v33 }
 0x234   :  { %2378 = vmatmul.mubr.bf16.vlgmr.msra.gmra.mrb[4].mxu0 %v1645_v63  ;;  %v3690_v63 = vld [vmem:[#allocation8 + $0xb0] sm:$0xff]  }
 0x2c7   :  { %v3112_v34 = vpop.f32.mrb[4].mxu1 }
 0x2c8   :  { %v3113_v35 = vpop.f32.mrb[5].mxu1 }
 0x2c9   :  { %v3114_v36 = vadd.f32 %v3113_v35, %v3112_v34  ;;  %v3115_v37 = vpop.f32.mrb[6].mxu1 }
 0x2ca   :  { %v3116_v38 = vpop.f32.mrb[7].mxu1 }
 0x2cb   :  { %v2421_v43 = vadd.f32 %v3114_v36, %v1788_v40 }
 0x2e7   :  { %v3134_v41 = vpop.f32.mrb[8].mxu1 }
 0x2e8   :  { %v3135_v42 = vpop.f32.mrb[9].mxu1 }
 0x2e9   :  { %v3136_v44 = vadd.f32 %v3135_v42, %v3134_v41  ;;  %v3137_v46 = vpop.f32.mrb[10].mxu1 }
 0x2ea   :  { %v3138_v47 = vpop.f32.mrb[11].mxu1 }
 0x2eb   :  { %v2461_v48 = vadd.f32 %v3136_v44, %v2421_v43 }
 0x2ed   :  { %v2468_v1 = vmax.f32 %v2461_v48, 0.0 }
 0x2ef   :  { %v2471_v4 = vpack.c.bf16 %v2468_v1, %v2468_v1 }
 0x307   :  { %v2379_v51 = vpop.f32.mrb[4].mxu0 }
 0x308   :  { %v3195_v52 = vadd.f32 %v2379_v51, %v1780_v49  ;;  %v2381_v53 = vpop.f32.mrb[5].mxu0 }
 0x309   :  { %v3196_v54 = vadd.f32 %v2381_v53, %v1784_v50  ;;  %v2383_v55 = vpop.f32.mrb[6].mxu0 }
 0x30a   :  { %v2466_v56 = vmax.f32 %v3195_v52, 0.0  ;;  %v2384_v45 = vpop.f32.mrb[7].mxu0 }
 0x30b   :  { %v2467_v57 = vmax.f32 %v3196_v54, 0.0 }
 0x30c   :  { %v2469_v60 = vpack.c.bf16 %v2466_v56, %v2466_v56 }
 0x30d   :  { %v2470_v58 = vpack.c.bf16 %v2467_v57, %v2467_v57 }
 0x30f   :  { %2703 = vmatprep.mubr.bf16.mxu1 %v2470_v58 }
 0x310   :  { %2704 = vmatmul.mubr.bf16.vlgmr.msra.gmra.mrb[12].mxu1 %v2469_v60 }
 0x311   :  { %3172 = vmatpush3.bf16.msra.mxu1 %v3684_v59  ;;  %3187 = vmatprep.mubr.msk.bf16.mxu1 %vm3822_vm1, %v3821_v33 }
 0x312   :  { %3173 = vmatprep.subr.bf16.mxu1 %v3821_v33 }
 0x315   :  { %3174 = vmatpush3.bf16.msra.mxu1 %v3685_v61 }
 0x316   :  { %3175 = vmatprep.subr.bf16.mxu1 %v3821_v33 }
 0x319   :  { %3176 = vmatpush3.bf16.msra.mxu1 %v3686_v2 }
 0x31a   :  { %3177 = vmatprep.subr.bf16.mxu1 %v3821_v33 }
 0x31d   :  { %3178 = vmatpush3.bf16.msra.mxu1 %v3687_v3 }
 0x31e   :  { %3179 = vmatprep.subr.bf16.mxu1 %v3821_v33 }
 0x321   :  { %3180 = vmatpush3.bf16.msra.mxu1 %v3688_v5 }
 0x322   :  { %3181 = vmatprep.subr.bf16.mxu1 %v3821_v33 }
 0x325   :  { %3182 = vmatpush3.bf16.msra.mxu1 %v3689_v62 }
 0x326   :  { %3183 = vmatprep.subr.bf16.mxu1 %v3821_v33 }
 0x329   :  { %3184 = vmatpush3.bf16.msra.mxu1 %v3690_v63 }
 0x32a   :  { %3185 = vmatprep.subr.bf16.mxu1 %v3821_v33 }
 0x32d   :  { %3186 = vmatpush3.bf16.msra.mxu1 %v3691_v0 }
 0x330   :  { %3188 = vmatmul.mubr.bf16.vlgmr.msra.gmra.mrb[16].mxu1 %v2471_v4 }
 0x3e3   :  { %v3156_v6 = vpop.f32.mrb[12].mxu1 }
 0x3e4   :  { %v3157_v7 = vpop.f32.mrb[13].mxu1 }
 0x3e5   :  { %v3158_v8 = vadd.f32 %v3157_v7, %v3156_v6  ;;  %v3159_v9 = vpop.f32.mrb[14].mxu1 }
 0x3e6   :  { %v3160_v10 = vpop.f32.mrb[15].mxu1 }
 0x3e7   :  { %v2706_v13 = vadd.f32 %v3158_v8, %v3071_v12 }
 0x403   :  { %v2745_v14 = vpop.f32.mrb[16].mxu1 }
 0x404   :  { %v2746_v15 = vadd.f32 %v2745_v14, %v2706_v13  ;;  %v3189_v16 = vpop.f32.mrb[17].mxu1 }
 0x405   :  { %v2748_v17 = vpop.f32.mrb[18].mxu1 }
 0x406   :  { %v2751_v18 = vmax.f32 %v2746_v15, 0.0  ;;  %v3190_v19 = vpop.f32.mrb[19].mxu1 }
 0x408   :  { %2752 = vst [vmem:[#allocation10] sm:$0xff] %v2751_v18 }
 0x409   :  { %3791 = shalt.err (!%p3788_p8)
}
 0x40a   :  { %s3792_s12 = scalar_lea.hbm %s3979_s7, 128 }
 0x40b   :  { %p3793_p9 = scmp.ne.s32.totalorder %s3979_s7, %s3792_s12  ;;  %p3796_p10 = scmp.lt.u32.totalorder %s3792_s12, %s3979_s7 }
 0x40d   :  { %p3798_p11 = pnand %p3796_p10, %p3793_p9 }
 0x40f   :  { %3801 = shalt.err (!%p3798_p11)
}
 0x410   :  { %2762 = dma.vmem_to_hbm [thread:$0]  %s2760_s9, 128, %s3979_s7, [#allocation4]  }
 0x411   :  { %3808 = dma.done.wait [#allocation4], 128  }
 0x412   :  { %3809 = vsyncadd [#allocation4], 4294967168 }
 0x413   :  { %2766 = vsyncpa [#allocation3], 1 }
 0x414   :  { %2767 = vsyncpa [#allocation6], 1 }
 0x415   :  { %2768 = vsyncpa [#allocation9], 1 }
 0x416   :  { %2769 = vsyncpa [#allocation4], 1 }

</bundles_post_ra>
